<compile_context>
chip_gen: v5e
topology: v5e:2x2
jax: 0.10.0
libtpu: 0.0.40
codegen_flags: <defaults>
</compile_context>

<pallas_src>
import functools

import jax
import jax.numpy as jnp
from jax.experimental import pallas as pl
from jax.experimental.pallas import tpu as pltpu

# ----------------------------- model config ---------------------------------
VOCAB = 64
HIDDEN = 32
N_LAYERS = 2
N_HEADS = 4
HEAD_DIM = HIDDEN // N_HEADS
FFN = 64
MAX_POS = 16
TYPE_VOCAB = 2
LN_EPS = 1e-12

SEQ = 8
BATCH_Q = 2
BATCH_CTX = 4

MXU_DTYPE = jnp.bfloat16  # MXU operand dtype; accumulation stays f32.

EMB_ROWS = VOCAB + MAX_POS + TYPE_VOCAB          # word | pos | type tables stacked
VEC_W = 128                                      # lane-padded width of the bias/LN slab
VEC_ROWS = 2 + 8 * N_LAYERS                      # emb LN (2 rows) + 8 vectors per layer


# ------------------------------ fused kernel ---------------------------------
def _biencoder_kernel(tok_ref, emb_ref, vec_ref,
                      wqkv_ref, wo_ref, w1_ref, w2_ref,
                      out_ref, *, rep_pos_q, rep_pos_ctx):
    """One grid step = one full BERT encoder (all layers, whole batch) in VMEM."""
    f32 = jnp.float32
    _, _, B, S = tok_ref.shape
    H = HIDDEN
    BS = B * S

    def layer_norm(v, g, b):
        mean = jnp.mean(v, axis=-1, keepdims=True)
        cent = v - mean
        var = jnp.mean(cent * cent, axis=-1, keepdims=True)
        return cent * jax.lax.rsqrt(var + f32(LN_EPS)) * g + b

    tok = tok_ref[0]                                   # (3, B, S) int32: ids|segments|mask
    tables = emb_ref[0]                                # (EMB_ROWS, H) f32
    vec = vec_ref[0]                                   # (VEC_ROWS, VEC_W) f32

    ids = tok[0]                                       # (B, S)
    seg = tok[1]
    mask = tok[2].astype(f32)

    word_tab = tables[:VOCAB, :]
    pos_tab = tables[VOCAB:VOCAB + MAX_POS, :]
    type_tab = tables[VOCAB + MAX_POS:VOCAB + MAX_POS + TYPE_VOCAB, :]

    # --- embeddings, fully in-kernel ---
    vocab_iota = jax.lax.broadcasted_iota(jnp.int32, (B, S, VOCAB), 2)
    word_oh = jnp.where(ids[:, :, None] == vocab_iota, f32(1.0), f32(0.0))
    word_oh = word_oh.reshape(BS, VOCAB).astype(MXU_DTYPE)
    word_part = jnp.dot(word_oh, word_tab.astype(MXU_DTYPE),
                        preferred_element_type=f32)                    # (BS, H)
    pos_part = jnp.broadcast_to(pos_tab[:S, :][None], (B, S, H)).reshape(BS, H)
    type_part = jnp.where(seg[:, :, None] > 0,
                          type_tab[1:2, :], type_tab[0:1, :]).reshape(BS, H)

    hs = layer_norm(word_part + pos_part + type_part,
                    vec[0:1, :H], vec[1:2, :H])                        # (BS, H) f32

    bias = (f32(1.0) - mask) * f32(-1e9)               # (B, S) additive key mask, f32
    scale = f32(1.0 / (HEAD_DIM ** 0.5))

    for l in range(N_LAYERS):                          # static unroll, weights in VMEM
        base = 2 + 8 * l
        bqkv = vec[base + 0:base + 1, :3 * H]
        bo = vec[base + 1:base + 2, :H]
        ln1g = vec[base + 2:base + 3, :H]
        ln1b = vec[base + 3:base + 4, :H]
        b1 = vec[base + 4:base + 5, :FFN]
        b2 = vec[base + 5:base + 6, :H]
        ln2g = vec[base + 6:base + 7, :H]
        ln2b = vec[base + 7:base + 8, :H]

        wqkv = wqkv_ref[0, l].astype(MXU_DTYPE)        # cast f32 masters once per use
        wo = wo_ref[0, l].astype(MXU_DTYPE)
        w1 = w1_ref[0, l].astype(MXU_DTYPE)
        w2 = w2_ref[0, l].astype(MXU_DTYPE)

        # ---- self-attention ----
        qkv = jnp.dot(hs.astype(MXU_DTYPE), wqkv,
                      preferred_element_type=f32) + bqkv               # (BS, 3H) f32
        qkv_bf = qkv.astype(MXU_DTYPE)                 # single bf16 copy, sliced below

        ctx_rows = []
        for b in range(B):                             # attention is per-sample
            qkv_b = qkv_bf[b * S:(b + 1) * S, :]                       # (S, 3H)
            q = qkv_b[:, 0 * H:1 * H].reshape(S, N_HEADS, HEAD_DIM)
            k = qkv_b[:, 1 * H:2 * H].reshape(S, N_HEADS, HEAD_DIM)
            v = qkv_b[:, 2 * H:3 * H].reshape(S, N_HEADS, HEAD_DIM)
            scores = jnp.einsum('qhd,khd->hqk', q, k,
                                preferred_element_type=f32)            # (NH, S, S)
            scores = scores * scale + bias[b:b + 1, :]                 # mask over keys
            m = jnp.max(scores, axis=-1, keepdims=True)
            p = jnp.exp(scores - m)
            denom = jnp.sum(p, axis=-1, keepdims=True)
            probs = (p * pl.reciprocal(denom, approx=True)).astype(MXU_DTYPE)
            ctx_b = jnp.einsum('hqk,khd->qhd', probs, v,
                               preferred_element_type=f32)             # (S, NH, D)
            ctx_rows.append(ctx_b.reshape(S, H))
        attn = jnp.concatenate(ctx_rows, axis=0)                       # (BS, H) f32

        attn = jnp.dot(attn.astype(MXU_DTYPE), wo,
                       preferred_element_type=f32) + bo                # one full WO GEMM
        hs = layer_norm(attn + hs, ln1g, ln1b)

        # ---- feed-forward ----
        ffn = jnp.dot(hs.astype(MXU_DTYPE), w1, preferred_element_type=f32) + b1
        # TODO(synk): HF BERT uses erf-GELU; tanh approximation used here.
        c0 = f32(0.7978845608028654)  # sqrt(2/pi)
        ffn = 0.5 * ffn * (1.0 + jnp.tanh(c0 * (ffn + 0.044715 * ffn * ffn * ffn)))
        ffn = jnp.dot(ffn.astype(MXU_DTYPE), w2, preferred_element_type=f32) + b2
        hs = layer_norm(ffn + hs, ln2g, ln2b)

    # Emit only the pooled representation rows (no full-sequence HBM writeback).
    def gather_rows(mat, rows):
        return jnp.concatenate([mat[r:r + 1, :] for r in rows], axis=0)

    pooled_q = gather_rows(hs, [b * S + rep_pos_q for b in range(B)])  # (B, H)
    if rep_pos_q == rep_pos_ctx:
        pooled = pooled_q
    else:
        pooled_c = gather_rows(hs, [b * S + rep_pos_ctx for b in range(B)])
        pooled = jnp.where(pl.program_id(0) == 0, pooled_q, pooled_c)
    out_ref[0] = pooled.astype(out_ref.dtype)


# --------------------------- parameter construction --------------------------
def init_encoder_params(key):
    keys = jax.random.split(key, 8)
    kit = iter(keys)

    def nrm(shape):
        return 0.02 * jax.random.normal(next(kit), shape, jnp.float32)

    # f32 master weights (matches a real DPR/BERT checkpoint); bf16 cast happens
    # only at MXU-feed time inside the kernel.
    return {
        "word_emb": nrm((VOCAB, HIDDEN)),
        "pos_emb": nrm((MAX_POS, HIDDEN)),
        "type_emb": nrm((TYPE_VOCAB, HIDDEN)),
        "emb_ln_g": jnp.ones((1, HIDDEN), jnp.float32),
        "emb_ln_b": jnp.zeros((1, HIDDEN), jnp.float32),
        "wqkv": nrm((N_LAYERS, HIDDEN, 3 * HIDDEN)),
        "bqkv": jnp.zeros((N_LAYERS, 1, 3 * HIDDEN), jnp.float32),
        "wo": nrm((N_LAYERS, HIDDEN, HIDDEN)),
        "bo": jnp.zeros((N_LAYERS, 1, HIDDEN), jnp.float32),
        "ln1_g": jnp.ones((N_LAYERS, 1, HIDDEN), jnp.float32),
        "ln1_b": jnp.zeros((N_LAYERS, 1, HIDDEN), jnp.float32),
        "w1": nrm((N_LAYERS, HIDDEN, FFN)),
        "b1": jnp.zeros((N_LAYERS, 1, FFN), jnp.float32),
        "w2": nrm((N_LAYERS, FFN, HIDDEN)),
        "b2": jnp.zeros((N_LAYERS, 1, HIDDEN), jnp.float32),
        "ln2_g": jnp.ones((N_LAYERS, 1, HIDDEN), jnp.float32),
        "ln2_b": jnp.zeros((N_LAYERS, 1, HIDDEN), jnp.float32),
    }


def stack_biencoder_params(q_params, ctx_params, encoder_type=None):
    """Pack both encoders' params into the fused-kernel layout (done once)."""
    enc0 = q_params if encoder_type in (None, "question") else ctx_params
    enc1 = ctx_params if encoder_type in (None, "ctx") else q_params
    encs = (enc0, enc1)

    def stack(fn):
        return jnp.stack([fn(p) for p in encs], axis=0)

    def vec_slab(p):
        def pad_row(v):                                   # (1, W) -> (1, VEC_W)
            return jnp.pad(v, ((0, 0), (0, VEC_W - v.shape[-1])))
        rows = [pad_row(p["emb_ln_g"]), pad_row(p["emb_ln_b"])]
        for l in range(N_LAYERS):
            rows += [pad_row(p["bqkv"][l]), pad_row(p["bo"][l]),
                     pad_row(p["ln1_g"][l]), pad_row(p["ln1_b"][l]),
                     pad_row(p["b1"][l]), pad_row(p["b2"][l]),
                     pad_row(p["ln2_g"][l]), pad_row(p["ln2_b"][l])]
        return jnp.concatenate(rows, axis=0)              # (VEC_ROWS, VEC_W)

    return {
        "tables": stack(lambda p: jnp.concatenate(
            [p["word_emb"], p["pos_emb"], p["type_emb"]], axis=0)),   # (2, EMB_ROWS, H)
        "vecs": stack(vec_slab),                                       # (2, VEC_ROWS, 128)
        "wqkv": stack(lambda p: p["wqkv"]),
        "wo": stack(lambda p: p["wo"]),
        "w1": stack(lambda p: p["w1"]),
        "w2": stack(lambda p: p["w2"]),
    }


# ------------------------------ BiEncoder forward -----------------------------
def biencoder_forward(stacked, question_ids, question_segments, question_attn_mask,
                      context_ids, ctx_segments, ctx_attn_mask,
                      representation_token_pos=0,
                      fix_q_encoder=False, fix_ctx_encoder=False):
    Bq, S = question_ids.shape
    Bc, _ = context_ids.shape
    B = max(Bq, Bc)

    def pad_b(x, fill):
        return jnp.pad(x, ((0, B - x.shape[0]), (0, 0)), constant_values=fill)

    q_tok = jnp.stack([pad_b(question_ids, 0), pad_b(question_segments, 0),
                       pad_b(question_attn_mask, 1)], axis=0)          # (3, B, S)
    c_tok = jnp.stack([pad_b(context_ids, 0), pad_b(ctx_segments, 0),
                       pad_b(ctx_attn_mask, 1)], axis=0)
    tokens = jnp.stack([q_tok, c_tok], axis=0).astype(jnp.int32)       # (2, 3, B, S)

    # TODO(synk): per-sample tensor-valued representation_token_pos (DPR supports it) is not implemented.
    kernel = functools.partial(_biencoder_kernel,
                               rep_pos_q=int(representation_token_pos),
                               rep_pos_ctx=0)

    pooled = pl.pallas_call(
        kernel,
        out_shape=jax.ShapeDtypeStruct((2, B, HIDDEN), jnp.float32),
        grid=(2,),
        in_specs=[
            pl.BlockSpec((1, 3, B, S), lambda e: (e, 0, 0, 0)),                       # tokens
            pl.BlockSpec((1, EMB_ROWS, HIDDEN), lambda e: (e, 0, 0)),                 # emb tables
            pl.BlockSpec((1, VEC_ROWS, VEC_W), lambda e: (e, 0, 0)),                  # bias/LN slab
            pl.BlockSpec((1, N_LAYERS, HIDDEN, 3 * HIDDEN), lambda e: (e, 0, 0, 0)),  # wqkv
            pl.BlockSpec((1, N_LAYERS, HIDDEN, HIDDEN), lambda e: (e, 0, 0, 0)),      # wo
            pl.BlockSpec((1, N_LAYERS, HIDDEN, FFN), lambda e: (e, 0, 0, 0)),         # w1
            pl.BlockSpec((1, N_LAYERS, FFN, HIDDEN), lambda e: (e, 0, 0, 0)),         # w2
        ],
        out_specs=pl.BlockSpec((1, B, HIDDEN), lambda e: (e, 0, 0)),
        compiler_params=pltpu.CompilerParams(
            dimension_semantics=("parallel",)),    # one encoder per TC on v7x
    )(tokens, stacked["tables"], stacked["vecs"],
      stacked["wqkv"], stacked["wo"], stacked["w1"], stacked["w2"])

    q_pooled = pooled[0, :Bq]
    ctx_pooled = pooled[1, :Bc]
    if fix_q_encoder:
        q_pooled = jax.lax.stop_gradient(q_pooled)     # mirrors torch.no_grad()
    if fix_ctx_encoder:
        ctx_pooled = jax.lax.stop_gradient(ctx_pooled)
    return q_pooled, ctx_pooled


# ----------------------------------- main -------------------------------------
if __name__ == "__main__":
    root = jax.random.PRNGKey(0)
    k_qparams, k_cparams, k_qids, k_cids = jax.random.split(root, 4)

    q_params = init_encoder_params(k_qparams)
    ctx_params = init_encoder_params(k_cparams)
    stacked = stack_biencoder_params(q_params, ctx_params, encoder_type=None)

    question_ids = jax.random.randint(k_qids, (BATCH_Q, SEQ), 0, VOCAB, dtype=jnp.int32)
    context_ids = jax.random.randint(k_cids, (BATCH_CTX, SEQ), 0, VOCAB, dtype=jnp.int32)
    question_segments = jnp.zeros((BATCH_Q, SEQ), jnp.int32)
    ctx_segments = jnp.zeros((BATCH_CTX, SEQ), jnp.int32)
    question_attn_mask = jnp.ones((BATCH_Q, SEQ), jnp.int32)
    ctx_attn_mask = jnp.ones((BATCH_CTX, SEQ), jnp.int32)

    fwd = jax.jit(biencoder_forward)
    q_pooled, ctx_pooled = fwd(
        stacked,
        question_ids, question_segments, question_attn_mask,
        context_ids, ctx_segments, ctx_attn_mask)

    jax.block_until_ready((q_pooled, ctx_pooled))
    assert q_pooled.shape == (BATCH_Q, HIDDEN)
    assert ctx_pooled.shape == (BATCH_CTX, HIDDEN)
    print("KERNEL_OK")
</pallas_src>

<mosaic_0001>
module attributes {stable_mosaic.version = 11 : i64} {
  func.func @_biencoder_kernel(%arg0: i32, %arg1: memref<1x3x4x8xi32, #tpu.memory_space<vmem>>, %arg2: memref<1x82x32xf32, #tpu.memory_space<vmem>>, %arg3: memref<1x18x128xf32, #tpu.memory_space<vmem>>, %arg4: memref<1x2x32x96xf32, #tpu.memory_space<vmem>>, %arg5: memref<1x2x32x32xf32, #tpu.memory_space<vmem>>, %arg6: memref<1x2x32x64xf32, #tpu.memory_space<vmem>>, %arg7: memref<1x2x64x32xf32, #tpu.memory_space<vmem>>, %arg8: memref<1x4x32xf32, #tpu.memory_space<vmem>>) attributes {dimension_semantics = [#tpu.dimension_semantics<parallel>], iteration_bounds = array<i64: 2>, scalar_prefetch = 0 : i64, scratch_operands = 0 : i64, tpu.core_type = #tpu.core_type<tc>, window_params = [{transform_indices = @transform_0, window_bounds = array<i64: 1, 3, 4, 8>}, {transform_indices = @transform_1, window_bounds = array<i64: 1, 82, 32>}, {transform_indices = @transform_2, window_bounds = array<i64: 1, 18, 128>}, {transform_indices = @transform_3, window_bounds = array<i64: 1, 2, 32, 96>}, {transform_indices = @transform_4, window_bounds = array<i64: 1, 2, 32, 32>}, {transform_indices = @transform_5, window_bounds = array<i64: 1, 2, 32, 64>}, {transform_indices = @transform_6, window_bounds = array<i64: 1, 2, 64, 32>}, {transform_indices = @transform_7, window_bounds = array<i64: 1, 4, 32>}]} {
    %c0 = arith.constant 0 : index
    %c0_0 = arith.constant 0 : index
    %c0_1 = arith.constant 0 : index
    %c0_2 = arith.constant 0 : index
    %0 = vector.load %arg1[%c0, %c0_0, %c0_1, %c0_2] : memref<1x3x4x8xi32, #tpu.memory_space<vmem>>, vector<1x3x4x8xi32>
    %1 = vector.shape_cast %0 : vector<1x3x4x8xi32> to vector<3x4x8xi32>
    %c0_3 = arith.constant 0 : index
    %c0_4 = arith.constant 0 : index
    %c0_5 = arith.constant 0 : index
    %2 = vector.load %arg2[%c0_3, %c0_4, %c0_5] : memref<1x82x32xf32, #tpu.memory_space<vmem>>, vector<1x82x32xf32>
    %3 = vector.shape_cast %2 : vector<1x82x32xf32> to vector<82x32xf32>
    %c0_6 = arith.constant 0 : index
    %c0_7 = arith.constant 0 : index
    %c0_8 = arith.constant 0 : index
    %4 = vector.load %arg3[%c0_6, %c0_7, %c0_8] : memref<1x18x128xf32, #tpu.memory_space<vmem>>, vector<1x18x128xf32>
    %5 = vector.shape_cast %4 : vector<1x18x128xf32> to vector<18x128xf32>
    %6 = vector.extract_strided_slice %1 {offsets = [0, 0, 0], sizes = [1, 4, 8], strides = [1, 1, 1]} : vector<3x4x8xi32> to vector<1x4x8xi32>
    %7 = vector.shape_cast %6 : vector<1x4x8xi32> to vector<4x8xi32>
    %8 = vector.extract_strided_slice %1 {offsets = [1, 0, 0], sizes = [1, 4, 8], strides = [1, 1, 1]} : vector<3x4x8xi32> to vector<1x4x8xi32>
    %9 = vector.shape_cast %8 : vector<1x4x8xi32> to vector<4x8xi32>
    %10 = vector.extract_strided_slice %1 {offsets = [2, 0, 0], sizes = [1, 4, 8], strides = [1, 1, 1]} : vector<3x4x8xi32> to vector<1x4x8xi32>
    %11 = vector.shape_cast %10 : vector<1x4x8xi32> to vector<4x8xi32>
    %12 = arith.sitofp %11 : vector<4x8xi32> to vector<4x8xf32>
    %13 = vector.extract_strided_slice %3 {offsets = [0, 0], sizes = [64, 32], strides = [1, 1]} : vector<82x32xf32> to vector<64x32xf32>
    %14 = vector.extract_strided_slice %3 {offsets = [64, 0], sizes = [16, 32], strides = [1, 1]} : vector<82x32xf32> to vector<16x32xf32>
    %15 = vector.extract_strided_slice %3 {offsets = [80, 0], sizes = [2, 32], strides = [1, 1]} : vector<82x32xf32> to vector<2x32xf32>
    %16 = tpu.iota {dimensions = array<i32: 2>} : vector<4x8x64xi32>
    %17 = vector.shape_cast %7 : vector<4x8xi32> to vector<4x8x1xi32>
    %18 = vector.broadcast %17 : vector<4x8x1xi32> to vector<4x8x64xi32>
    %19 = arith.cmpi eq, %18, %16 : vector<4x8x64xi32>
    %cst = arith.constant 1.000000e+00 : f32
    %cst_9 = arith.constant 0.000000e+00 : f32
    %20 = vector.broadcast %cst : f32 to vector<4x8x64xf32>
    %21 = vector.broadcast %cst_9 : f32 to vector<4x8x64xf32>
    %22 = arith.select %19, %20, %21 : vector<4x8x64xi1>, vector<4x8x64xf32>
    %23 = vector.shape_cast %22 : vector<4x8x64xf32> to vector<32x64xf32>
    %24 = arith.truncf %23 : vector<32x64xf32> to vector<32x64xbf16>
    %25 = arith.truncf %13 : vector<64x32xf32> to vector<64x32xbf16>
    %cst_10 = arith.constant dense<0.000000e+00> : vector<32x32xf32>
    %26 = tpu.matmul %24, %25, %cst_10 {dimension_numbers = #tpu.dot_dimension_numbers<[1], [0], [0], [1], [0, 0, 1, 1], [], []>} : vector<32x64xbf16>, vector<64x32xbf16>, vector<32x32xf32> -> vector<32x32xf32>
    %27 = vector.extract_strided_slice %14 {offsets = [0, 0], sizes = [8, 32], strides = [1, 1]} : vector<16x32xf32> to vector<8x32xf32>
    %28 = vector.shape_cast %27 : vector<8x32xf32> to vector<1x8x32xf32>
    %29 = vector.shape_cast %28 : vector<1x8x32xf32> to vector<1x8x32xf32>
    %30 = vector.broadcast %29 : vector<1x8x32xf32> to vector<4x8x32xf32>
    %31 = vector.shape_cast %30 : vector<4x8x32xf32> to vector<32x32xf32>
    %32 = vector.shape_cast %9 : vector<4x8xi32> to vector<4x8x1xi32>
    %c0_i32 = arith.constant 0 : i32
    %33 = vector.broadcast %c0_i32 : i32 to vector<4x8x1xi32>
    %34 = arith.cmpi sgt, %32, %33 : vector<4x8x1xi32>
    %35 = vector.extract_strided_slice %15 {offsets = [1, 0], sizes = [1, 32], strides = [1, 1]} : vector<2x32xf32> to vector<1x32xf32>
    %36 = vector.extract_strided_slice %15 {offsets = [0, 0], sizes = [1, 32], strides = [1, 1]} : vector<2x32xf32> to vector<1x32xf32>
    %37 = vector.shape_cast %34 : vector<4x8x1xi1> to vector<4x8x1xi1>
    %38 = vector.broadcast %37 : vector<4x8x1xi1> to vector<4x8x32xi1>
    %39 = vector.shape_cast %35 : vector<1x32xf32> to vector<1x1x32xf32>
    %40 = vector.broadcast %39 : vector<1x1x32xf32> to vector<4x8x32xf32>
    %41 = vector.shape_cast %36 : vector<1x32xf32> to vector<1x1x32xf32>
    %42 = vector.broadcast %41 : vector<1x1x32xf32> to vector<4x8x32xf32>
    %43 = arith.select %38, %40, %42 : vector<4x8x32xi1>, vector<4x8x32xf32>
    %44 = vector.shape_cast %43 : vector<4x8x32xf32> to vector<32x32xf32>
    %45 = arith.addf %26, %31 : vector<32x32xf32>
    %46 = arith.addf %45, %44 : vector<32x32xf32>
    %47 = vector.extract_strided_slice %5 {offsets = [0, 0], sizes = [1, 32], strides = [1, 1]} : vector<18x128xf32> to vector<1x32xf32>
    %48 = vector.extract_strided_slice %5 {offsets = [1, 0], sizes = [1, 32], strides = [1, 1]} : vector<18x128xf32> to vector<1x32xf32>
    %cst_11 = arith.constant dense<0.000000e+00> : vector<32xf32>
    %49 = vector.multi_reduction <add>, %46, %cst_11 [1] : vector<32x32xf32> to vector<32xf32>
    %50 = vector.shape_cast %49 : vector<32xf32> to vector<32x1xf32>
    %cst_12 = arith.constant 3.200000e+01 : f32
    %51 = vector.broadcast %cst_12 : f32 to vector<32x1xf32>
    %52 = arith.divf %50, %51 : vector<32x1xf32>
    %53 = vector.broadcast %52 : vector<32x1xf32> to vector<32x32xf32>
    %54 = arith.subf %46, %53 : vector<32x32xf32>
    %55 = arith.mulf %54, %54 : vector<32x32xf32>
    %cst_13 = arith.constant dense<0.000000e+00> : vector<32xf32>
    %56 = vector.multi_reduction <add>, %55, %cst_13 [1] : vector<32x32xf32> to vector<32xf32>
    %57 = vector.shape_cast %56 : vector<32xf32> to vector<32x1xf32>
    %cst_14 = arith.constant 3.200000e+01 : f32
    %58 = vector.broadcast %cst_14 : f32 to vector<32x1xf32>
    %59 = arith.divf %57, %58 : vector<32x1xf32>
    %cst_15 = arith.constant 9.99999996E-13 : f32
    %60 = vector.broadcast %cst_15 : f32 to vector<32x1xf32>
    %61 = arith.addf %59, %60 : vector<32x1xf32>
    %62 = math.rsqrt %61 : vector<32x1xf32>
    %63 = vector.broadcast %62 : vector<32x1xf32> to vector<32x32xf32>
    %64 = arith.mulf %54, %63 : vector<32x32xf32>
    %65 = vector.broadcast %47 : vector<1x32xf32> to vector<32x32xf32>
    %66 = arith.mulf %64, %65 : vector<32x32xf32>
    %67 = vector.broadcast %48 : vector<1x32xf32> to vector<32x32xf32>
    %68 = arith.addf %66, %67 : vector<32x32xf32>
    %cst_16 = arith.constant 1.000000e+00 : f32
    %69 = vector.broadcast %cst_16 : f32 to vector<4x8xf32>
    %70 = arith.subf %69, %12 : vector<4x8xf32>
    %cst_17 = arith.constant -1.000000e+09 : f32
    %71 = vector.broadcast %cst_17 : f32 to vector<4x8xf32>
    %72 = arith.mulf %70, %71 : vector<4x8xf32>
    %73 = vector.extract_strided_slice %5 {offsets = [2, 0], sizes = [1, 96], strides = [1, 1]} : vector<18x128xf32> to vector<1x96xf32>
    %74 = vector.extract_strided_slice %5 {offsets = [3, 0], sizes = [1, 32], strides = [1, 1]} : vector<18x128xf32> to vector<1x32xf32>
    %75 = vector.extract_strided_slice %5 {offsets = [4, 0], sizes = [1, 32], strides = [1, 1]} : vector<18x128xf32> to vector<1x32xf32>
    %76 = vector.extract_strided_slice %5 {offsets = [5, 0], sizes = [1, 32], strides = [1, 1]} : vector<18x128xf32> to vector<1x32xf32>
    %77 = vector.extract_strided_slice %5 {offsets = [6, 0], sizes = [1, 64], strides = [1, 1]} : vector<18x128xf32> to vector<1x64xf32>
    %78 = vector.extract_strided_slice %5 {offsets = [7, 0], sizes = [1, 32], strides = [1, 1]} : vector<18x128xf32> to vector<1x32xf32>
    %79 = vector.extract_strided_slice %5 {offsets = [8, 0], sizes = [1, 32], strides = [1, 1]} : vector<18x128xf32> to vector<1x32xf32>
    %80 = vector.extract_strided_slice %5 {offsets = [9, 0], sizes = [1, 32], strides = [1, 1]} : vector<18x128xf32> to vector<1x32xf32>
    %c0_18 = arith.constant 0 : index
    %c0_19 = arith.constant 0 : index
    %c0_20 = arith.constant 0 : index
    %c0_21 = arith.constant 0 : index
    %81 = vector.load %arg4[%c0_18, %c0_19, %c0_20, %c0_21] : memref<1x2x32x96xf32, #tpu.memory_space<vmem>>, vector<1x1x32x96xf32>
    %82 = vector.shape_cast %81 : vector<1x1x32x96xf32> to vector<32x96xf32>
    %83 = arith.truncf %82 : vector<32x96xf32> to vector<32x96xbf16>
    %c0_22 = arith.constant 0 : index
    %c0_23 = arith.constant 0 : index
    %c0_24 = arith.constant 0 : index
    %c0_25 = arith.constant 0 : index
    %84 = vector.load %arg5[%c0_22, %c0_23, %c0_24, %c0_25] : memref<1x2x32x32xf32, #tpu.memory_space<vmem>>, vector<1x1x32x32xf32>
    %85 = vector.shape_cast %84 : vector<1x1x32x32xf32> to vector<32x32xf32>
    %86 = arith.truncf %85 : vector<32x32xf32> to vector<32x32xbf16>
    %c0_26 = arith.constant 0 : index
    %c0_27 = arith.constant 0 : index
    %c0_28 = arith.constant 0 : index
    %c0_29 = arith.constant 0 : index
    %87 = vector.load %arg6[%c0_26, %c0_27, %c0_28, %c0_29] : memref<1x2x32x64xf32, #tpu.memory_space<vmem>>, vector<1x1x32x64xf32>
    %88 = vector.shape_cast %87 : vector<1x1x32x64xf32> to vector<32x64xf32>
    %89 = arith.truncf %88 : vector<32x64xf32> to vector<32x64xbf16>
    %c0_30 = arith.constant 0 : index
    %c0_31 = arith.constant 0 : index
    %c0_32 = arith.constant 0 : index
    %c0_33 = arith.constant 0 : index
    %90 = vector.load %arg7[%c0_30, %c0_31, %c0_32, %c0_33] : memref<1x2x64x32xf32, #tpu.memory_space<vmem>>, vector<1x1x64x32xf32>
    %91 = vector.shape_cast %90 : vector<1x1x64x32xf32> to vector<64x32xf32>
    %92 = arith.truncf %91 : vector<64x32xf32> to vector<64x32xbf16>
    %93 = arith.truncf %68 : vector<32x32xf32> to vector<32x32xbf16>
    %cst_34 = arith.constant dense<0.000000e+00> : vector<32x96xf32>
    %94 = tpu.matmul %93, %83, %cst_34 {dimension_numbers = #tpu.dot_dimension_numbers<[1], [0], [0], [1], [0, 0, 1, 1], [], []>} : vector<32x32xbf16>, vector<32x96xbf16>, vector<32x96xf32> -> vector<32x96xf32>
    %95 = vector.broadcast %73 : vector<1x96xf32> to vector<32x96xf32>
    %96 = arith.addf %94, %95 : vector<32x96xf32>
    %97 = arith.truncf %96 : vector<32x96xf32> to vector<32x96xbf16>
    %98 = vector.extract_strided_slice %97 {offsets = [0, 0], sizes = [8, 96], strides = [1, 1]} : vector<32x96xbf16> to vector<8x96xbf16>
    %99 = vector.extract_strided_slice %98 {offsets = [0, 0], sizes = [8, 32], strides = [1, 1]} : vector<8x96xbf16> to vector<8x32xbf16>
    %100 = vector.shape_cast %99 : vector<8x32xbf16> to vector<8x4x8xbf16>
    %101 = vector.extract_strided_slice %98 {offsets = [0, 32], sizes = [8, 32], strides = [1, 1]} : vector<8x96xbf16> to vector<8x32xbf16>
    %102 = vector.shape_cast %101 : vector<8x32xbf16> to vector<8x4x8xbf16>
    %103 = vector.extract_strided_slice %98 {offsets = [0, 64], sizes = [8, 32], strides = [1, 1]} : vector<8x96xbf16> to vector<8x32xbf16>
    %104 = vector.shape_cast %103 : vector<8x32xbf16> to vector<8x4x8xbf16>
    "tpu.trace_start"() <{level = 10 : i32, message = "qhd,khd->hqk"}> : () -> ()
    %cst_35 = arith.constant dense<0.000000e+00> : vector<4x8x8xf32>
    %105 = tpu.matmul %100, %102, %cst_35 {dimension_numbers = #tpu.dot_dimension_numbers<[2], [2], [0], [0], [0, 1, 0, 0, 1, 0], [1], [1]>} : vector<8x4x8xbf16>, vector<8x4x8xbf16>, vector<4x8x8xf32> -> vector<4x8x8xf32>
    "tpu.trace_stop"() : () -> ()
    %cst_36 = arith.constant 0.353553385 : f32
    %106 = vector.broadcast %cst_36 : f32 to vector<4x8x8xf32>
    %107 = arith.mulf %105, %106 : vector<4x8x8xf32>
    %108 = vector.extract_strided_slice %72 {offsets = [0, 0], sizes = [1, 8], strides = [1, 1]} : vector<4x8xf32> to vector<1x8xf32>
    %109 = vector.shape_cast %108 : vector<1x8xf32> to vector<1x1x8xf32>
    %110 = vector.broadcast %109 : vector<1x1x8xf32> to vector<4x8x8xf32>
    %111 = arith.addf %107, %110 : vector<4x8x8xf32>
    %cst_37 = arith.constant dense<0xFF800000> : vector<4x8xf32>
    %112 = vector.multi_reduction <maximumf>, %111, %cst_37 [2] : vector<4x8x8xf32> to vector<4x8xf32>
    %113 = vector.shape_cast %112 : vector<4x8xf32> to vector<4x8x1xf32>
    %114 = vector.broadcast %113 : vector<4x8x1xf32> to vector<4x8x8xf32>
    %115 = arith.subf %111, %114 : vector<4x8x8xf32>
    %116 = math.exp %115 : vector<4x8x8xf32>
    %cst_38 = arith.constant dense<0.000000e+00> : vector<4x8xf32>
    %117 = vector.multi_reduction <add>, %116, %cst_38 [2] : vector<4x8x8xf32> to vector<4x8xf32>
    %118 = vector.shape_cast %117 : vector<4x8xf32> to vector<4x8x1xf32>
    %119 = tpu.reciprocal %118 {approx = true} : vector<4x8x1xf32> -> vector<4x8x1xf32>
    %120 = vector.broadcast %119 : vector<4x8x1xf32> to vector<4x8x8xf32>
    %121 = arith.mulf %116, %120 : vector<4x8x8xf32>
    %122 = arith.truncf %121 : vector<4x8x8xf32> to vector<4x8x8xbf16>
    "tpu.trace_start"() <{level = 10 : i32, message = "hqk,khd->qhd"}> : () -> ()
    %cst_39 = arith.constant dense<0.000000e+00> : vector<4x8x8xf32>
    %123 = tpu.matmul %104, %122, %cst_39 {dimension_numbers = #tpu.dot_dimension_numbers<[0], [2], [2], [1], [0, 1, 0, 2, 1, 1], [1], [0]>} : vector<8x4x8xbf16>, vector<4x8x8xbf16>, vector<4x8x8xf32> -> vector<4x8x8xf32>
    %124 = tpu.transpose %123, [2, 0, 1] : vector<4x8x8xf32> -> vector<8x4x8xf32>
    "tpu.trace_stop"() : () -> ()
    %125 = vector.shape_cast %124 : vector<8x4x8xf32> to vector<8x32xf32>
    %126 = vector.extract_strided_slice %97 {offsets = [8, 0], sizes = [8, 96], strides = [1, 1]} : vector<32x96xbf16> to vector<8x96xbf16>
    %127 = vector.extract_strided_slice %126 {offsets = [0, 0], sizes = [8, 32], strides = [1, 1]} : vector<8x96xbf16> to vector<8x32xbf16>
    %128 = vector.shape_cast %127 : vector<8x32xbf16> to vector<8x4x8xbf16>
    %129 = vector.extract_strided_slice %126 {offsets = [0, 32], sizes = [8, 32], strides = [1, 1]} : vector<8x96xbf16> to vector<8x32xbf16>
    %130 = vector.shape_cast %129 : vector<8x32xbf16> to vector<8x4x8xbf16>
    %131 = vector.extract_strided_slice %126 {offsets = [0, 64], sizes = [8, 32], strides = [1, 1]} : vector<8x96xbf16> to vector<8x32xbf16>
    %132 = vector.shape_cast %131 : vector<8x32xbf16> to vector<8x4x8xbf16>
    "tpu.trace_start"() <{level = 10 : i32, message = "qhd,khd->hqk"}> : () -> ()
    %cst_40 = arith.constant dense<0.000000e+00> : vector<4x8x8xf32>
    %133 = tpu.matmul %128, %130, %cst_40 {dimension_numbers = #tpu.dot_dimension_numbers<[2], [2], [0], [0], [0, 1, 0, 0, 1, 0], [1], [1]>} : vector<8x4x8xbf16>, vector<8x4x8xbf16>, vector<4x8x8xf32> -> vector<4x8x8xf32>
    "tpu.trace_stop"() : () -> ()
    %cst_41 = arith.constant 0.353553385 : f32
    %134 = vector.broadcast %cst_41 : f32 to vector<4x8x8xf32>
    %135 = arith.mulf %133, %134 : vector<4x8x8xf32>
    %136 = vector.extract_strided_slice %72 {offsets = [1, 0], sizes = [1, 8], strides = [1, 1]} : vector<4x8xf32> to vector<1x8xf32>
    %137 = vector.shape_cast %136 : vector<1x8xf32> to vector<1x1x8xf32>
    %138 = vector.broadcast %137 : vector<1x1x8xf32> to vector<4x8x8xf32>
    %139 = arith.addf %135, %138 : vector<4x8x8xf32>
    %cst_42 = arith.constant dense<0xFF800000> : vector<4x8xf32>
    %140 = vector.multi_reduction <maximumf>, %139, %cst_42 [2] : vector<4x8x8xf32> to vector<4x8xf32>
    %141 = vector.shape_cast %140 : vector<4x8xf32> to vector<4x8x1xf32>
    %142 = vector.broadcast %141 : vector<4x8x1xf32> to vector<4x8x8xf32>
    %143 = arith.subf %139, %142 : vector<4x8x8xf32>
    %144 = math.exp %143 : vector<4x8x8xf32>
    %cst_43 = arith.constant dense<0.000000e+00> : vector<4x8xf32>
    %145 = vector.multi_reduction <add>, %144, %cst_43 [2] : vector<4x8x8xf32> to vector<4x8xf32>
    %146 = vector.shape_cast %145 : vector<4x8xf32> to vector<4x8x1xf32>
    %147 = tpu.reciprocal %146 {approx = true} : vector<4x8x1xf32> -> vector<4x8x1xf32>
    %148 = vector.broadcast %147 : vector<4x8x1xf32> to vector<4x8x8xf32>
    %149 = arith.mulf %144, %148 : vector<4x8x8xf32>
    %150 = arith.truncf %149 : vector<4x8x8xf32> to vector<4x8x8xbf16>
    "tpu.trace_start"() <{level = 10 : i32, message = "hqk,khd->qhd"}> : () -> ()
    %cst_44 = arith.constant dense<0.000000e+00> : vector<4x8x8xf32>
    %151 = tpu.matmul %132, %150, %cst_44 {dimension_numbers = #tpu.dot_dimension_numbers<[0], [2], [2], [1], [0, 1, 0, 2, 1, 1], [1], [0]>} : vector<8x4x8xbf16>, vector<4x8x8xbf16>, vector<4x8x8xf32> -> vector<4x8x8xf32>
    %152 = tpu.transpose %151, [2, 0, 1] : vector<4x8x8xf32> -> vector<8x4x8xf32>
    "tpu.trace_stop"() : () -> ()
    %153 = vector.shape_cast %152 : vector<8x4x8xf32> to vector<8x32xf32>
    %154 = vector.extract_strided_slice %97 {offsets = [16, 0], sizes = [8, 96], strides = [1, 1]} : vector<32x96xbf16> to vector<8x96xbf16>
    %155 = vector.extract_strided_slice %154 {offsets = [0, 0], sizes = [8, 32], strides = [1, 1]} : vector<8x96xbf16> to vector<8x32xbf16>
    %156 = vector.shape_cast %155 : vector<8x32xbf16> to vector<8x4x8xbf16>
    %157 = vector.extract_strided_slice %154 {offsets = [0, 32], sizes = [8, 32], strides = [1, 1]} : vector<8x96xbf16> to vector<8x32xbf16>
    %158 = vector.shape_cast %157 : vector<8x32xbf16> to vector<8x4x8xbf16>
    %159 = vector.extract_strided_slice %154 {offsets = [0, 64], sizes = [8, 32], strides = [1, 1]} : vector<8x96xbf16> to vector<8x32xbf16>
    %160 = vector.shape_cast %159 : vector<8x32xbf16> to vector<8x4x8xbf16>
    "tpu.trace_start"() <{level = 10 : i32, message = "qhd,khd->hqk"}> : () -> ()
    %cst_45 = arith.constant dense<0.000000e+00> : vector<4x8x8xf32>
    %161 = tpu.matmul %156, %158, %cst_45 {dimension_numbers = #tpu.dot_dimension_numbers<[2], [2], [0], [0], [0, 1, 0, 0, 1, 0], [1], [1]>} : vector<8x4x8xbf16>, vector<8x4x8xbf16>, vector<4x8x8xf32> -> vector<4x8x8xf32>
    "tpu.trace_stop"() : () -> ()
    %cst_46 = arith.constant 0.353553385 : f32
    %162 = vector.broadcast %cst_46 : f32 to vector<4x8x8xf32>
    %163 = arith.mulf %161, %162 : vector<4x8x8xf32>
    %164 = vector.extract_strided_slice %72 {offsets = [2, 0], sizes = [1, 8], strides = [1, 1]} : vector<4x8xf32> to vector<1x8xf32>
    %165 = vector.shape_cast %164 : vector<1x8xf32> to vector<1x1x8xf32>
    %166 = vector.broadcast %165 : vector<1x1x8xf32> to vector<4x8x8xf32>
    %167 = arith.addf %163, %166 : vector<4x8x8xf32>
    %cst_47 = arith.constant dense<0xFF800000> : vector<4x8xf32>
    %168 = vector.multi_reduction <maximumf>, %167, %cst_47 [2] : vector<4x8x8xf32> to vector<4x8xf32>
    %169 = vector.shape_cast %168 : vector<4x8xf32> to vector<4x8x1xf32>
    %170 = vector.broadcast %169 : vector<4x8x1xf32> to vector<4x8x8xf32>
    %171 = arith.subf %167, %170 : vector<4x8x8xf32>
    %172 = math.exp %171 : vector<4x8x8xf32>
    %cst_48 = arith.constant dense<0.000000e+00> : vector<4x8xf32>
    %173 = vector.multi_reduction <add>, %172, %cst_48 [2] : vector<4x8x8xf32> to vector<4x8xf32>
    %174 = vector.shape_cast %173 : vector<4x8xf32> to vector<4x8x1xf32>
    %175 = tpu.reciprocal %174 {approx = true} : vector<4x8x1xf32> -> vector<4x8x1xf32>
    %176 = vector.broadcast %175 : vector<4x8x1xf32> to vector<4x8x8xf32>
    %177 = arith.mulf %172, %176 : vector<4x8x8xf32>
    %178 = arith.truncf %177 : vector<4x8x8xf32> to vector<4x8x8xbf16>
    "tpu.trace_start"() <{level = 10 : i32, message = "hqk,khd->qhd"}> : () -> ()
    %cst_49 = arith.constant dense<0.000000e+00> : vector<4x8x8xf32>
    %179 = tpu.matmul %160, %178, %cst_49 {dimension_numbers = #tpu.dot_dimension_numbers<[0], [2], [2], [1], [0, 1, 0, 2, 1, 1], [1], [0]>} : vector<8x4x8xbf16>, vector<4x8x8xbf16>, vector<4x8x8xf32> -> vector<4x8x8xf32>
    %180 = tpu.transpose %179, [2, 0, 1] : vector<4x8x8xf32> -> vector<8x4x8xf32>
    "tpu.trace_stop"() : () -> ()
    %181 = vector.shape_cast %180 : vector<8x4x8xf32> to vector<8x32xf32>
    %182 = vector.extract_strided_slice %97 {offsets = [24, 0], sizes = [8, 96], strides = [1, 1]} : vector<32x96xbf16> to vector<8x96xbf16>
    %183 = vector.extract_strided_slice %182 {offsets = [0, 0], sizes = [8, 32], strides = [1, 1]} : vector<8x96xbf16> to vector<8x32xbf16>
    %184 = vector.shape_cast %183 : vector<8x32xbf16> to vector<8x4x8xbf16>
    %185 = vector.extract_strided_slice %182 {offsets = [0, 32], sizes = [8, 32], strides = [1, 1]} : vector<8x96xbf16> to vector<8x32xbf16>
    %186 = vector.shape_cast %185 : vector<8x32xbf16> to vector<8x4x8xbf16>
    %187 = vector.extract_strided_slice %182 {offsets = [0, 64], sizes = [8, 32], strides = [1, 1]} : vector<8x96xbf16> to vector<8x32xbf16>
    %188 = vector.shape_cast %187 : vector<8x32xbf16> to vector<8x4x8xbf16>
    "tpu.trace_start"() <{level = 10 : i32, message = "qhd,khd->hqk"}> : () -> ()
    %cst_50 = arith.constant dense<0.000000e+00> : vector<4x8x8xf32>
    %189 = tpu.matmul %184, %186, %cst_50 {dimension_numbers = #tpu.dot_dimension_numbers<[2], [2], [0], [0], [0, 1, 0, 0, 1, 0], [1], [1]>} : vector<8x4x8xbf16>, vector<8x4x8xbf16>, vector<4x8x8xf32> -> vector<4x8x8xf32>
    "tpu.trace_stop"() : () -> ()
    %cst_51 = arith.constant 0.353553385 : f32
    %190 = vector.broadcast %cst_51 : f32 to vector<4x8x8xf32>
    %191 = arith.mulf %189, %190 : vector<4x8x8xf32>
    %192 = vector.extract_strided_slice %72 {offsets = [3, 0], sizes = [1, 8], strides = [1, 1]} : vector<4x8xf32> to vector<1x8xf32>
    %193 = vector.shape_cast %192 : vector<1x8xf32> to vector<1x1x8xf32>
    %194 = vector.broadcast %193 : vector<1x1x8xf32> to vector<4x8x8xf32>
    %195 = arith.addf %191, %194 : vector<4x8x8xf32>
    %cst_52 = arith.constant dense<0xFF800000> : vector<4x8xf32>
    %196 = vector.multi_reduction <maximumf>, %195, %cst_52 [2] : vector<4x8x8xf32> to vector<4x8xf32>
    %197 = vector.shape_cast %196 : vector<4x8xf32> to vector<4x8x1xf32>
    %198 = vector.broadcast %197 : vector<4x8x1xf32> to vector<4x8x8xf32>
    %199 = arith.subf %195, %198 : vector<4x8x8xf32>
    %200 = math.exp %199 : vector<4x8x8xf32>
    %cst_53 = arith.constant dense<0.000000e+00> : vector<4x8xf32>
    %201 = vector.multi_reduction <add>, %200, %cst_53 [2] : vector<4x8x8xf32> to vector<4x8xf32>
    %202 = vector.shape_cast %201 : vector<4x8xf32> to vector<4x8x1xf32>
    %203 = tpu.reciprocal %202 {approx = true} : vector<4x8x1xf32> -> vector<4x8x1xf32>
    %204 = vector.broadcast %203 : vector<4x8x1xf32> to vector<4x8x8xf32>
    %205 = arith.mulf %200, %204 : vector<4x8x8xf32>
    %206 = arith.truncf %205 : vector<4x8x8xf32> to vector<4x8x8xbf16>
    "tpu.trace_start"() <{level = 10 : i32, message = "hqk,khd->qhd"}> : () -> ()
    %cst_54 = arith.constant dense<0.000000e+00> : vector<4x8x8xf32>
    %207 = tpu.matmul %188, %206, %cst_54 {dimension_numbers = #tpu.dot_dimension_numbers<[0], [2], [2], [1], [0, 1, 0, 2, 1, 1], [1], [0]>} : vector<8x4x8xbf16>, vector<4x8x8xbf16>, vector<4x8x8xf32> -> vector<4x8x8xf32>
    %208 = tpu.transpose %207, [2, 0, 1] : vector<4x8x8xf32> -> vector<8x4x8xf32>
    "tpu.trace_stop"() : () -> ()
    %209 = vector.shape_cast %208 : vector<8x4x8xf32> to vector<8x32xf32>
    %210 = tpu.concatenate %125, %153, %181, %209 in 0 : vector<8x32xf32>, vector<8x32xf32>, vector<8x32xf32>, vector<8x32xf32> -> vector<32x32xf32>
    %211 = arith.truncf %210 : vector<32x32xf32> to vector<32x32xbf16>
    %cst_55 = arith.constant dense<0.000000e+00> : vector<32x32xf32>
    %212 = tpu.matmul %211, %86, %cst_55 {dimension_numbers = #tpu.dot_dimension_numbers<[1], [0], [0], [1], [0, 0, 1, 1], [], []>} : vector<32x32xbf16>, vector<32x32xbf16>, vector<32x32xf32> -> vector<32x32xf32>
    %213 = vector.broadcast %74 : vector<1x32xf32> to vector<32x32xf32>
    %214 = arith.addf %212, %213 : vector<32x32xf32>
    %215 = arith.addf %214, %68 : vector<32x32xf32>
    %cst_56 = arith.constant dense<0.000000e+00> : vector<32xf32>
    %216 = vector.multi_reduction <add>, %215, %cst_56 [1] : vector<32x32xf32> to vector<32xf32>
    %217 = vector.shape_cast %216 : vector<32xf32> to vector<32x1xf32>
    %cst_57 = arith.constant 3.200000e+01 : f32
    %218 = vector.broadcast %cst_57 : f32 to vector<32x1xf32>
    %219 = arith.divf %217, %218 : vector<32x1xf32>
    %220 = vector.broadcast %219 : vector<32x1xf32> to vector<32x32xf32>
    %221 = arith.subf %215, %220 : vector<32x32xf32>
    %222 = arith.mulf %221, %221 : vector<32x32xf32>
    %cst_58 = arith.constant dense<0.000000e+00> : vector<32xf32>
    %223 = vector.multi_reduction <add>, %222, %cst_58 [1] : vector<32x32xf32> to vector<32xf32>
    %224 = vector.shape_cast %223 : vector<32xf32> to vector<32x1xf32>
    %cst_59 = arith.constant 3.200000e+01 : f32
    %225 = vector.broadcast %cst_59 : f32 to vector<32x1xf32>
    %226 = arith.divf %224, %225 : vector<32x1xf32>
    %cst_60 = arith.constant 9.99999996E-13 : f32
    %227 = vector.broadcast %cst_60 : f32 to vector<32x1xf32>
    %228 = arith.addf %226, %227 : vector<32x1xf32>
    %229 = math.rsqrt %228 : vector<32x1xf32>
    %230 = vector.broadcast %229 : vector<32x1xf32> to vector<32x32xf32>
    %231 = arith.mulf %221, %230 : vector<32x32xf32>
    %232 = vector.broadcast %75 : vector<1x32xf32> to vector<32x32xf32>
    %233 = arith.mulf %231, %232 : vector<32x32xf32>
    %234 = vector.broadcast %76 : vector<1x32xf32> to vector<32x32xf32>
    %235 = arith.addf %233, %234 : vector<32x32xf32>
    %236 = arith.truncf %235 : vector<32x32xf32> to vector<32x32xbf16>
    %cst_61 = arith.constant dense<0.000000e+00> : vector<32x64xf32>
    %237 = tpu.matmul %236, %89, %cst_61 {dimension_numbers = #tpu.dot_dimension_numbers<[1], [0], [0], [1], [0, 0, 1, 1], [], []>} : vector<32x32xbf16>, vector<32x64xbf16>, vector<32x64xf32> -> vector<32x64xf32>
    %238 = vector.broadcast %77 : vector<1x64xf32> to vector<32x64xf32>
    %239 = arith.addf %237, %238 : vector<32x64xf32>
    %cst_62 = arith.constant 5.000000e-01 : f32
    %240 = vector.broadcast %cst_62 : f32 to vector<32x64xf32>
    %241 = arith.mulf %240, %239 : vector<32x64xf32>
    %cst_63 = arith.constant 4.471500e-02 : f32
    %242 = vector.broadcast %cst_63 : f32 to vector<32x64xf32>
    %243 = arith.mulf %242, %239 : vector<32x64xf32>
    %244 = arith.mulf %243, %239 : vector<32x64xf32>
    %245 = arith.mulf %244, %239 : vector<32x64xf32>
    %246 = arith.addf %239, %245 : vector<32x64xf32>
    %cst_64 = arith.constant 0.797884583 : f32
    %247 = vector.broadcast %cst_64 : f32 to vector<32x64xf32>
    %248 = arith.mulf %247, %246 : vector<32x64xf32>
    %249 = math.tanh %248 : vector<32x64xf32>
    %cst_65 = arith.constant 1.000000e+00 : f32
    %250 = vector.broadcast %cst_65 : f32 to vector<32x64xf32>
    %251 = arith.addf %250, %249 : vector<32x64xf32>
    %252 = arith.mulf %241, %251 : vector<32x64xf32>
    %253 = arith.truncf %252 : vector<32x64xf32> to vector<32x64xbf16>
    %cst_66 = arith.constant dense<0.000000e+00> : vector<32x32xf32>
    %254 = tpu.matmul %253, %92, %cst_66 {dimension_numbers = #tpu.dot_dimension_numbers<[1], [0], [0], [1], [0, 0, 1, 1], [], []>} : vector<32x64xbf16>, vector<64x32xbf16>, vector<32x32xf32> -> vector<32x32xf32>
    %255 = vector.broadcast %78 : vector<1x32xf32> to vector<32x32xf32>
    %256 = arith.addf %254, %255 : vector<32x32xf32>
    %257 = arith.addf %256, %235 : vector<32x32xf32>
    %cst_67 = arith.constant dense<0.000000e+00> : vector<32xf32>
    %258 = vector.multi_reduction <add>, %257, %cst_67 [1] : vector<32x32xf32> to vector<32xf32>
    %259 = vector.shape_cast %258 : vector<32xf32> to vector<32x1xf32>
    %cst_68 = arith.constant 3.200000e+01 : f32
    %260 = vector.broadcast %cst_68 : f32 to vector<32x1xf32>
    %261 = arith.divf %259, %260 : vector<32x1xf32>
    %262 = vector.broadcast %261 : vector<32x1xf32> to vector<32x32xf32>
    %263 = arith.subf %257, %262 : vector<32x32xf32>
    %264 = arith.mulf %263, %263 : vector<32x32xf32>
    %cst_69 = arith.constant dense<0.000000e+00> : vector<32xf32>
    %265 = vector.multi_reduction <add>, %264, %cst_69 [1] : vector<32x32xf32> to vector<32xf32>
    %266 = vector.shape_cast %265 : vector<32xf32> to vector<32x1xf32>
    %cst_70 = arith.constant 3.200000e+01 : f32
    %267 = vector.broadcast %cst_70 : f32 to vector<32x1xf32>
    %268 = arith.divf %266, %267 : vector<32x1xf32>
    %cst_71 = arith.constant 9.99999996E-13 : f32
    %269 = vector.broadcast %cst_71 : f32 to vector<32x1xf32>
    %270 = arith.addf %268, %269 : vector<32x1xf32>
    %271 = math.rsqrt %270 : vector<32x1xf32>
    %272 = vector.broadcast %271 : vector<32x1xf32> to vector<32x32xf32>
    %273 = arith.mulf %263, %272 : vector<32x32xf32>
    %274 = vector.broadcast %79 : vector<1x32xf32> to vector<32x32xf32>
    %275 = arith.mulf %273, %274 : vector<32x32xf32>
    %276 = vector.broadcast %80 : vector<1x32xf32> to vector<32x32xf32>
    %277 = arith.addf %275, %276 : vector<32x32xf32>
    %278 = vector.extract_strided_slice %5 {offsets = [10, 0], sizes = [1, 96], strides = [1, 1]} : vector<18x128xf32> to vector<1x96xf32>
    %279 = vector.extract_strided_slice %5 {offsets = [11, 0], sizes = [1, 32], strides = [1, 1]} : vector<18x128xf32> to vector<1x32xf32>
    %280 = vector.extract_strided_slice %5 {offsets = [12, 0], sizes = [1, 32], strides = [1, 1]} : vector<18x128xf32> to vector<1x32xf32>
    %281 = vector.extract_strided_slice %5 {offsets = [13, 0], sizes = [1, 32], strides = [1, 1]} : vector<18x128xf32> to vector<1x32xf32>
    %282 = vector.extract_strided_slice %5 {offsets = [14, 0], sizes = [1, 64], strides = [1, 1]} : vector<18x128xf32> to vector<1x64xf32>
    %283 = vector.extract_strided_slice %5 {offsets = [15, 0], sizes = [1, 32], strides = [1, 1]} : vector<18x128xf32> to vector<1x32xf32>
    %284 = vector.extract_strided_slice %5 {offsets = [16, 0], sizes = [1, 32], strides = [1, 1]} : vector<18x128xf32> to vector<1x32xf32>
    %285 = vector.extract_strided_slice %5 {offsets = [17, 0], sizes = [1, 32], strides = [1, 1]} : vector<18x128xf32> to vector<1x32xf32>
    %c0_72 = arith.constant 0 : index
    %c1 = arith.constant 1 : index
    %c0_73 = arith.constant 0 : index
    %c0_74 = arith.constant 0 : index
    %286 = vector.load %arg4[%c0_72, %c1, %c0_73, %c0_74] : memref<1x2x32x96xf32, #tpu.memory_space<vmem>>, vector<1x1x32x96xf32>
    %287 = vector.shape_cast %286 : vector<1x1x32x96xf32> to vector<32x96xf32>
    %288 = arith.truncf %287 : vector<32x96xf32> to vector<32x96xbf16>
    %c0_75 = arith.constant 0 : index
    %c1_76 = arith.constant 1 : index
    %c0_77 = arith.constant 0 : index
    %c0_78 = arith.constant 0 : index
    %289 = vector.load %arg5[%c0_75, %c1_76, %c0_77, %c0_78] : memref<1x2x32x32xf32, #tpu.memory_space<vmem>>, vector<1x1x32x32xf32>
    %290 = vector.shape_cast %289 : vector<1x1x32x32xf32> to vector<32x32xf32>
    %291 = arith.truncf %290 : vector<32x32xf32> to vector<32x32xbf16>
    %c0_79 = arith.constant 0 : index
    %c1_80 = arith.constant 1 : index
    %c0_81 = arith.constant 0 : index
    %c0_82 = arith.constant 0 : index
    %292 = vector.load %arg6[%c0_79, %c1_80, %c0_81, %c0_82] : memref<1x2x32x64xf32, #tpu.memory_space<vmem>>, vector<1x1x32x64xf32>
    %293 = vector.shape_cast %292 : vector<1x1x32x64xf32> to vector<32x64xf32>
    %294 = arith.truncf %293 : vector<32x64xf32> to vector<32x64xbf16>
    %c0_83 = arith.constant 0 : index
    %c1_84 = arith.constant 1 : index
    %c0_85 = arith.constant 0 : index
    %c0_86 = arith.constant 0 : index
    %295 = vector.load %arg7[%c0_83, %c1_84, %c0_85, %c0_86] : memref<1x2x64x32xf32, #tpu.memory_space<vmem>>, vector<1x1x64x32xf32>
    %296 = vector.shape_cast %295 : vector<1x1x64x32xf32> to vector<64x32xf32>
    %297 = arith.truncf %296 : vector<64x32xf32> to vector<64x32xbf16>
    %298 = arith.truncf %277 : vector<32x32xf32> to vector<32x32xbf16>
    %cst_87 = arith.constant dense<0.000000e+00> : vector<32x96xf32>
    %299 = tpu.matmul %298, %288, %cst_87 {dimension_numbers = #tpu.dot_dimension_numbers<[1], [0], [0], [1], [0, 0, 1, 1], [], []>} : vector<32x32xbf16>, vector<32x96xbf16>, vector<32x96xf32> -> vector<32x96xf32>
    %300 = vector.broadcast %278 : vector<1x96xf32> to vector<32x96xf32>
    %301 = arith.addf %299, %300 : vector<32x96xf32>
    %302 = arith.truncf %301 : vector<32x96xf32> to vector<32x96xbf16>
    %303 = vector.extract_strided_slice %302 {offsets = [0, 0], sizes = [8, 96], strides = [1, 1]} : vector<32x96xbf16> to vector<8x96xbf16>
    %304 = vector.extract_strided_slice %303 {offsets = [0, 0], sizes = [8, 32], strides = [1, 1]} : vector<8x96xbf16> to vector<8x32xbf16>
    %305 = vector.shape_cast %304 : vector<8x32xbf16> to vector<8x4x8xbf16>
    %306 = vector.extract_strided_slice %303 {offsets = [0, 32], sizes = [8, 32], strides = [1, 1]} : vector<8x96xbf16> to vector<8x32xbf16>
    %307 = vector.shape_cast %306 : vector<8x32xbf16> to vector<8x4x8xbf16>
    %308 = vector.extract_strided_slice %303 {offsets = [0, 64], sizes = [8, 32], strides = [1, 1]} : vector<8x96xbf16> to vector<8x32xbf16>
    %309 = vector.shape_cast %308 : vector<8x32xbf16> to vector<8x4x8xbf16>
    "tpu.trace_start"() <{level = 10 : i32, message = "qhd,khd->hqk"}> : () -> ()
    %cst_88 = arith.constant dense<0.000000e+00> : vector<4x8x8xf32>
    %310 = tpu.matmul %305, %307, %cst_88 {dimension_numbers = #tpu.dot_dimension_numbers<[2], [2], [0], [0], [0, 1, 0, 0, 1, 0], [1], [1]>} : vector<8x4x8xbf16>, vector<8x4x8xbf16>, vector<4x8x8xf32> -> vector<4x8x8xf32>
    "tpu.trace_stop"() : () -> ()
    %cst_89 = arith.constant 0.353553385 : f32
    %311 = vector.broadcast %cst_89 : f32 to vector<4x8x8xf32>
    %312 = arith.mulf %310, %311 : vector<4x8x8xf32>
    %313 = vector.extract_strided_slice %72 {offsets = [0, 0], sizes = [1, 8], strides = [1, 1]} : vector<4x8xf32> to vector<1x8xf32>
    %314 = vector.shape_cast %313 : vector<1x8xf32> to vector<1x1x8xf32>
    %315 = vector.broadcast %314 : vector<1x1x8xf32> to vector<4x8x8xf32>
    %316 = arith.addf %312, %315 : vector<4x8x8xf32>
    %cst_90 = arith.constant dense<0xFF800000> : vector<4x8xf32>
    %317 = vector.multi_reduction <maximumf>, %316, %cst_90 [2] : vector<4x8x8xf32> to vector<4x8xf32>
    %318 = vector.shape_cast %317 : vector<4x8xf32> to vector<4x8x1xf32>
    %319 = vector.broadcast %318 : vector<4x8x1xf32> to vector<4x8x8xf32>
    %320 = arith.subf %316, %319 : vector<4x8x8xf32>
    %321 = math.exp %320 : vector<4x8x8xf32>
    %cst_91 = arith.constant dense<0.000000e+00> : vector<4x8xf32>
    %322 = vector.multi_reduction <add>, %321, %cst_91 [2] : vector<4x8x8xf32> to vector<4x8xf32>
    %323 = vector.shape_cast %322 : vector<4x8xf32> to vector<4x8x1xf32>
    %324 = tpu.reciprocal %323 {approx = true} : vector<4x8x1xf32> -> vector<4x8x1xf32>
    %325 = vector.broadcast %324 : vector<4x8x1xf32> to vector<4x8x8xf32>
    %326 = arith.mulf %321, %325 : vector<4x8x8xf32>
    %327 = arith.truncf %326 : vector<4x8x8xf32> to vector<4x8x8xbf16>
    "tpu.trace_start"() <{level = 10 : i32, message = "hqk,khd->qhd"}> : () -> ()
    %cst_92 = arith.constant dense<0.000000e+00> : vector<4x8x8xf32>
    %328 = tpu.matmul %309, %327, %cst_92 {dimension_numbers = #tpu.dot_dimension_numbers<[0], [2], [2], [1], [0, 1, 0, 2, 1, 1], [1], [0]>} : vector<8x4x8xbf16>, vector<4x8x8xbf16>, vector<4x8x8xf32> -> vector<4x8x8xf32>
    %329 = tpu.transpose %328, [2, 0, 1] : vector<4x8x8xf32> -> vector<8x4x8xf32>
    "tpu.trace_stop"() : () -> ()
    %330 = vector.shape_cast %329 : vector<8x4x8xf32> to vector<8x32xf32>
    %331 = vector.extract_strided_slice %302 {offsets = [8, 0], sizes = [8, 96], strides = [1, 1]} : vector<32x96xbf16> to vector<8x96xbf16>
    %332 = vector.extract_strided_slice %331 {offsets = [0, 0], sizes = [8, 32], strides = [1, 1]} : vector<8x96xbf16> to vector<8x32xbf16>
    %333 = vector.shape_cast %332 : vector<8x32xbf16> to vector<8x4x8xbf16>
    %334 = vector.extract_strided_slice %331 {offsets = [0, 32], sizes = [8, 32], strides = [1, 1]} : vector<8x96xbf16> to vector<8x32xbf16>
    %335 = vector.shape_cast %334 : vector<8x32xbf16> to vector<8x4x8xbf16>
    %336 = vector.extract_strided_slice %331 {offsets = [0, 64], sizes = [8, 32], strides = [1, 1]} : vector<8x96xbf16> to vector<8x32xbf16>
    %337 = vector.shape_cast %336 : vector<8x32xbf16> to vector<8x4x8xbf16>
    "tpu.trace_start"() <{level = 10 : i32, message = "qhd,khd->hqk"}> : () -> ()
    %cst_93 = arith.constant dense<0.000000e+00> : vector<4x8x8xf32>
    %338 = tpu.matmul %333, %335, %cst_93 {dimension_numbers = #tpu.dot_dimension_numbers<[2], [2], [0], [0], [0, 1, 0, 0, 1, 0], [1], [1]>} : vector<8x4x8xbf16>, vector<8x4x8xbf16>, vector<4x8x8xf32> -> vector<4x8x8xf32>
    "tpu.trace_stop"() : () -> ()
    %cst_94 = arith.constant 0.353553385 : f32
    %339 = vector.broadcast %cst_94 : f32 to vector<4x8x8xf32>
    %340 = arith.mulf %338, %339 : vector<4x8x8xf32>
    %341 = vector.extract_strided_slice %72 {offsets = [1, 0], sizes = [1, 8], strides = [1, 1]} : vector<4x8xf32> to vector<1x8xf32>
    %342 = vector.shape_cast %341 : vector<1x8xf32> to vector<1x1x8xf32>
    %343 = vector.broadcast %342 : vector<1x1x8xf32> to vector<4x8x8xf32>
    %344 = arith.addf %340, %343 : vector<4x8x8xf32>
    %cst_95 = arith.constant dense<0xFF800000> : vector<4x8xf32>
    %345 = vector.multi_reduction <maximumf>, %344, %cst_95 [2] : vector<4x8x8xf32> to vector<4x8xf32>
    %346 = vector.shape_cast %345 : vector<4x8xf32> to vector<4x8x1xf32>
    %347 = vector.broadcast %346 : vector<4x8x1xf32> to vector<4x8x8xf32>
    %348 = arith.subf %344, %347 : vector<4x8x8xf32>
    %349 = math.exp %348 : vector<4x8x8xf32>
    %cst_96 = arith.constant dense<0.000000e+00> : vector<4x8xf32>
    %350 = vector.multi_reduction <add>, %349, %cst_96 [2] : vector<4x8x8xf32> to vector<4x8xf32>
    %351 = vector.shape_cast %350 : vector<4x8xf32> to vector<4x8x1xf32>
    %352 = tpu.reciprocal %351 {approx = true} : vector<4x8x1xf32> -> vector<4x8x1xf32>
    %353 = vector.broadcast %352 : vector<4x8x1xf32> to vector<4x8x8xf32>
    %354 = arith.mulf %349, %353 : vector<4x8x8xf32>
    %355 = arith.truncf %354 : vector<4x8x8xf32> to vector<4x8x8xbf16>
    "tpu.trace_start"() <{level = 10 : i32, message = "hqk,khd->qhd"}> : () -> ()
    %cst_97 = arith.constant dense<0.000000e+00> : vector<4x8x8xf32>
    %356 = tpu.matmul %337, %355, %cst_97 {dimension_numbers = #tpu.dot_dimension_numbers<[0], [2], [2], [1], [0, 1, 0, 2, 1, 1], [1], [0]>} : vector<8x4x8xbf16>, vector<4x8x8xbf16>, vector<4x8x8xf32> -> vector<4x8x8xf32>
    %357 = tpu.transpose %356, [2, 0, 1] : vector<4x8x8xf32> -> vector<8x4x8xf32>
    "tpu.trace_stop"() : () -> ()
    %358 = vector.shape_cast %357 : vector<8x4x8xf32> to vector<8x32xf32>
    %359 = vector.extract_strided_slice %302 {offsets = [16, 0], sizes = [8, 96], strides = [1, 1]} : vector<32x96xbf16> to vector<8x96xbf16>
    %360 = vector.extract_strided_slice %359 {offsets = [0, 0], sizes = [8, 32], strides = [1, 1]} : vector<8x96xbf16> to vector<8x32xbf16>
    %361 = vector.shape_cast %360 : vector<8x32xbf16> to vector<8x4x8xbf16>
    %362 = vector.extract_strided_slice %359 {offsets = [0, 32], sizes = [8, 32], strides = [1, 1]} : vector<8x96xbf16> to vector<8x32xbf16>
    %363 = vector.shape_cast %362 : vector<8x32xbf16> to vector<8x4x8xbf16>
    %364 = vector.extract_strided_slice %359 {offsets = [0, 64], sizes = [8, 32], strides = [1, 1]} : vector<8x96xbf16> to vector<8x32xbf16>
    %365 = vector.shape_cast %364 : vector<8x32xbf16> to vector<8x4x8xbf16>
    "tpu.trace_start"() <{level = 10 : i32, message = "qhd,khd->hqk"}> : () -> ()
    %cst_98 = arith.constant dense<0.000000e+00> : vector<4x8x8xf32>
    %366 = tpu.matmul %361, %363, %cst_98 {dimension_numbers = #tpu.dot_dimension_numbers<[2], [2], [0], [0], [0, 1, 0, 0, 1, 0], [1], [1]>} : vector<8x4x8xbf16>, vector<8x4x8xbf16>, vector<4x8x8xf32> -> vector<4x8x8xf32>
    "tpu.trace_stop"() : () -> ()
    %cst_99 = arith.constant 0.353553385 : f32
    %367 = vector.broadcast %cst_99 : f32 to vector<4x8x8xf32>
    %368 = arith.mulf %366, %367 : vector<4x8x8xf32>
    %369 = vector.extract_strided_slice %72 {offsets = [2, 0], sizes = [1, 8], strides = [1, 1]} : vector<4x8xf32> to vector<1x8xf32>
    %370 = vector.shape_cast %369 : vector<1x8xf32> to vector<1x1x8xf32>
    %371 = vector.broadcast %370 : vector<1x1x8xf32> to vector<4x8x8xf32>
    %372 = arith.addf %368, %371 : vector<4x8x8xf32>
    %cst_100 = arith.constant dense<0xFF800000> : vector<4x8xf32>
    %373 = vector.multi_reduction <maximumf>, %372, %cst_100 [2] : vector<4x8x8xf32> to vector<4x8xf32>
    %374 = vector.shape_cast %373 : vector<4x8xf32> to vector<4x8x1xf32>
    %375 = vector.broadcast %374 : vector<4x8x1xf32> to vector<4x8x8xf32>
    %376 = arith.subf %372, %375 : vector<4x8x8xf32>
    %377 = math.exp %376 : vector<4x8x8xf32>
    %cst_101 = arith.constant dense<0.000000e+00> : vector<4x8xf32>
    %378 = vector.multi_reduction <add>, %377, %cst_101 [2] : vector<4x8x8xf32> to vector<4x8xf32>
    %379 = vector.shape_cast %378 : vector<4x8xf32> to vector<4x8x1xf32>
    %380 = tpu.reciprocal %379 {approx = true} : vector<4x8x1xf32> -> vector<4x8x1xf32>
    %381 = vector.broadcast %380 : vector<4x8x1xf32> to vector<4x8x8xf32>
    %382 = arith.mulf %377, %381 : vector<4x8x8xf32>
    %383 = arith.truncf %382 : vector<4x8x8xf32> to vector<4x8x8xbf16>
    "tpu.trace_start"() <{level = 10 : i32, message = "hqk,khd->qhd"}> : () -> ()
    %cst_102 = arith.constant dense<0.000000e+00> : vector<4x8x8xf32>
    %384 = tpu.matmul %365, %383, %cst_102 {dimension_numbers = #tpu.dot_dimension_numbers<[0], [2], [2], [1], [0, 1, 0, 2, 1, 1], [1], [0]>} : vector<8x4x8xbf16>, vector<4x8x8xbf16>, vector<4x8x8xf32> -> vector<4x8x8xf32>
    %385 = tpu.transpose %384, [2, 0, 1] : vector<4x8x8xf32> -> vector<8x4x8xf32>
    "tpu.trace_stop"() : () -> ()
    %386 = vector.shape_cast %385 : vector<8x4x8xf32> to vector<8x32xf32>
    %387 = vector.extract_strided_slice %302 {offsets = [24, 0], sizes = [8, 96], strides = [1, 1]} : vector<32x96xbf16> to vector<8x96xbf16>
    %388 = vector.extract_strided_slice %387 {offsets = [0, 0], sizes = [8, 32], strides = [1, 1]} : vector<8x96xbf16> to vector<8x32xbf16>
    %389 = vector.shape_cast %388 : vector<8x32xbf16> to vector<8x4x8xbf16>
    %390 = vector.extract_strided_slice %387 {offsets = [0, 32], sizes = [8, 32], strides = [1, 1]} : vector<8x96xbf16> to vector<8x32xbf16>
    %391 = vector.shape_cast %390 : vector<8x32xbf16> to vector<8x4x8xbf16>
    %392 = vector.extract_strided_slice %387 {offsets = [0, 64], sizes = [8, 32], strides = [1, 1]} : vector<8x96xbf16> to vector<8x32xbf16>
    %393 = vector.shape_cast %392 : vector<8x32xbf16> to vector<8x4x8xbf16>
    "tpu.trace_start"() <{level = 10 : i32, message = "qhd,khd->hqk"}> : () -> ()
    %cst_103 = arith.constant dense<0.000000e+00> : vector<4x8x8xf32>
    %394 = tpu.matmul %389, %391, %cst_103 {dimension_numbers = #tpu.dot_dimension_numbers<[2], [2], [0], [0], [0, 1, 0, 0, 1, 0], [1], [1]>} : vector<8x4x8xbf16>, vector<8x4x8xbf16>, vector<4x8x8xf32> -> vector<4x8x8xf32>
    "tpu.trace_stop"() : () -> ()
    %cst_104 = arith.constant 0.353553385 : f32
    %395 = vector.broadcast %cst_104 : f32 to vector<4x8x8xf32>
    %396 = arith.mulf %394, %395 : vector<4x8x8xf32>
    %397 = vector.extract_strided_slice %72 {offsets = [3, 0], sizes = [1, 8], strides = [1, 1]} : vector<4x8xf32> to vector<1x8xf32>
    %398 = vector.shape_cast %397 : vector<1x8xf32> to vector<1x1x8xf32>
    %399 = vector.broadcast %398 : vector<1x1x8xf32> to vector<4x8x8xf32>
    %400 = arith.addf %396, %399 : vector<4x8x8xf32>
    %cst_105 = arith.constant dense<0xFF800000> : vector<4x8xf32>
    %401 = vector.multi_reduction <maximumf>, %400, %cst_105 [2] : vector<4x8x8xf32> to vector<4x8xf32>
    %402 = vector.shape_cast %401 : vector<4x8xf32> to vector<4x8x1xf32>
    %403 = vector.broadcast %402 : vector<4x8x1xf32> to vector<4x8x8xf32>
    %404 = arith.subf %400, %403 : vector<4x8x8xf32>
    %405 = math.exp %404 : vector<4x8x8xf32>
    %cst_106 = arith.constant dense<0.000000e+00> : vector<4x8xf32>
    %406 = vector.multi_reduction <add>, %405, %cst_106 [2] : vector<4x8x8xf32> to vector<4x8xf32>
    %407 = vector.shape_cast %406 : vector<4x8xf32> to vector<4x8x1xf32>
    %408 = tpu.reciprocal %407 {approx = true} : vector<4x8x1xf32> -> vector<4x8x1xf32>
    %409 = vector.broadcast %408 : vector<4x8x1xf32> to vector<4x8x8xf32>
    %410 = arith.mulf %405, %409 : vector<4x8x8xf32>
    %411 = arith.truncf %410 : vector<4x8x8xf32> to vector<4x8x8xbf16>
    "tpu.trace_start"() <{level = 10 : i32, message = "hqk,khd->qhd"}> : () -> ()
    %cst_107 = arith.constant dense<0.000000e+00> : vector<4x8x8xf32>
    %412 = tpu.matmul %393, %411, %cst_107 {dimension_numbers = #tpu.dot_dimension_numbers<[0], [2], [2], [1], [0, 1, 0, 2, 1, 1], [1], [0]>} : vector<8x4x8xbf16>, vector<4x8x8xbf16>, vector<4x8x8xf32> -> vector<4x8x8xf32>
    %413 = tpu.transpose %412, [2, 0, 1] : vector<4x8x8xf32> -> vector<8x4x8xf32>
    "tpu.trace_stop"() : () -> ()
    %414 = vector.shape_cast %413 : vector<8x4x8xf32> to vector<8x32xf32>
    %415 = tpu.concatenate %330, %358, %386, %414 in 0 : vector<8x32xf32>, vector<8x32xf32>, vector<8x32xf32>, vector<8x32xf32> -> vector<32x32xf32>
    %416 = arith.truncf %415 : vector<32x32xf32> to vector<32x32xbf16>
    %cst_108 = arith.constant dense<0.000000e+00> : vector<32x32xf32>
    %417 = tpu.matmul %416, %291, %cst_108 {dimension_numbers = #tpu.dot_dimension_numbers<[1], [0], [0], [1], [0, 0, 1, 1], [], []>} : vector<32x32xbf16>, vector<32x32xbf16>, vector<32x32xf32> -> vector<32x32xf32>
    %418 = vector.broadcast %279 : vector<1x32xf32> to vector<32x32xf32>
    %419 = arith.addf %417, %418 : vector<32x32xf32>
    %420 = arith.addf %419, %277 : vector<32x32xf32>
    %cst_109 = arith.constant dense<0.000000e+00> : vector<32xf32>
    %421 = vector.multi_reduction <add>, %420, %cst_109 [1] : vector<32x32xf32> to vector<32xf32>
    %422 = vector.shape_cast %421 : vector<32xf32> to vector<32x1xf32>
    %cst_110 = arith.constant 3.200000e+01 : f32
    %423 = vector.broadcast %cst_110 : f32 to vector<32x1xf32>
    %424 = arith.divf %422, %423 : vector<32x1xf32>
    %425 = vector.broadcast %424 : vector<32x1xf32> to vector<32x32xf32>
    %426 = arith.subf %420, %425 : vector<32x32xf32>
    %427 = arith.mulf %426, %426 : vector<32x32xf32>
    %cst_111 = arith.constant dense<0.000000e+00> : vector<32xf32>
    %428 = vector.multi_reduction <add>, %427, %cst_111 [1] : vector<32x32xf32> to vector<32xf32>
    %429 = vector.shape_cast %428 : vector<32xf32> to vector<32x1xf32>
    %cst_112 = arith.constant 3.200000e+01 : f32
    %430 = vector.broadcast %cst_112 : f32 to vector<32x1xf32>
    %431 = arith.divf %429, %430 : vector<32x1xf32>
    %cst_113 = arith.constant 9.99999996E-13 : f32
    %432 = vector.broadcast %cst_113 : f32 to vector<32x1xf32>
    %433 = arith.addf %431, %432 : vector<32x1xf32>
    %434 = math.rsqrt %433 : vector<32x1xf32>
    %435 = vector.broadcast %434 : vector<32x1xf32> to vector<32x32xf32>
    %436 = arith.mulf %426, %435 : vector<32x32xf32>
    %437 = vector.broadcast %280 : vector<1x32xf32> to vector<32x32xf32>
    %438 = arith.mulf %436, %437 : vector<32x32xf32>
    %439 = vector.broadcast %281 : vector<1x32xf32> to vector<32x32xf32>
    %440 = arith.addf %438, %439 : vector<32x32xf32>
    %441 = arith.truncf %440 : vector<32x32xf32> to vector<32x32xbf16>
    %cst_114 = arith.constant dense<0.000000e+00> : vector<32x64xf32>
    %442 = tpu.matmul %441, %294, %cst_114 {dimension_numbers = #tpu.dot_dimension_numbers<[1], [0], [0], [1], [0, 0, 1, 1], [], []>} : vector<32x32xbf16>, vector<32x64xbf16>, vector<32x64xf32> -> vector<32x64xf32>
    %443 = vector.broadcast %282 : vector<1x64xf32> to vector<32x64xf32>
    %444 = arith.addf %442, %443 : vector<32x64xf32>
    %cst_115 = arith.constant 5.000000e-01 : f32
    %445 = vector.broadcast %cst_115 : f32 to vector<32x64xf32>
    %446 = arith.mulf %445, %444 : vector<32x64xf32>
    %cst_116 = arith.constant 4.471500e-02 : f32
    %447 = vector.broadcast %cst_116 : f32 to vector<32x64xf32>
    %448 = arith.mulf %447, %444 : vector<32x64xf32>
    %449 = arith.mulf %448, %444 : vector<32x64xf32>
    %450 = arith.mulf %449, %444 : vector<32x64xf32>
    %451 = arith.addf %444, %450 : vector<32x64xf32>
    %cst_117 = arith.constant 0.797884583 : f32
    %452 = vector.broadcast %cst_117 : f32 to vector<32x64xf32>
    %453 = arith.mulf %452, %451 : vector<32x64xf32>
    %454 = math.tanh %453 : vector<32x64xf32>
    %cst_118 = arith.constant 1.000000e+00 : f32
    %455 = vector.broadcast %cst_118 : f32 to vector<32x64xf32>
    %456 = arith.addf %455, %454 : vector<32x64xf32>
    %457 = arith.mulf %446, %456 : vector<32x64xf32>
    %458 = arith.truncf %457 : vector<32x64xf32> to vector<32x64xbf16>
    %cst_119 = arith.constant dense<0.000000e+00> : vector<32x32xf32>
    %459 = tpu.matmul %458, %297, %cst_119 {dimension_numbers = #tpu.dot_dimension_numbers<[1], [0], [0], [1], [0, 0, 1, 1], [], []>} : vector<32x64xbf16>, vector<64x32xbf16>, vector<32x32xf32> -> vector<32x32xf32>
    %460 = vector.broadcast %283 : vector<1x32xf32> to vector<32x32xf32>
    %461 = arith.addf %459, %460 : vector<32x32xf32>
    %462 = arith.addf %461, %440 : vector<32x32xf32>
    %cst_120 = arith.constant dense<0.000000e+00> : vector<32xf32>
    %463 = vector.multi_reduction <add>, %462, %cst_120 [1] : vector<32x32xf32> to vector<32xf32>
    %464 = vector.shape_cast %463 : vector<32xf32> to vector<32x1xf32>
    %cst_121 = arith.constant 3.200000e+01 : f32
    %465 = vector.broadcast %cst_121 : f32 to vector<32x1xf32>
    %466 = arith.divf %464, %465 : vector<32x1xf32>
    %467 = vector.broadcast %466 : vector<32x1xf32> to vector<32x32xf32>
    %468 = arith.subf %462, %467 : vector<32x32xf32>
    %469 = arith.mulf %468, %468 : vector<32x32xf32>
    %cst_122 = arith.constant dense<0.000000e+00> : vector<32xf32>
    %470 = vector.multi_reduction <add>, %469, %cst_122 [1] : vector<32x32xf32> to vector<32xf32>
    %471 = vector.shape_cast %470 : vector<32xf32> to vector<32x1xf32>
    %cst_123 = arith.constant 3.200000e+01 : f32
    %472 = vector.broadcast %cst_123 : f32 to vector<32x1xf32>
    %473 = arith.divf %471, %472 : vector<32x1xf32>
    %cst_124 = arith.constant 9.99999996E-13 : f32
    %474 = vector.broadcast %cst_124 : f32 to vector<32x1xf32>
    %475 = arith.addf %473, %474 : vector<32x1xf32>
    %476 = math.rsqrt %475 : vector<32x1xf32>
    %477 = vector.broadcast %476 : vector<32x1xf32> to vector<32x32xf32>
    %478 = arith.mulf %468, %477 : vector<32x32xf32>
    %479 = vector.broadcast %284 : vector<1x32xf32> to vector<32x32xf32>
    %480 = arith.mulf %478, %479 : vector<32x32xf32>
    %481 = vector.broadcast %285 : vector<1x32xf32> to vector<32x32xf32>
    %482 = arith.addf %480, %481 : vector<32x32xf32>
    %483 = vector.extract_strided_slice %482 {offsets = [0, 0], sizes = [1, 32], strides = [1, 1]} : vector<32x32xf32> to vector<1x32xf32>
    %484 = vector.extract_strided_slice %482 {offsets = [8, 0], sizes = [1, 32], strides = [1, 1]} : vector<32x32xf32> to vector<1x32xf32>
    %485 = vector.extract_strided_slice %482 {offsets = [16, 0], sizes = [1, 32], strides = [1, 1]} : vector<32x32xf32> to vector<1x32xf32>
    %486 = vector.extract_strided_slice %482 {offsets = [24, 0], sizes = [1, 32], strides = [1, 1]} : vector<32x32xf32> to vector<1x32xf32>
    %487 = tpu.concatenate %483, %484, %485, %486 in 0 : vector<1x32xf32>, vector<1x32xf32>, vector<1x32xf32>, vector<1x32xf32> -> vector<4x32xf32>
    %c0_125 = arith.constant 0 : index
    %c0_126 = arith.constant 0 : index
    %c0_127 = arith.constant 0 : index
    %488 = vector.load %arg8[%c0_125, %c0_126, %c0_127] : memref<1x4x32xf32, #tpu.memory_space<vmem>>, vector<1x4x32xf32>
    %489 = vector.shape_cast %488 : vector<1x4x32xf32> to vector<4x32xf32>
    %490 = vector.shape_cast %487 : vector<4x32xf32> to vector<1x4x32xf32>
    tpu.vector_store %arg8[%c0_125, %c0_126, %c0_127], %490 {strides = array<i32>} : memref<1x4x32xf32, #tpu.memory_space<vmem>>, vector<1x4x32xf32>,
    return
  }
  func.func @transform_0(%arg0: i32) -> (i32, i32, i32, i32) {
    %c0_i32 = arith.constant 0 : i32
    %c0_i32_0 = arith.constant 0 : i32
    %c0_i32_1 = arith.constant 0 : i32
    %c0_i32_2 = arith.constant 0 : i32
    return %arg0, %c0_i32, %c0_i32_0, %c0_i32_1 : i32, i32, i32, i32
  }
  func.func @transform_1(%arg0: i32) -> (i32, i32, i32) {
    %c0_i32 = arith.constant 0 : i32
    %c0_i32_0 = arith.constant 0 : i32
    %c0_i32_1 = arith.constant 0 : i32
    return %arg0, %c0_i32, %c0_i32_0 : i32, i32, i32
  }
  func.func @transform_2(%arg0: i32) -> (i32, i32, i32) {
    %c0_i32 = arith.constant 0 : i32
    %c0_i32_0 = arith.constant 0 : i32
    %c0_i32_1 = arith.constant 0 : i32
    return %arg0, %c0_i32, %c0_i32_0 : i32, i32, i32
  }
  func.func @transform_3(%arg0: i32) -> (i32, i32, i32, i32) {
    %c0_i32 = arith.constant 0 : i32
    %c0_i32_0 = arith.constant 0 : i32
    %c0_i32_1 = arith.constant 0 : i32
    %c0_i32_2 = arith.constant 0 : i32
    return %arg0, %c0_i32, %c0_i32_0, %c0_i32_1 : i32, i32, i32, i32
  }
  func.func @transform_4(%arg0: i32) -> (i32, i32, i32, i32) {
    %c0_i32 = arith.constant 0 : i32
    %c0_i32_0 = arith.constant 0 : i32
    %c0_i32_1 = arith.constant 0 : i32
    %c0_i32_2 = arith.constant 0 : i32
    return %arg0, %c0_i32, %c0_i32_0, %c0_i32_1 : i32, i32, i32, i32
  }
  func.func @transform_5(%arg0: i32) -> (i32, i32, i32, i32) {
    %c0_i32 = arith.constant 0 : i32
    %c0_i32_0 = arith.constant 0 : i32
    %c0_i32_1 = arith.constant 0 : i32
    %c0_i32_2 = arith.constant 0 : i32
    return %arg0, %c0_i32, %c0_i32_0, %c0_i32_1 : i32, i32, i32, i32
  }
  func.func @transform_6(%arg0: i32) -> (i32, i32, i32, i32) {
    %c0_i32 = arith.constant 0 : i32
    %c0_i32_0 = arith.constant 0 : i32
    %c0_i32_1 = arith.constant 0 : i32
    %c0_i32_2 = arith.constant 0 : i32
    return %arg0, %c0_i32, %c0_i32_0, %c0_i32_1 : i32, i32, i32, i32
  }
  func.func @transform_7(%arg0: i32) -> (i32, i32, i32) {
    %c0_i32 = arith.constant 0 : i32
    %c0_i32_0 = arith.constant 0 : i32
    %c0_i32_1 = arith.constant 0 : i32
    return %arg0, %c0_i32, %c0_i32_0 : i32, i32, i32
  }
}

</mosaic_0001>

<bundles_post_ra>
// kernel: biencoder_forward.1
= control target key start
LH: loop header
LB: loop body
LE: loop exit
PB: predicated region body
PF: predicated region fallthrough
CT: control target
= control target key end

     0   :  { %s7258_s24 = smov 0   ;;  %s8842_s0 = inlined_call_operand.vmem [shape: s32[2,3,4,8], index: 0, kind: input, shape index: {}]   ;;  %s8843_s1 = inlined_call_operand.vmem [shape: f32[2,82,32], index: 1, kind: input, shape index: {}]   ;;  %s8844_s2 = inlined_call_operand.vmem [shape: f32[2,18,128], index: 2, kind: input, shape index: {}]   ;;  %s8845_s3 = inlined_call_operand.vmem [shape: f32[2,2,32,96], index: 3, kind: input, shape index: {}]   ;;  %s8846_s4 = inlined_call_operand.vmem [shape: f32[2,2,32,32], index: 4, kind: input, shape index: {}]   ;;  %s8847_s5 = inlined_call_operand.vmem [shape: f32[2,2,32,64], index: 5, kind: input, shape index: {}]   ;;  %s8848_s6 = inlined_call_operand.vmem [shape: f32[2,2,64,32], index: 6, kind: input, shape index: {}]   ;;  %s8849_s7 = inlined_call_operand.vmem [shape: f32[2,4,32], index: 7, kind: output, shape index: {}]  }
   0x1 LB: > { %s6594_s25 = sadd.s32 4294967295, %s7204_s24   ;;  %p6598_p0 = scmp.ge.s32.totalorder %s7204_s24, 1  ;;  %s7204_s24 = sphi %s7258_s24, %s17_s24  }
   0x2   : > { %p297_p1 = scmp.lt.s32.totalorder %s7204_s24, 3 }
   0x4   : > { %p298_p2 = pnand %p6598_p0, %p297_p1 }
   0x5   : > { %p358_p3 = scmp.lt.s32.totalorder (!%p298_p2), %s6594_s25, 1  ;;  %s7208_s19 = smov (!%p298_p2), 104  }
   0x6   : > { %301 = sbr.rel (%p298_p2) target bundleno = 8588 (0x218c), region = 48  ;;  %s7209_s20 = smov (!%p298_p2), 112  }
   0x7   : > { %s7210_s21 = smov (!%p298_p2), 120   ;;  %s7211_s22 = smov (!%p298_p2), 96  }
   0x8   : > { %s7212_s23 = smov (!%p298_p2), 64   ;;  %s7217_s28 = smov (!%p298_p2), 16  }
   0xb   : > { %v415_v0 = vlaneseq  ;;  %s8851_s25 = smov (!%p358_p3, %s6594_s25), 1  ;;  %v7206_v23 = vmov 0.0   ;;  %vm505_vm2 = vcmask 523264   ;;  %vm535_vm4 = vcmask 261120  }
   0xc   : > { %s6721_s26 = smul.u32 12, %s8851_s25  ;;  %v7207_v43 = vmov 32.0   ;;  %s7325_s11 = sshll.u32 %s8851_s25, 6 }
   0xd   : > { %v419_v1 = vshrl.u32 %v415_v0, 7  ;;  %s6722_s27 = smul.u32 88, %s8851_s25  ;;  %v416_v21 = vand.u32 127, %v415_v0  ;;  %7010 = vrcp.f32 %v7207_v43  ;;  %s7331_s14 = scalar_lea.vmem %s8845_s3, %s7325_s11 }
   0xe   : > { %s7273_s30 = scalar_lea.vmem %s8842_s0, %s6721_s26  ;;  %s6723_s15 = smul.u32 24, %s8851_s25 }
   0xf   : > { %6745 = vset.pattern.permute.xlu0 %v419_v1  ;;  %6746 = vset.pattern.permute.xlu1 %v419_v1  ;;  %v7276_v2 = vld [vmem:[%s7273_s30] sm:$0xf]  ;;  %s7281_s10 = scalar_lea.vmem %s8843_s1, %s6722_s27  ;;  %v7294_v17 = vld [vmem:[%s7273_s30 + $0x4] sm:$0xf]  ;;  %s7215_s26 = smov 24  }
  0x10   : > { %6747 = vset.pattern.permute.xlu2 %v419_v1  ;;  %v417_v3 = vperm.slane %v7276_v2, 0  ;;  %v407_v4 = vld [vmem:[%s7281_s10 + $0x30] sm:$0xff]  ;;  %v408_v5 = vld [vmem:[%s7281_s10 + $0x38] sm:$0xff]  ;;  %v424_v7 = vperm.slane %v7276_v2, 1  ;;  %v405_v8 = vld [vmem:[%s7281_s10 + $0x20] sm:$0xff]  ;;  %v459_v18 = vperm.slane %v7294_v17, 0  ;;  %s7343_s18 = scalar_lea.vmem %s8844_s2, %s6723_s15  ;;  %s7875_s8 = scalar_lea.vmem %s8846_s4, %s7325_s11 }
  0x11   : > { %v458_v6 = vpack.c.bf16 %v408_v5, %v407_v4  ;;  %v406_v9 = vld [vmem:[%s7281_s10 + $0x28] sm:$0xff]  ;;  %v403_v11 = vld [vmem:[%s7281_s10 + $0x10] sm:$0xff]  ;;  %v404_v12 = vld [vmem:[%s7281_s10 + $0x18] sm:$0xff]  ;;  %v466_v19 = vperm.slane %v7294_v17, 1  ;;  %v431_v46 = vperm.slane %v7276_v2, 2  ;;  %v438_v49 = vperm.slane %v7276_v2, 3  ;;  %s8008_s12 = scalar_lea.vmem %s8847_s5, %s7325_s11 }
  0x12   : > { %v457_v10 = vpack.c.bf16 %v406_v9, %v405_v8  ;;  %v456_v13 = vpack.c.bf16 %v404_v12, %v403_v11  ;;  %v401_v14 = vld [vmem:[%s7281_s10] sm:$0xff]  ;;  %v402_v15 = vld [vmem:[%s7281_s10 + $0x8] sm:$0xff]  ;;  %v410_v27 = vld [vmem:[%s7281_s10 + $0x50] sm:$0x3]  ;;  %s7216_s27 = smov 8   ;;  %s6718_s11 = sshll.u32 %s8851_s25, 7 }
  0x13   : > { %516 = vmatpush.bf16.msra.mxu0 %v458_v6  ;;  %v455_v16 = vpack.c.bf16 %v402_v15, %v401_v14  ;;  %v7300_v29 = vperm.slane %v410_v27, 1  ;;  %v7302_v30 = vperm.slane %v410_v27, 0  ;;  %v7305_v31 = vld [vmem:[%s7281_s10 + $0x40] sm:$0xff]  ;;  %v7011_v44 = vpop.eup %7010  ;;  %v646_v4 = vld [vmem:[%s7331_s14 + $0x18] sm:$0xff]  ;;  %s8047_s16 = scalar_lea.vmem %s8848_s6, %s6718_s11 }
  0x14   : > { %v549_v45 = vmul.f32 32.0, %v7011_v44  ;;  %vm553_vm6 = vweird.f32 %v7011_v44  ;;  %v643_v6 = vld [vmem:[%s7331_s14] sm:$0xff] }
  0x15   : > { %v411_v27 = vld [vmem:[%s7343_s18] sm:$0xff] }
  0x16   : > { %v550_v47 = vsub.f32 1.0, %v549_v45  ;;  %v7361_v45 = vperm.slane %v411_v27, 2 }
  0x17   : > { %422 = vperm.xlu0 %6745, %v417_v3   ;;  %517 = vmatpush.bf16.msra.mxu0 %v457_v10  ;;  %v645_v3 = vld [vmem:[%s7331_s14 + $0x10] sm:$0xff] }
  0x18   : > { %464 = vperm.xlu1 %6746, %v459_v18   ;;  %v551_v48 = vmul.f32 %v7011_v44, %v550_v47  ;;  %v648_v5 = vpack.c.bf16 %v646_v4, %v645_v3 }
  0x1a   : > { %v552_v50 = vadd.f32 %v7011_v44, %v551_v48  ;;  %6719 = vmatpush.bf16.msra.mxu1 %v648_v5 }
  0x1b   : > { %518 = vmatpush.bf16.msra.mxu0 %v456_v13 }
  0x1c   : > { %v7317_v51 = vsel %vm553_vm6, %v7011_v44, %v552_v50 }
  0x1f   : > { %429 = vperm.xlu0 %6745, %v424_v7   ;;  %519 = vmatpush.bf16.msra.mxu0 %v455_v16  ;;  %v644_v7 = vld [vmem:[%s7331_s14 + $0x8] sm:$0xff] }
  0x20   : > { %471 = vperm.xlu1 %6746, %v466_v19   ;;  %v647_v9 = vpack.c.bf16 %v644_v7, %v643_v6 }
  0x22   : > { %6720 = vmatpush.bf16.msra.mxu1 %v647_v9 }
  0x23   : > { %688 = vmatpush.bf16.msrb.mxu0 %v648_v5 }
  0x27   : > { %689 = vmatpush.bf16.msrb.mxu0 %v647_v9 }
  0x89   : > { %v423_v20 = vpop.permute.xlu0 %422 }
  0x8a   : > { %vm445_vm0 = vcmp.eq.s32.totalorder %v423_v20, %v416_v21  ;;  %v465_v28 = vpop.permute.xlu1 %464 }
  0x8b   : > { %v449_v24 = vsel %vm445_vm0, 1.0, %v7206_v23  ;;  %vm487_vm3 = vcmp.gt.s32.totalorder %v465_v28, 0 }
  0x8c   : > { %v501_v33 = vsel %vm487_vm3, %v7300_v29, %v7302_v30  ;;  %vm796_vm3 = vcmask 64512  }
  0x91   : > { %v430_v22 = vpop.permute.xlu0 %429 }
  0x92   : > { %vm446_vm1 = vcmp.eq.s32.totalorder %v430_v22, %v416_v21  ;;  %v472_v36 = vpop.permute.xlu1 %471 }
  0x93   : > { %v450_v25 = vsel %vm446_vm1, 1.0, %v7206_v23  ;;  %vm488_vm5 = vcmp.gt.s32.totalorder %v472_v36, 0  ;;  %vm800_vm1 = vcmask 1043456  }
  0x94   : > { %v453_v26 = vpack.c.bf16 %v450_v25, %v449_v24  ;;  %v502_v40 = vsel %vm488_vm5, %v7300_v29, %v7302_v30 }
  0x96   : > { %6611 = vmatmul.msk.bf16.vlgmr.msra.gmra.mxu0 %vm505_vm2, %v453_v26 }
 0x113   : > { %v521_v32 = vpop.f32.mrf.mxu0 }
 0x114   : > { %v522_v34 = vadd.f32 %v521_v32, %v7305_v31 }
 0x116   : > { %v531_v35 = vadd.f32 %v522_v34, %v501_v33  ;;  %v7346_v33 = vperm.slane %v411_v27, 0 }
 0x118   : > { %v536_v37 = vsel %vm535_vm4, %v531_v35, 0.0 }
 0x119   : > { %537 = vadd.xlane.f32.xlu2 %v536_v37 }
 0x11b   : > { %v523_v38 = vpop.f32.mrf.mxu0 }
 0x11c   : > { %v524_v39 = vadd.f32 %v523_v38, %v7305_v31  ;;  %v7349_v38 = vperm.slane %v411_v27, 1 }
 0x11e   : > { %v532_v41 = vadd.f32 %v524_v39, %v502_v40 }
 0x120   : > { %v539_v42 = vsel %vm535_vm4, %v532_v41, 0.0 }
 0x121   : > { %540 = vadd.xlane.f32.xlu2 %v539_v42 }
 0x139   : > { %436 = vperm.xlu2 %6747, %v431_v46  }
 0x141   : > { %443 = vperm.xlu2 %6747, %v438_v49  }
 0x18c   : > { %v538_v52 = vpop.xlane.xlu2 %537 }
 0x18d   : > { %v555_v53 = vmul.f32 %v7317_v51, %v538_v52 }
 0x18f   : > { %v559_v54 = vsub.f32 %v531_v35, %v555_v53 }
 0x191   : > { %v563_v55 = vmul.f32 %v559_v54, %v559_v54 }
 0x193   : > { %v567_v56 = vsel %vm535_vm4, %v563_v55, 0.0 }
 0x194   : > { %568 = vadd.xlane.f32.xlu0 %v567_v56  ;;  %v541_v57 = vpop.xlane.xlu2 %540 }
 0x195   : > { %v556_v58 = vmul.f32 %v7317_v51, %v541_v57 }
 0x197   : > { %v560_v59 = vsub.f32 %v532_v41, %v556_v58 }
 0x199   : > { %v564_v60 = vmul.f32 %v560_v59, %v560_v59 }
 0x19b   : > { %v570_v61 = vsel %vm535_vm4, %v564_v60, 0.0 }
 0x19c   : > { %571 = vadd.xlane.f32.xlu1 %v570_v61  ;;  %v437_v62 = vpop.permute.xlu2 %436 }
 0x19d   : > { %vm447_vm7 = vcmp.eq.s32.totalorder %v437_v62, %v416_v21  ;;  %v480_v62 = vperm.slane %v7294_v17, 3 }
 0x19e   : > { %v451_v63 = vsel %vm447_vm7, 1.0, %v7206_v23 }
 0x1a4   : > { %v444_v0 = vpop.permute.xlu2 %443 }
 0x1a5   : > { %vm448_vm8 = vcmp.eq.s32.totalorder %v444_v0, %v416_v21 }
 0x1a6   : > { %v452_v1 = vsel %vm448_vm8, 1.0, %v7206_v23 }
 0x1a7   : > { %v454_v2 = vpack.c.bf16 %v452_v1, %v451_v63  ;;  %v473_v63 = vperm.slane %v7294_v17, 2 }
 0x1a9   : > { %6612 = vmatmul.msk.bf16.gmra.mxu0 %vm505_vm2, %v454_v2 }
 0x207   : > { %v569_v8 = vpop.xlane.xlu0 %568 }
 0x208   : > { %v579_v10 = vmul.f32 %v569_v8, %v7317_v51 }
 0x20a   : > { %v583_v11 = vadd.f32 1e-12, %v579_v10 }
 0x20c   : > { %7012 = vrsqrt.f32 %v583_v11  ;;  %vm593_vm10 = vweird.f32 %v583_v11 }
 0x20f   : > { %v572_v12 = vpop.xlane.xlu1 %571 }
 0x210   : > { %v580_v13 = vmul.f32 %v572_v12, %v7317_v51 }
 0x212   : > { %v7013_v14 = vpop.eup %7012  ;;  %v584_v15 = vadd.f32 1e-12, %v580_v13 }
 0x213   : > { %v588_v16 = vmul.f32 %v7013_v14, %v583_v11  ;;  %vm594_vm9 = vweird.f32 %v7013_v14 }
 0x214   : > { %7014 = vrsqrt.f32 %v584_v15  ;;  %vm595_vm11 = vmor %vm593_vm10, %vm594_vm9  ;;  %vm603_vm13 = vweird.f32 %v584_v15 }
 0x215   : > { %v589_v18 = vmul.f32 %v7013_v14, %v588_v16 }
 0x217   : > { %v590_v19 = vmul.f32 0.5, %v589_v18 }
 0x219   : > { %v591_v20 = vsub.f32 1.5, %v590_v19 }
 0x21a   : > { %v7015_v21 = vpop.eup %7014 }
 0x21b   : > { %v592_v22 = vmul.f32 %v7013_v14, %v591_v20  ;;  %v598_v23 = vmul.f32 %v7015_v21, %v584_v15  ;;  %vm604_vm12 = vweird.f32 %v7015_v21 }
 0x21c   : > { %vm605_vm14 = vmor %vm603_vm13, %vm604_vm12  ;;  %vm1335_vm12 = vcmask 130048   ;;  %vm1337_vm13 = vcmask 195584  }
 0x21d   : > { %v599_v24 = vmul.f32 %v7015_v21, %v598_v23  ;;  %v596_v25 = vsel %vm595_vm11, %v7013_v14, %v592_v22  ;;  %vm1212_vm11 = vcmask 1047556  }
 0x21e   : > { %v627_v32 = vmul.f32 %v596_v25, %v559_v54 }
 0x21f   : > { %v600_v26 = vmul.f32 0.5, %v599_v24 }
 0x220   : > { %v632_v37 = vmul.f32 %v7346_v33, %v627_v32 }
 0x221   : > { %v601_v28 = vsub.f32 1.5, %v600_v26 }
 0x222   : > { %v7353_v40 = vadd.f32 %v7349_v38, %v632_v37 }
 0x223   : > { %v602_v34 = vmul.f32 %v7015_v21, %v601_v28 }
 0x225   : > { %v606_v35 = vsel %vm605_vm14, %v7015_v21, %v602_v34 }
 0x226   : > { %v628_v36 = vmul.f32 %v606_v35, %v560_v59  ;;  %v526_v43 = vpop.f32.mrf.mxu0 }
 0x227   : > { %v527_v5 = vadd.f32 %v526_v43, %v7305_v31 }
 0x228   : > { %v633_v39 = vmul.f32 %v7346_v33, %v628_v36 }
 0x22a   : > { %v7356_v41 = vadd.f32 %v7349_v38, %v633_v39 }
 0x22c   : > { %v673_v42 = vpack.c.bf16 %v7356_v41, %v7353_v40 }
 0x22e   : > { %6613 = vmatmul.msk.bf16.vlgmr.msrb.gmra.mxu0 %vm535_vm4, %v673_v42  ;;  %v528_v44 = vpop.f32.mrf.mxu0 }
 0x22f   : > { %v529_v9 = vadd.f32 %v528_v44, %v7305_v31 }
 0x2ab   : > { %v691_v46 = vpop.f32.mrf.mxu0 }
 0x2ac   : > { %v692_v47 = vadd.f32 %v691_v46, %v7361_v45 }
 0x2ae   : > { %v701_v48 = vpack.c.bf16 %v692_v47, %v692_v47  ;;  %v400_v47 = vld [vmem:[%s7273_s30 + $0x8] sm:$0xf] }
 0x2b0   : > { %710 = vrot.lane.b32.xlu1 %v701_v48, %s7208_s19  ;;  %708 = vrot.lane.b32.xlu0 %v701_v48, %s7209_s20  ;;  %v712_v49 = vunpack.c.l.b16 %v701_v48 }
 0x2b1   : > { %706 = vrot.lane.b32.xlu2 %v701_v48, %s7210_s21 }
 0x2b2   : > { %v716_v50 = vpack.c.b16 %v712_v49, %v712_v49 }
 0x2b3   : > { %v693_v13 = vpop.f32.mrf.mxu0 }
 0x2b4   : > { %v694_v15 = vadd.f32 %v693_v13, %v7361_v45 }
 0x2b6   : > { %v7402_v16 = vpack.c.bf16 %v694_v15, %v694_v15 }
 0x2b9   : > { %720 = vrot.lane.b32.xlu2 %v716_v50, %s7211_s22 }
 0x30b   : > { %v7368_v52 = vpop.permute.xlu2 %706 }
 0x30c   : > { %v713_v53 = vunpack.c.l.b16 %v7368_v52 }
 0x30e   : > { %v7371_v54 = vpack.c.b16 %v713_v53, %v713_v53 }
 0x310   : > { %722 = vrot.lane.b32.xlu0 %v7371_v54, %s7211_s22 }
 0x313   : > { %v721_v55 = vpop.permute.xlu2 %720 }
 0x314   : > { %732 = vxpose.xlu2.c.b16.start.end [1/1] (short) (narrow) %v721_v55, 16 }
 0x322   : > { %v7375_v56 = vpop.permute.xlu1 %710  ;;  %v7377_v57 = vpop.permute.xlu0 %708 }
 0x323   : > { %v715_v58 = vunpack.c.l.b16 %v7375_v56  ;;  %v714_v59 = vunpack.c.l.b16 %v7377_v57 }
 0x325   : > { %v7381_v60 = vpack.c.b16 %v714_v59, %v714_v59  ;;  %v7383_v61 = vpack.c.b16 %v715_v58, %v715_v58 }
 0x327   : > { %724 = vrot.lane.b32.xlu1 %v7381_v60, %s7211_s22  ;;  %726 = vrot.lane.b32.xlu0 %v7383_v61, %s7211_s22 }
 0x32f   : > { %485 = vperm.xlu1 %6746, %v480_v62   ;;  %478 = vperm.xlu0 %6745, %v473_v63  }
 0x382   : > { %v723_v0 = vpop.permute.xlu0 %722 }
 0x399   : > { %v725_v1 = vpop.permute.xlu1 %724  ;;  %v727_v2 = vpop.permute.xlu0 %726 }
 0x39a   : > { %6748 = vxpose.binary.xlu1.c.b16.start.end [1/2] (short) (narrow) %v725_v1, %v723_v0, 16 }
 0x39b   : > { %780 = vxpose.xlu0.c.b16.start.end [1/1] (short) (narrow) %v727_v2, 16 }
 0x3a1   : > { %v486_v3 = vpop.permute.xlu1 %485  ;;  %v479_v4 = vpop.permute.xlu0 %478 }
 0x3a2   : > { %vm489_vm15 = vcmp.gt.s32.totalorder %v479_v4, 0  ;;  %vm490_vm0 = vcmp.gt.s32.totalorder %v486_v3, 0 }
 0x3a3   : > { %v503_v6 = vsel %vm489_vm15, %v7300_v29, %v7302_v30  ;;  %v504_v17 = vsel %vm490_vm0, %v7300_v29, %v7302_v30  ;;  %v1346_v29 = vunpack.c.l.b16 %v7402_v16 }
 0x3a4   : > { %v533_v7 = vadd.f32 %v527_v5, %v503_v6  ;;  %v534_v10 = vadd.f32 %v529_v9, %v504_v17 }
 0x3a5   : > { %v7405_v30 = vpack.c.b16 %v1346_v29, %v1346_v29 }
 0x3a6   : > { %v542_v8 = vsel %vm535_vm4, %v533_v7, 0.0  ;;  %v545_v11 = vsel %vm535_vm4, %v534_v10, 0.0 }
 0x3a7   : > { %543 = vadd.xlane.f32.xlu2 %v542_v8 }
 0x3af   : > { %546 = vadd.xlane.f32.xlu2 %v545_v11 }
 0x3b5   : > { %v740_v12 = vpop.trf.xlu2 }
 0x3b6   : > { %v802_v14 = vsel %vm800_vm1, %v740_v12, 0 }
 0x3b7   : > { %811 = vmatpush.bf16.msra.mxu2 %v802_v14 }
 0x3ba   : > { %6615 = vmatmul.msk.bf16.vlgmr.msra.gmra.mxu2 %vm796_vm3, %v701_v48  ;;  %v414_v48 = vcvt.s32.f32 %v400_v47 }
 0x3bc   : > { %v641_v49 = vsub.f32 1.0, %v414_v48 }
 0x3c7   : > { %1354 = vrot.lane.b32.xlu2 %v7405_v30, %s7211_s22 }
 0x3cf   : > { %1340 = vrot.lane.b32.xlu2 %v7402_v16, %s7210_s21 }
 0x3f4   : > { %931 = vrot.lane.b32.xlu1 %v716_v50, %s7212_s23  ;;  %v7449_v50 = vmul.f32 -1e+09, %v641_v49 }
 0x3fc   : > { %1342 = vrot.lane.b32.xlu1 %v7402_v16, %s7209_s20 }
 0x404   : > { %1344 = vrot.lane.b32.xlu1 %v7402_v16, %s7208_s19 }
 0x41a   : > { %v544_v31 = vpop.xlane.xlu2 %543 }
 0x41b   : > { %v557_v18 = vmul.f32 %v7317_v51, %v544_v31 }
 0x41d   : > { %v7417_v19 = vsub.f32 %v533_v7, %v557_v18 }
 0x41f   : > { %v565_v20 = vmul.f32 %v7417_v19, %v7417_v19 }
 0x421   : > { %v573_v21 = vsel %vm535_vm4, %v565_v20, 0.0 }
 0x422   : > { %574 = vadd.xlane.f32.xlu2 %v573_v21  ;;  %v547_v22 = vpop.xlane.xlu2 %546 }
 0x423   : > { %v558_v23 = vmul.f32 %v7317_v51, %v547_v22 }
 0x425   : > { %v7423_v24 = vsub.f32 %v534_v10, %v558_v23 }
 0x427   : > { %v566_v25 = vmul.f32 %v7423_v24, %v7423_v24 }
 0x429   : > { %v576_v26 = vsel %vm535_vm4, %v566_v25, 0.0 }
 0x42a   : > { %v1355_v27 = vpop.permute.xlu2 %1354 }
 0x42e   : > { %577 = vadd.xlane.f32.xlu1 %v576_v26 }
 0x432   : > { %v7428_v28 = vpop.permute.xlu2 %1340 }
 0x433   : > { %v1347_v32 = vunpack.c.l.b16 %v7428_v28 }
 0x435   : > { %v7433_v35 = vpack.c.b16 %v1347_v32, %v1347_v32 }
 0x43a   : > { %933 = vrot.lane.b32.xlu2 %v7371_v54, %s7212_s23  ;;  %v7452_v54 = vperm.slane %v7449_v50, 0 }
 0x43d   : > { %v813_v34 = vpop.f32.mrf.mxu2 }
 0x442   : > { %1356 = vrot.lane.b32.xlu2 %v7433_v35, %s7211_s22 }
 0x445   : > { %v815_v36 = vpop.f32.mrf.mxu2 }
 0x446   : > { %v6749_v37 = vpop.trf.xlu1 }
 0x447   : > { %v821_v39 = vsel %vm800_vm1, %v6749_v37, 0  ;;  %v788_v42 = vpop.trf.xlu0 }
 0x448   : > { %830 = vmatpush.bf16.msra.mxu3 %v821_v39  ;;  %v859_v43 = vsel %vm800_vm1, %v788_v42, 0 }
 0x44a   : > { %935 = vrot.lane.b32.xlu2 %v7381_v60, %s7212_s23 }
 0x44b   : > { %6616 = vmatmul.msk.bf16.vlgmr.msra.gmra.mxu3 %vm796_vm3, %v7368_v52  ;;  %v874_v52 = vmul.f32 0.35355338, %v813_v34 }
 0x44c   : > { %868 = vmatpush.bf16.msrb.mxu3 %v859_v43 }
 0x44d   : > { %v7455_v55 = vadd.f32 %v7452_v54, %v874_v52 }
 0x44e   : > { %v6750_v44 = vpop.trf.xlu1 }
 0x44f   : > { %v840_v46 = vsel %vm800_vm1, %v6750_v44, 0 }
 0x450   : > { %849 = vmatpush.bf16.msrb.mxu2 %v840_v46 }
 0x453   : > { %6617 = vmatmul.msk.bf16.vlgmr.msrb.gmra.mxu2 %vm796_vm3, %v7377_v57  ;;  %v883_v57 = vsel %vm796_vm3, %v7455_v55, -inf }
 0x45b   : > { %6618 = vmatmul.msk.bf16.vlgmr.msrb.gmra.mxu3 %vm796_vm3, %v7375_v56 }
 0x466   : > { %v932_v53 = vpop.permute.xlu1 %931 }
 0x467   : > { %6751 = vxpose.binary.xlu0.c.b16.start.end [1/2] (short) (narrow) %v1355_v27, %v932_v53, 16 }
 0x46e   : > { %v7461_v56 = vpop.permute.xlu1 %1342 }
 0x473   : > { %884 = vmax.xlane.f32.xlu2 %v883_v57 }
 0x476   : > { %v7464_v62 = vpop.permute.xlu1 %1344 }
 0x477   : > { %v1349_v53 = vunpack.c.l.b16 %v7464_v62 }
 0x48b   : > { %937 = vrot.lane.b32.xlu2 %v7383_v61, %s7212_s23 }
 0x495   : > { %v575_v58 = vpop.xlane.xlu2 %574 }
 0x496   : > { %v581_v59 = vmul.f32 %v575_v58, %v7317_v51  ;;  %v7491_v58 = vpack.c.b16 %v1349_v53, %v1349_v53 }
 0x498   : > { %v585_v60 = vadd.f32 1e-12, %v581_v59  ;;  %v1348_v59 = vunpack.c.l.b16 %v7461_v56 }
 0x49a   : > { %7016 = vrsqrt.f32 %v585_v60  ;;  %vm613_vm6 = vweird.f32 %v585_v60 }
 0x4a0   : > { %v7017_v63 = vpop.eup %7016 }
 0x4a1   : > { %v608_v0 = vmul.f32 %v7017_v63, %v585_v60  ;;  %v578_v1 = vpop.xlane.xlu1 %577  ;;  %vm614_vm5 = vweird.f32 %v7017_v63  ;;  %v7496_v60 = vpack.c.b16 %v1348_v59, %v1348_v59 }
 0x4a2   : > { %v582_v2 = vmul.f32 %v578_v1, %v7317_v51  ;;  %vm615_vm7 = vmor %vm613_vm6, %vm614_vm5 }
 0x4a3   : > { %v609_v3 = vmul.f32 %v7017_v63, %v608_v0 }
 0x4a4   : > { %v586_v4 = vadd.f32 1e-12, %v582_v2 }
 0x4a5   : > { %v610_v5 = vmul.f32 0.5, %v609_v3 }
 0x4a6   : > { %7018 = vrsqrt.f32 %v586_v4  ;;  %vm623_vm9 = vweird.f32 %v586_v4 }
 0x4a7   : > { %v611_v6 = vsub.f32 1.5, %v610_v5 }
 0x4a9   : > { %v612_v7 = vmul.f32 %v7017_v63, %v611_v6 }
 0x4ab   : > { %v616_v9 = vsel %vm615_vm7, %v7017_v63, %v612_v7 }
 0x4ac   : > { %v7019_v61 = vpop.eup %7018  ;;  %v629_v12 = vmul.f32 %v616_v9, %v7417_v19  ;;  %v934_v19 = vpop.permute.xlu2 %933 }
 0x4ad   : > { %v618_v8 = vmul.f32 %v7019_v61, %v586_v4  ;;  %vm624_vm8 = vweird.f32 %v7019_v61 }
 0x4ae   : > { %vm625_vm10 = vmor %vm623_vm9, %vm624_vm8  ;;  %v634_v29 = vmul.f32 %v7346_v33, %v629_v12 }
 0x4af   : > { %v619_v17 = vmul.f32 %v7019_v61, %v618_v8 }
 0x4b0   : > { %v7472_v18 = vadd.f32 %v7349_v38, %v634_v29 }
 0x4b1   : > { %v620_v10 = vmul.f32 0.5, %v619_v17 }
 0x4b3   : > { %v621_v11 = vsub.f32 1.5, %v620_v10 }
 0x4b4   : > { %v1357_v25 = vpop.permute.xlu2 %1356 }
 0x4b5   : > { %v622_v13 = vmul.f32 %v7019_v61, %v621_v11 }
 0x4b7   : > { %v626_v14 = vsel %vm625_vm10, %v7019_v61, %v622_v13 }
 0x4b8   : > { %v630_v15 = vmul.f32 %v626_v14, %v7423_v24 }
 0x4ba   : > { %v635_v31 = vmul.f32 %v7346_v33, %v630_v15 }
 0x4bc   : > { %v7475_v20 = vadd.f32 %v7349_v38, %v635_v31  ;;  %v7484_v36 = vpop.permute.xlu2 %935 }
 0x4be   : > { %v674_v21 = vpack.c.bf16 %v7475_v20, %v7472_v18 }
 0x4c0   : > { %6614 = vmatmul.msk.bf16.vlgmr.msra.gmra.mxu1 %vm535_vm4, %v674_v21 }
 0x4ce   : > { %v832_v22 = vpop.f32.mrf.mxu3 }
 0x4cf   : > { %v875_v23 = vmul.f32 0.35355338, %v832_v22 }
 0x4d1   : > { %v880_v24 = vadd.f32 %v7452_v54, %v875_v23 }
 0x4d3   : > { %v886_v26 = vsel %vm796_vm3, %v880_v24, -inf }
 0x4d4   : > { %887 = vmax.xlane.f32.xlu2 %v886_v26 }
 0x4d6   : > { %v834_v33 = vpop.f32.mrf.mxu3  ;;  %v851_v27 = vpop.f32.mrf.mxu2 }
 0x4d7   : > { %v876_v32 = vmul.f32 0.35355338, %v851_v27 }
 0x4d9   : > { %v881_v38 = vadd.f32 %v7452_v54, %v876_v32 }
 0x4db   : > { %v889_v34 = vsel %vm796_vm3, %v881_v38, -inf }
 0x4dc   : > { %890 = vmax.xlane.f32.xlu1 %v889_v34 }
 0x4de   : > { %v853_v37 = vpop.f32.mrf.mxu2  ;;  %v870_v39 = vpop.f32.mrf.mxu3 }
 0x4df   : > { %v877_v42 = vmul.f32 0.35355338, %v870_v39 }
 0x4e1   : > { %v882_v43 = vadd.f32 %v7452_v54, %v877_v42 }
 0x4e3   : > { %v892_v44 = vsel %vm796_vm3, %v882_v43, -inf }
 0x4e4   : > { %893 = vmax.xlane.f32.xlu2 %v892_v44 }
 0x4e6   : > { %v872_v46 = vpop.f32.mrf.mxu3  ;;  %v885_v47 = vpop.xlane.xlu2 %884 }
 0x4e7   : > { %v895_v48 = vsub.f32 %v7455_v55, %v885_v47 }
 0x4e9   : > { %v899_v49 = vmul.f32 1.442695, %v895_v48 }
 0x4eb   : > { %7020 = vpow2.f32 %v899_v49 }
 0x4ee   : > { %v938_v55 = vpop.permute.xlu2 %937 }
 0x4f1   : > { %v7021_v52 = vpop.eup %7020 }
 0x4f2   : > { %v907_v57 = vsel %vm796_vm3, %v7021_v52, 0.0 }
 0x4f3   : > { %908 = vadd.xlane.f32.xlu0 %v907_v57 }
 0x4f5   : > { %1360 = vrot.lane.b32.xlu1 %v7491_v58, %s7211_s22 }
 0x4fc   : > { %1358 = vrot.lane.b32.xlu2 %v7496_v60, %s7211_s22 }
 0x513   : > { %v6752_v6 = vpop.trf.xlu0 }
 0x51b   : > { %v6753_v11 = vpop.trf.xlu0 }
 0x51c   : > { %v1434_v33 = vsel %vm800_vm1, %v6753_v11, 0 }
 0x522   : > { %6754 = vxpose.binary.xlu2.c.b16.start.end [1/2] (short) (narrow) %v1357_v25, %v934_v19, 16 }
 0x53d   : > { %v696_v12 = vpop.f32.mrf.mxu1 }
 0x53e   : > { %v697_v14 = vadd.f32 %v696_v12, %v7361_v45 }
 0x540   : > { %v7504_v29 = vpack.c.bf16 %v697_v14, %v697_v14 }
 0x542   : > { %v1975_v22 = vunpack.c.l.b16 %v7504_v29 }
 0x547   : > { %v888_v63 = vpop.xlane.xlu2 %887 }
 0x548   : > { %v896_v0 = vsub.f32 %v880_v24, %v888_v63  ;;  %v7509_v24 = vpack.c.b16 %v1975_v22, %v1975_v22 }
 0x54a   : > { %v901_v1 = vmul.f32 1.442695, %v896_v0 }
 0x54c   : > { %7022 = vpow2.f32 %v901_v1  ;;  %v7531_v1 = vperm.slane %v7449_v50, 1 }
 0x54f   : > { %v891_v2 = vpop.xlane.xlu1 %890 }
 0x550   : > { %v897_v3 = vsub.f32 %v881_v38, %v891_v2 }
 0x552   : > { %v7023_v4 = vpop.eup %7022  ;;  %v903_v5 = vmul.f32 1.442695, %v897_v3 }
 0x553   : > { %v910_v61 = vsel %vm796_vm3, %v7023_v4, 0.0 }
 0x554   : > { %7024 = vpow2.f32 %v903_v5  ;;  %911 = vadd.xlane.f32.xlu0 %v910_v61 }
 0x557   : > { %v894_v7 = vpop.xlane.xlu2 %893 }
 0x558   : > { %v898_v8 = vsub.f32 %v882_v43, %v894_v7 }
 0x55a   : > { %v7025_v17 = vpop.eup %7024  ;;  %v905_v9 = vmul.f32 1.442695, %v898_v8 }
 0x55b   : > { %v913_v10 = vsel %vm796_vm3, %v7025_v17, 0.0 }
 0x55c   : > { %7026 = vpow2.f32 %v905_v9  ;;  %914 = vadd.xlane.f32.xlu1 %v913_v10 }
 0x55f   : > { %v1359_v19 = vpop.permute.xlu2 %1358 }
 0x562   : > { %v7027_v13 = vpop.eup %7026 }
 0x563   : > { %v916_v15 = vsel %vm796_vm3, %v7027_v13, 0.0 }
 0x564   : > { %917 = vadd.xlane.f32.xlu1 %v916_v15 }
 0x566   : > { %v909_v31 = vpop.xlane.xlu0 %908 }
 0x567   : > { %7028 = vrcp.f32 %v909_v31  ;;  %v1361_v21 = vpop.permute.xlu1 %1360 }
 0x568   : > { %1563 = vrot.lane.b32.xlu0 %v7405_v30, %s7212_s23 }
 0x569   : > { %6760 = vxpose.binary.xlu2.c.b16.start.end [1/2] (short) (narrow) %v1361_v21, %v1359_v19, 16  ;;  %v7558_v21 = vpop.f32.mrf.mxu1 }
 0x56d   : > { %v7029_v23 = vpop.eup %7028 }
 0x56e   : > { %v923_v25 = vmul.f32 %v7029_v23, %v7021_v52 }
 0x570   : > { %1983 = vrot.lane.b32.xlu0 %v7509_v24, %s7211_s22  ;;  %v927_v26 = vpack.c.bf16 %v923_v25, %v923_v25 }
 0x572   : > { %v1011_v27 = vsel %vm796_vm3, %v927_v26, 0 }
 0x573   : > { %1020 = vmatpush.bf16.xpose.msra.mxu2 %v1011_v27 }
 0x57a   : > { %6619 = vmatmul.msk.bf16.vlgmr.msra.gmra.mxu2 %vm796_vm3, %v6752_v6 }
 0x57b   : > { %1443 = vmatpush.bf16.msrb.mxu2 %v1434_v33 }
 0x58a   : > { %6623 = vmatmul.msk.bf16.vlgmr.msrb.gmra.mxu2 %vm796_vm3, %v7402_v16 }
 0x59e   : > { %6757 = vxpose.binary.xlu1.c.b16.start.end [1/2] (short) (narrow) %v938_v55, %v7484_v36, 16 }
 0x5c3   : > { %v6755_v32 = vpop.trf.xlu2 }
 0x5c7   : > { %v912_v30 = vpop.xlane.xlu0 %911 }
 0x5c8   : > { %7030 = vrcp.f32 %v912_v30 }
 0x5cb   : > { %v6756_v39 = vpop.trf.xlu2 }
 0x5cc   : > { %v1453_v43 = vsel %vm800_vm1, %v6756_v39, 0 }
 0x5ce   : > { %v7031_v38 = vpop.eup %7030 }
 0x5cf   : > { %v915_v34 = vpop.xlane.xlu1 %914  ;;  %v924_v37 = vmul.f32 %v7031_v38, %v7023_v4 }
 0x5d0   : > { %7032 = vrcp.f32 %v915_v34 }
 0x5d1   : > { %v928_v42 = vpack.c.bf16 %v924_v37, %v924_v37 }
 0x5d3   : > { %v1030_v44 = vsel %vm796_vm3, %v928_v42, 0 }
 0x5d4   : > { %1039 = vmatpush.bf16.xpose.msra.mxu3 %v1030_v44 }
 0x5d6   : > { %v7033_v46 = vpop.eup %7032 }
 0x5d7   : > { %v918_v47 = vpop.xlane.xlu1 %917  ;;  %v925_v16 = vmul.f32 %v7033_v46, %v7025_v17 }
 0x5d8   : > { %7034 = vrcp.f32 %v918_v47 }
 0x5d9   : > { %v929_v36 = vpack.c.bf16 %v925_v16, %v925_v16 }
 0x5da   : > { %v1564_v48 = vpop.permute.xlu0 %1563 }
 0x5db   : > { %6620 = vmatmul.msk.bf16.vlgmr.msra.gmra.mxu3 %vm796_vm3, %v6755_v32  ;;  %v1049_v49 = vsel %vm796_vm3, %v929_v36, 0 }
 0x5dc   : > { %1462 = vmatpush.bf16.msrb.mxu3 %v1453_v43  ;;  %1058 = vmatpush.bf16.xpose.msrb.mxu1 %v1049_v49 }
 0x5de   : > { %v7035_v53 = vpop.eup %7034 }
 0x5df   : > { %v926_v52 = vmul.f32 %v7035_v53, %v7027_v13 }
 0x5e1   : > { %v930_v57 = vpack.c.bf16 %v926_v52, %v926_v52 }
 0x5e2   : > { %v1984_v59 = vpop.permute.xlu0 %1983 }
 0x5e3   : > { %6763 = vxpose.binary.xlu0.c.b16.start.end [1/2] (short) (narrow) %v1984_v59, %v1564_v48, 16  ;;  %v1068_v55 = vsel %vm796_vm3, %v930_v57, 0 }
 0x5e4   : > { %1077 = vmatpush.bf16.xpose.msra.mxu0 %v1068_v55 }
 0x5eb   : > { %6624 = vmatmul.msk.bf16.vlgmr.msrb.gmra.mxu3 %vm796_vm3, %v7428_v28 }
 0x5f8   : > { %1565 = vrot.lane.b32.xlu1 %v7433_v35, %s7212_s23 }
 0x5fd   : > { %v7528_v63 = vpop.f32.mrf.mxu2 }
 0x605   : > { %v1024_v0 = vpop.f32.mrf.mxu2 }
 0x60a   : > { %v6761_v28 = vpop.trf.xlu2 }
 0x60b   : > { %v1472_v35 = vsel %vm800_vm1, %v6761_v28, 0 }
 0x60c   : > { %1481 = vmatpush.bf16.msra.mxu1 %v1472_v35 }
 0x60d   : > { %v1445_v2 = vpop.f32.mrf.mxu2 }
 0x60e   : > { %v1506_v3 = vmul.f32 0.35355338, %v1445_v2 }
 0x610   : > { %v1511_v4 = vadd.f32 %v7531_v1, %v1506_v3 }
 0x612   : > { %v1515_v5 = vsel %vm796_vm3, %v1511_v4, -inf  ;;  %v6762_v61 = vpop.trf.xlu2 }
 0x613   : > { %1516 = vmax.xlane.f32.xlu2 %v1515_v5  ;;  %v1491_v7 = vsel %vm800_vm1, %v6762_v61, 0 }
 0x614   : > { %1500 = vmatpush.bf16.msrb.mxu0 %v1491_v7 }
 0x615   : > { %v1447_v6 = vpop.f32.mrf.mxu2 }
 0x62b   : > { %1973 = vrot.lane.b32.xlu2 %v7504_v29, %s7208_s19 }
 0x633   : > { %1569 = vrot.lane.b32.xlu2 %v7491_v58, %s7212_s23 }
 0x64a   : > { %v6758_v8 = vpop.trf.xlu1 }
 0x64b   : > { %6621 = vmatmul.msk.bf16.vlgmr.msrb.gmra.mxu1 %vm796_vm3, %v6758_v8 }
 0x651   : > { %1969 = vrot.lane.b32.xlu0 %v7504_v29, %s7210_s21 }
 0x652   : > { %v6759_v17 = vpop.trf.xlu1 }
 0x653   : > { %6622 = vmatmul.msk.bf16.vlgmr.msra.gmra.mxu0 %vm796_vm3, %v6759_v17 }
 0x65b   : > { %6625 = vmatmul.msk.bf16.vlgmr.msra.gmra.mxu1 %vm796_vm3, %v7461_v56 }
 0x65e   : > { %v7547_v58 = vpop.f32.mrf.mxu3 }
 0x663   : > { %6626 = vmatmul.msk.bf16.vlgmr.msrb.gmra.mxu0 %vm796_vm3, %v7464_v62 }
 0x666   : > { %v1043_v9 = vpop.f32.mrf.mxu3 }
 0x66a   : > { %v1566_v57 = vpop.permute.xlu1 %1565 }
 0x66e   : > { %v1464_v10 = vpop.f32.mrf.mxu3 }
 0x66f   : > { %v1507_v38 = vmul.f32 0.35355338, %v1464_v10 }
 0x671   : > { %v1512_v43 = vadd.f32 %v7531_v1, %v1507_v38 }
 0x673   : > { %v1518_v46 = vsel %vm796_vm3, %v1512_v43, -inf }
 0x676   : > { %v1466_v11 = vpop.f32.mrf.mxu3 }
 0x686   : > { %v1517_v12 = vpop.xlane.xlu2 %1516 }
 0x687   : > { %v1527_v37 = vsub.f32 %v1511_v4, %v1517_v12 }
 0x689   : > { %v1531_v44 = vmul.f32 1.442695, %v1527_v37 }
 0x68b   : > { %7036 = vpow2.f32 %v1531_v44  ;;  %v7601_v44 = vperm.slane %v7449_v50, 2 }
 0x68e   : > { %v7551_v13 = vpop.permute.xlu2 %1973 }
 0x68f   : > { %v1978_v14 = vunpack.c.l.b16 %v7551_v13  ;;  %v6764_v31 = vpop.trf.xlu0 }
 0x691   : > { %v7554_v15 = vpack.c.b16 %v1978_v14, %v1978_v14  ;;  %v7037_v16 = vpop.eup %7036 }
 0x692   : > { %v1539_v36 = vsel %vm796_vm3, %v7037_v16, 0.0 }
 0x693   : > { %1989 = vrot.lane.b32.xlu2 %v7554_v15, %s7211_s22 }
 0x697   : > { %v6765_v56 = vpop.trf.xlu0 }
 0x698   : > { %v2063_v17 = vsel %vm800_vm1, %v6765_v56, 0 }
 0x6c3   : > { %v7560_v19 = vpop.permute.xlu0 %1969 }
 0x6c4   : > { %v1976_v62 = vunpack.c.l.b16 %v7560_v19 }
 0x6c6   : > { %v7563_v22 = vpack.c.b16 %v1976_v62, %v1976_v62 }
 0x6c8   : > { %1985 = vrot.lane.b32.xlu1 %v7563_v22, %s7211_s22  ;;  %v7567_v23 = vpop.f32.mrf.mxu1 }
 0x6d0   : > { %v1062_v25 = vpop.f32.mrf.mxu1  ;;  %v7569_v26 = vpop.f32.mrf.mxu0 }
 0x6d8   : > { %v1081_v33 = vpop.f32.mrf.mxu0  ;;  %v1483_v27 = vpop.f32.mrf.mxu1 }
 0x6d9   : > { %v1508_v30 = vmul.f32 0.35355338, %v1483_v27 }
 0x6db   : > { %v1513_v32 = vadd.f32 %v7531_v1, %v1508_v30 }
 0x6dd   : > { %v1521_v34 = vsel %vm796_vm3, %v1513_v32, -inf }
 0x6de   : > { %1522 = vmax.xlane.f32.xlu0 %v1521_v34 }
 0x6e0   : > { %v1485_v39 = vpop.f32.mrf.mxu1  ;;  %v1502_v42 = vpop.f32.mrf.mxu0 }
 0x6e1   : > { %v1509_v48 = vmul.f32 0.35355338, %v1502_v42 }
 0x6e3   : > { %v1514_v49 = vadd.f32 %v7531_v1, %v1509_v48 }
 0x6e5   : > { %v1524_v53 = vsel %vm796_vm3, %v1514_v49, -inf }
 0x6e6   : > { %1519 = vmax.xlane.f32.xlu0 %v1518_v46 }
 0x6e8   : > { %v1504_v47 = vpop.f32.mrf.mxu0 }
 0x6f2   : > { %1540 = vadd.xlane.f32.xlu1 %v1539_v36 }
 0x6fa   : > { %1971 = vrot.lane.b32.xlu0 %v7504_v29, %s7209_s20 }
 0x724   : > { %1525 = vmax.xlane.f32.xlu0 %v1524_v53 }
 0x738   : > { %1567 = vrot.lane.b32.xlu0 %v7496_v60, %s7212_s23 }
 0x73a   : > { %v1986_v2 = vpop.permute.xlu1 %1985 }
 0x751   : > { %v1523_v52 = vpop.xlane.xlu0 %1522 }
 0x752   : > { %v1529_v9 = vsub.f32 %v1513_v32, %v1523_v52 }
 0x754   : > { %v1535_v10 = vmul.f32 1.442695, %v1529_v9 }
 0x759   : > { %v1520_v59 = vpop.xlane.xlu0 %1519 }
 0x75a   : > { %v1528_v55 = vsub.f32 %v1512_v43, %v1520_v59 }
 0x75c   : > { %v1533_v0 = vmul.f32 1.442695, %v1528_v55 }
 0x75e   : > { %7038 = vpow2.f32 %v1533_v0 }
 0x764   : > { %v7039_v3 = vpop.eup %7038 }
 0x765   : > { %v1541_v4 = vpop.xlane.xlu1 %1540  ;;  %v1542_v5 = vsel %vm796_vm3, %v7039_v3, 0.0 }
 0x766   : > { %7040 = vrcp.f32 %v1541_v4  ;;  %1543 = vadd.xlane.f32.xlu2 %v1542_v5 }
 0x767   : > { %7042 = vpow2.f32 %v1535_v10 }
 0x76c   : > { %v7041_v6 = vpop.eup %7040  ;;  %v7583_v28 = vpop.permute.xlu0 %1971 }
 0x76d   : > { %v1977_v35 = vunpack.c.l.b16 %v7583_v28  ;;  %v1555_v61 = vmul.f32 %v7041_v6, %v7037_v16  ;;  %v7043_v11 = vpop.eup %7042 }
 0x76e   : > { %v1545_v25 = vsel %vm796_vm3, %v7043_v11, 0.0 }
 0x76f   : > { %v7586_v60 = vpack.c.b16 %v1977_v35, %v1977_v35  ;;  %v1559_v7 = vpack.c.bf16 %v1555_v61, %v1555_v61 }
 0x771   : > { %1987 = vrot.lane.b32.xlu1 %v7586_v60, %s7211_s22  ;;  %v1643_v8 = vsel %vm796_vm3, %v1559_v7, 0 }
 0x772   : > { %1652 = vmatpush.bf16.xpose.msra.mxu2 %v1643_v8 }
 0x779   : > { %6627 = vmatmul.msk.bf16.vlgmr.msra.gmra.mxu2 %vm796_vm3, %v6764_v31  ;;  %v1570_v31 = vpop.permute.xlu2 %1569 }
 0x77a   : > { %2072 = vmatpush.bf16.msrb.mxu2 %v2063_v17 }
 0x781   : > { %v1990_v27 = vpop.permute.xlu2 %1989 }
 0x789   : > { %6631 = vmatmul.msk.bf16.vlgmr.msrb.gmra.mxu2 %vm796_vm3, %v7504_v29 }
 0x78f   : > { %6766 = vxpose.binary.xlu2.c.b16.start.end [1/2] (short) (narrow) %v1986_v2, %v1566_v57, 16 }
 0x797   : > { %v1526_v12 = vpop.xlane.xlu0 %1525 }
 0x798   : > { %v1530_v14 = vsub.f32 %v1514_v49, %v1526_v12 }
 0x79a   : > { %v1537_v62 = vmul.f32 1.442695, %v1530_v14 }
 0x79b   : > { %1546 = vadd.xlane.f32.xlu1 %v1545_v25 }
 0x79c   : > { %7044 = vpow2.f32 %v1537_v62 }
 0x7a2   : > { %v7045_v56 = vpop.eup %7044 }
 0x7a3   : > { %v1548_v33 = vsel %vm796_vm3, %v7045_v56, 0.0 }
 0x7a4   : > { %1549 = vadd.xlane.f32.xlu1 %v1548_v33 }
 0x7aa   : > { %v1568_v29 = vpop.permute.xlu0 %1567 }
 0x7d9   : > { %v1544_v30 = vpop.xlane.xlu2 %1543 }
 0x7da   : > { %7046 = vrcp.f32 %v1544_v30 }
 0x7de   : > { %6769 = vxpose.binary.xlu1.c.b16.start.end [1/2] (short) (narrow) %v1570_v31, %v1568_v29, 16 }
 0x7e0   : > { %v7047_v32 = vpop.eup %7046 }
 0x7e1   : > { %v1556_v38 = vmul.f32 %v7047_v32, %v7039_v3 }
 0x7e3   : > { %v1988_v34 = vpop.permute.xlu1 %1987  ;;  %v1560_v37 = vpack.c.bf16 %v1556_v38, %v1556_v38 }
 0x7e4   : > { %6772 = vxpose.binary.xlu2.c.b16.start.end [1/2] (short) (narrow) %v1990_v27, %v1988_v34, 16  ;;  %v699_v34 = vadd.f32 %v7558_v21, %v7361_v45 }
 0x7e5   : > { %v1662_v39 = vsel %vm796_vm3, %v1560_v37, 0 }
 0x7e6   : > { %1671 = vmatpush.bf16.xpose.msra.mxu3 %v1662_v39  ;;  %v7636_v37 = vpack.c.bf16 %v699_v34, %v699_v34  ;;  %v6794_v34 = vpack.i.bf16 %v7569_v26, %v7528_v63 }
 0x7fc   : > { %v7598_v42 = vpop.f32.mrf.mxu2 }
 0x804   : > { %v1656_v43 = vpop.f32.mrf.mxu2 }
 0x805   : > { %v2604_v43 = vunpack.c.l.b16 %v7636_v37 }
 0x80c   : > { %v2074_v46 = vpop.f32.mrf.mxu2 }
 0x80d   : > { %v2135_v47 = vmul.f32 0.35355338, %v2074_v46  ;;  %v7639_v46 = vpack.c.b16 %v2604_v43, %v2604_v43 }
 0x80e   : > { %v1547_v16 = vpop.xlane.xlu1 %1546 }
 0x80f   : > { %7048 = vrcp.f32 %v1547_v16  ;;  %v7604_v36 = vadd.f32 %v7601_v44, %v2135_v47 }
 0x811   : > { %v2144_v48 = vsel %vm796_vm3, %v7604_v36, -inf }
 0x812   : > { %2145 = vmax.xlane.f32.xlu0 %v2144_v48 }
 0x814   : > { %v2076_v49 = vpop.f32.mrf.mxu2 }
 0x815   : > { %v7049_v53 = vpop.eup %7048 }
 0x816   : > { %v1557_v52 = vmul.f32 %v7049_v53, %v7043_v11 }
 0x817   : > { %v1550_v57 = vpop.xlane.xlu1 %1549 }
 0x818   : > { %7050 = vrcp.f32 %v1550_v57  ;;  %v1561_v59 = vpack.c.bf16 %v1557_v52, %v1557_v52 }
 0x81a   : > { %v1681_v55 = vsel %vm796_vm3, %v1561_v59, 0 }
 0x81b   : > { %1690 = vmatpush.bf16.xpose.msrb.mxu1 %v1681_v55 }
 0x81e   : > { %v7051_v0 = vpop.eup %7050 }
 0x81f   : > { %v1558_v2 = vmul.f32 %v7051_v0, %v7045_v56 }
 0x821   : > { %v1562_v3 = vpack.c.bf16 %v1558_v2, %v1558_v2 }
 0x823   : > { %v1700_v4 = vsel %vm796_vm3, %v1562_v3, 0 }
 0x824   : > { %1709 = vmatpush.bf16.xpose.msra.mxu0 %v1700_v4 }
 0x830   : > { %v6767_v5 = vpop.trf.xlu2 }
 0x831   : > { %6628 = vmatmul.msk.bf16.vlgmr.msra.gmra.mxu3 %vm796_vm3, %v6767_v5 }
 0x838   : > { %2192 = vrot.lane.b32.xlu1 %v7509_v24, %s7212_s23  ;;  %v6768_v6 = vpop.trf.xlu2 }
 0x839   : > { %v2082_v35 = vsel %vm800_vm1, %v6768_v6, 0 }
 0x83a   : > { %2091 = vmatpush.bf16.msrb.mxu3 %v2082_v35 }
 0x841   : > { %6632 = vmatmul.msk.bf16.vlgmr.msrb.gmra.mxu3 %vm796_vm3, %v7560_v19 }
 0x885   : > { %v6773_v61 = vpop.trf.xlu2  ;;  %v2146_v45 = vpop.xlane.xlu0 %2145 }
 0x886   : > { %v2101_v7 = vsel %vm800_vm1, %v6773_v61, 0  ;;  %v2156_v3 = vsub.f32 %v7604_v36, %v2146_v45 }
 0x887   : > { %2110 = vmatpush.bf16.msra.mxu1 %v2101_v7 }
 0x888   : > { %v2160_v5 = vmul.f32 1.442695, %v2156_v3 }
 0x88a   : > { %v6770_v8 = vpop.trf.xlu1 }
 0x88b   : > { %6629 = vmatmul.msk.bf16.vlgmr.msrb.gmra.mxu1 %vm796_vm3, %v6770_v8 }
 0x88d   : > { %v6774_v17 = vpop.trf.xlu2 }
 0x88e   : > { %v2120_v9 = vsel %vm800_vm1, %v6774_v17, 0 }
 0x88f   : > { %2129 = vmatpush.bf16.msrb.mxu0 %v2120_v9 }
 0x892   : > { %v6771_v10 = vpop.trf.xlu1 }
 0x893   : > { %6630 = vmatmul.msk.bf16.vlgmr.msra.gmra.mxu0 %vm796_vm3, %v6771_v10 }
 0x89b   : > { %6633 = vmatmul.msk.bf16.vlgmr.msra.gmra.mxu1 %vm796_vm3, %v7583_v28 }
 0x8a3   : > { %6634 = vmatmul.msk.bf16.vlgmr.msrb.gmra.mxu0 %vm796_vm3, %v7551_v13 }
 0x8aa   : > { %v2193_v59 = vpop.permute.xlu1 %2192 }
 0x8b4   : > { %v7624_v24 = vpop.f32.mrf.mxu3 }
 0x8bc   : > { %v1675_v19 = vpop.f32.mrf.mxu3 }
 0x8c4   : > { %v2093_v11 = vpop.f32.mrf.mxu3 }
 0x8c5   : > { %v2136_v12 = vmul.f32 0.35355338, %v2093_v11 }
 0x8c7   : > { %v2141_v14 = vadd.f32 %v7601_v44, %v2136_v12 }
 0x8c9   : > { %v2147_v62 = vsel %vm796_vm3, %v2141_v14, -inf }
 0x8ca   : > { %2148 = vmax.xlane.f32.xlu2 %v2147_v62 }
 0x8cc   : > { %v2095_v25 = vpop.f32.mrf.mxu3 }
 0x908   : > { %v7628_v56 = vpop.f32.mrf.mxu1 }
 0x910   : > { %v1694_v33 = vpop.f32.mrf.mxu1  ;;  %v7630_v31 = vpop.f32.mrf.mxu0 }
 0x918   : > { %v1713_v28 = vpop.f32.mrf.mxu0  ;;  %v2112_v27 = vpop.f32.mrf.mxu1 }
 0x919   : > { %v2137_v30 = vmul.f32 0.35355338, %v2112_v27 }
 0x91b   : > { %v2142_v13 = vadd.f32 %v7601_v44, %v2137_v30 }
 0x91d   : > { %v2150_v29 = vsel %vm796_vm3, %v2142_v13, -inf }
 0x91e   : > { %2151 = vmax.xlane.f32.xlu0 %v2150_v29 }
 0x920   : > { %v2114_v32 = vpop.f32.mrf.mxu1  ;;  %v2131_v38 = vpop.f32.mrf.mxu0 }
 0x921   : > { %v2138_v4 = vmul.f32 0.35355338, %v2131_v38  ;;  %v6787_v38 = vpack.i.bf16 %v7628_v56, %v7567_v23 }
 0x923   : > { %v2143_v6 = vadd.f32 %v7601_v44, %v2138_v4 }
 0x925   : > { %v2153_v35 = vsel %vm796_vm3, %v2143_v6, -inf }
 0x928   : > { %v2133_v39 = vpop.f32.mrf.mxu0 }
 0x929   : > { %v6808_v39 = vpack.i.bf16 %v7624_v24, %v7547_v58 }
 0x932   : > { %2612 = vrot.lane.b32.xlu0 %v7639_v46, %s7211_s22 }
 0x93a   : > { %2598 = vrot.lane.b32.xlu0 %v7636_v37, %s7210_s21 }
 0x93d   : > { %v2149_v21 = vpop.xlane.xlu2 %2148 }
 0x93e   : > { %v2157_v48 = vsub.f32 %v2141_v14, %v2149_v21 }
 0x940   : > { %v2162_v53 = vmul.f32 1.442695, %v2157_v48 }
 0x942   : > { %2600 = vrot.lane.b32.xlu0 %v7636_v37, %s7209_s20 }
 0x94a   : > { %2602 = vrot.lane.b32.xlu0 %v7636_v37, %s7208_s19 }
 0x952   : > { %2194 = vrot.lane.b32.xlu0 %v7563_v22, %s7212_s23 }
 0x95a   : > { %2196 = vrot.lane.b32.xlu0 %v7586_v60, %s7212_s23 }
 0x962   : > { %2198 = vrot.lane.b32.xlu0 %v7554_v15, %s7212_s23 }
 0x991   : > { %v2152_v47 = vpop.xlane.xlu0 %2151 }
 0x992   : > { %v2158_v16 = vsub.f32 %v2142_v13, %v2152_v47 }
 0x994   : > { %v2164_v49 = vmul.f32 1.442695, %v2158_v16 }
 0x996   : > { %7052 = vpow2.f32 %v2164_v49 }
 0x997   : > { %7054 = vpow2.f32 %v2162_v53 }
 0x998   : > { %7056 = vpow2.f32 %v2160_v5 }
 0x99c   : > { %v7053_v52 = vpop.eup %7052 }
 0x99d   : > { %v2174_v57 = vsel %vm796_vm3, %v7053_v52, 0.0  ;;  %v7055_v22 = vpop.eup %7054 }
 0x99e   : > { %2175 = vadd.xlane.f32.xlu2 %v2174_v57  ;;  %v2171_v60 = vsel %vm796_vm3, %v7055_v22, 0.0  ;;  %v7057_v61 = vpop.eup %7056 }
 0x99f   : > { %v2168_v7 = vsel %vm796_vm3, %v7057_v61, 0.0 }
 0x9a4   : > { %v2613_v55 = vpop.permute.xlu0 %2612 }
 0x9a5   : > { %6775 = vxpose.binary.xlu1.c.b16.start.end [1/2] (short) (narrow) %v2613_v55, %v2193_v59, 16 }
 0x9a6   : > { %2172 = vadd.xlane.f32.xlu2 %v2171_v60 }
 0x9ac   : > { %v7657_v15 = vpop.permute.xlu0 %2598 }
 0x9ad   : > { %v2605_v0 = vunpack.c.l.b16 %v7657_v15 }
 0x9af   : > { %v7660_v2 = vpack.c.b16 %v2605_v0, %v2605_v0 }
 0x9b1   : > { %2614 = vrot.lane.b32.xlu0 %v7660_v2, %s7211_s22 }
 0x9b4   : > { %v7668_v8 = vpop.permute.xlu0 %2600 }
 0x9b5   : > { %v2606_v24 = vunpack.c.l.b16 %v7668_v8 }
 0x9bc   : > { %v7670_v17 = vpop.permute.xlu0 %2602 }
 0x9bd   : > { %v2607_v9 = vunpack.c.l.b16 %v7670_v17 }
 0x9bf   : > { %v7673_v10 = vpack.c.b16 %v2607_v9, %v2607_v9 }
 0x9c4   : > { %v2195_v36 = vpop.permute.xlu0 %2194 }
 0x9cc   : > { %v2197_v19 = vpop.permute.xlu0 %2196 }
 0x9d4   : > { %v2199_v25 = vpop.permute.xlu0 %2198 }
 0x9db   : > { %2154 = vmax.xlane.f32.xlu0 %v2153_v35 }
 0x9e3   : > { %2169 = vadd.xlane.f32.xlu0 %v2168_v7 }
 0x9f7   : > { %2618 = vrot.lane.b32.xlu0 %v7673_v10, %s7211_s22 }
 0xa11   : > { %v2176_v11 = vpop.xlane.xlu2 %2175 }
 0xa12   : > { %7058 = vrcp.f32 %v2176_v11 }
 0xa18   : > { %v7059_v12 = vpop.eup %7058 }
 0xa19   : > { %6778 = vxpose.binary.xlu0.c.b16.start.end [1/2] (short) (narrow) %v2197_v19, %v2195_v36, 16  ;;  %v2173_v14 = vpop.xlane.xlu2 %2172  ;;  %v2186_v62 = vmul.f32 %v7059_v12, %v7053_v52  ;;  %v7690_v52 = vpack.c.b16 %v2606_v24, %v2606_v24 }
 0xa1a   : > { %7060 = vrcp.f32 %v2173_v14 }
 0xa1b   : > { %v2190_v33 = vpack.c.bf16 %v2186_v62, %v2186_v62  ;;  %v7213_v62 = vmov 1983009808  }
 0xa1d   : > { %v2310_v28 = vsel %vm796_vm3, %v2190_v33, 0 }
 0xa1e   : > { %2319 = vmatpush.bf16.xpose.msrb.mxu1 %v2310_v28 }
 0xa20   : > { %v7061_v27 = vpop.eup %7060 }
 0xa21   : > { %v2185_v30 = vmul.f32 %v7061_v27, %v7055_v22 }
 0xa23   : > { %v2615_v13 = vpop.permute.xlu0 %2614  ;;  %v2189_v29 = vpack.c.bf16 %v2185_v30, %v2185_v30 }
 0xa24   : > { %6781 = vxpose.binary.xlu1.c.b16.start.end [1/2] (short) (narrow) %v2615_v13, %v2199_v25, 16 }
 0xa25   : > { %v2291_v32 = vsel %vm796_vm3, %v2189_v29, 0 }
 0xa26   : > { %2300 = vmatpush.bf16.xpose.msra.mxu3 %v2291_v32 }
 0xa29   : > { %6788 = vxpose.xlu0.b32.start.end [1/1] (short) (narrow) %v6787_v38, 8  ;;  %v7214_v38 = vmov 1934713408  }
 0xa31   : > { %6795 = vxpose.xlu0.b32.start.end [1/1] (short) (narrow) %v6794_v34, 8  ;;  %v1241_v34 = vunpack.c.l.s4 %v7214_v38 }
 0xa39   : > { %6809 = vxpose.xlu0.b32.start.end [1/1] (short) (narrow) %v6808_v39, 8 }
 0xa4e   : > { %v2155_v43 = vpop.xlane.xlu0 %2154 }
 0xa4f   : > { %v2159_v45 = vsub.f32 %v2143_v6, %v2155_v43 }
 0xa51   : > { %v2166_v21 = vmul.f32 1.442695, %v2159_v45  ;;  %v6776_v16 = vpop.trf.xlu1 }
 0xa53   : > { %7062 = vpow2.f32 %v2166_v21 }
 0xa56   : > { %v2170_v47 = vpop.xlane.xlu0 %2169 }
 0xa57   : > { %7064 = vrcp.f32 %v2170_v47 }
 0xa59   : > { %v7063_v48 = vpop.eup %7062  ;;  %v6777_v53 = vpop.trf.xlu1 }
 0xa5a   : > { %v2177_v49 = vsel %vm796_vm3, %v7063_v48, 0.0  ;;  %v2692_v26 = vsel %vm800_vm1, %v6777_v53, 0 }
 0xa5b   : > { %2178 = vadd.xlane.f32.xlu2 %v2177_v49 }
 0xa5d   : > { %v7065_v23 = vpop.eup %7064 }
 0xa5e   : > { %v2184_v56 = vmul.f32 %v7065_v23, %v7057_v61 }
 0xa60   : > { %v2188_v63 = vpack.c.bf16 %v2184_v56, %v2184_v56 }
 0xa62   : > { %v2272_v58 = vsel %vm796_vm3, %v2188_v63, 0 }
 0xa63   : > { %2281 = vmatpush.bf16.xpose.msra.mxu2 %v2272_v58 }
 0xa69   : > { %v2619_v57 = vpop.permute.xlu0 %2618 }
 0xa6a   : > { %6635 = vmatmul.msk.bf16.vlgmr.msra.gmra.mxu2 %vm796_vm3, %v6776_v16  ;;  %v7725_v16 = vunpack.c.0.s8 %v1241_v34 }
 0xa6b   : > { %2701 = vmatpush.bf16.msrb.mxu2 %v2692_v26 }
 0xa73   : > { %2616 = vrot.lane.b32.xlu2 %v7690_v52, %s7211_s22 }
 0xa7a   : > { %6639 = vmatmul.msk.bf16.vlgmr.msrb.gmra.mxu2 %vm796_vm3, %v7636_v37  ;;  %v6801_v37 = vpack.i.bf16 %v7630_v31, %v7598_v42  ;;  %v1217_v42 = vunpack.c.l.s4 %v7213_v62  ;;  %v7744_v62 = vperm.slane %v7449_v50, 3 }
 0xa7c   : > { %v7714_v33 = vunpack.c.0.s8 %v1217_v42 }
 0xac5   : > { %v6779_v22 = vpop.trf.xlu0 }
 0xac6   : > { %6636 = vmatmul.msk.bf16.vlgmr.msra.gmra.mxu3 %vm796_vm3, %v6779_v22 }
 0xacd   : > { %v6780_v19 = vpop.trf.xlu0 }
 0xace   : > { %v2179_v59 = vpop.xlane.xlu2 %2178  ;;  %6637 = vmatmul.msk.bf16.vlgmr.msrb.gmra.mxu1 %vm796_vm3, %v6780_v19 }
 0xacf   : > { %7066 = vrcp.f32 %v2179_v59 }
 0xad0   : > { %v6782_v55 = vpop.trf.xlu1 }
 0xad5   : > { %v7067_v60 = vpop.eup %7066  ;;  %v7709_v11 = vpop.trf.xlu0 }
 0xad6   : > { %v2617_v0 = vpop.permute.xlu2 %2616  ;;  %v2187_v3 = vmul.f32 %v7067_v60, %v7063_v48  ;;  %v6790_v12 = vunpack.i.l.bf16 %v7709_v11 }
 0xad7   : > { %6784 = vxpose.binary.xlu2.c.b16.start.end [1/2] (short) (narrow) %v2619_v57, %v2617_v0, 16 }
 0xad8   : > { %v6783_v4 = vpop.trf.xlu1  ;;  %v2191_v5 = vpack.c.bf16 %v2187_v3, %v2187_v3 }
 0xad9   : > { %v2711_v6 = vsel %vm800_vm1, %v6783_v4, 0 }
 0xada   : > { %2720 = vmatpush.bf16.msrb.mxu3 %v2711_v6  ;;  %v2329_v35 = vsel %vm796_vm3, %v2191_v5, 0 }
 0xadb   : > { %2338 = vmatpush.bf16.xpose.msra.mxu0 %v2329_v35 }
 0xadd   : > { %6640 = vmatmul.msk.bf16.vlgmr.msrb.gmra.mxu3 %vm796_vm3, %v7657_v15  ;;  %v1211_v15 = vrot.slane %v6790_v12, 4  ;;  %v6796_v31 = vpop.trf.xlu0 }
 0xade   : > { %v6797_v25 = vunpack.i.l.bf16 %v6796_v31  ;;  %v6800_v28 = vunpack.i.h.bf16 %v6796_v31 }
 0xae0   : > { %v1213_v27 = vsel %vm1212_vm11, %v1211_v15, %v6797_v25  ;;  %v1214_v30 = vrot.slane %v6797_v25, 4  ;;  %v1224_v32 = vrot.slane %v6800_v28, 4 }
 0xae1   : > { %v1219_v29 = vperm.slane %v1213_v27, %v7714_v33 }
 0xae2   : > { %6638 = vmatmul.msk.bf16.vlgmr.msra.gmra.mxu0 %vm796_vm3, %v6782_v55  ;;  %v1215_v13 = vsel %vm1212_vm11, %v6790_v12, %v1214_v30 }
 0xae3   : > { %v1223_v43 = vperm.slane %v1215_v13, %v7714_v33  ;;  %v1238_v47 = vrot.slane %v1219_v29, 4 }
 0xae5   : > { %v7722_v45 = vpop.trf.xlu0  ;;  %v1250_v23 = vrot.slane %v1223_v43, 4 }
 0xae6   : > { %v6811_v21 = vunpack.i.l.bf16 %v7722_v45 }
 0xae7   : > { %6802 = vxpose.xlu2.b32.start.end [1/1] (short) (narrow) %v6801_v37, 8 }
 0xae8   : > { %v1225_v48 = vsel %vm1212_vm11, %v1224_v32, %v6811_v21  ;;  %v1226_v49 = vrot.slane %v6811_v21, 4 }
 0xae9   : > { %v1231_v56 = vperm.slane %v1225_v48, %v7714_v33 }
 0xaeb   : > { %v1236_v63 = vrot.slane %v1231_v56, 4  ;;  %v1239_v26 = vsel %vm1212_vm11, %v1231_v56, %v1238_v47 }
 0xaec   : > { %v1247_v58 = vperm.slane %v1239_v26, %v7725_v16 }
 0xaed   : > { %v7704_v61 = vpop.f32.mrf.mxu2  ;;  %v1237_v24 = vsel %vm1212_vm11, %v1236_v63, %v1219_v29 }
 0xaee   : > { %v1243_v59 = vperm.slane %v1237_v24, %v7725_v16  ;;  %v1262_v60 = vrot.slane %v1247_v58, 4  ;;  %v6814_v58 = vunpack.i.h.bf16 %v7722_v45  ;;  %v6793_v24 = vunpack.i.h.bf16 %v7709_v11 }
 0xaf0   : > { %v1263_v3 = vsel %vm1212_vm11, 0.0, %v1262_v60  ;;  %v1260_v35 = vrot.slane %v1243_v59, 4 }
 0xaf1   : > { %v1273_v5 = vrot.slane %v1263_v3, 4 }
 0xaf2   : > { %v1261_v37 = vsel %vm1212_vm11, 0.0, %v1260_v35 }
 0xaf3   : > { %v1274_v12 = vsel %vm1212_vm11, %v1273_v5, %v1261_v37 }
 0xaf4   : > { %v1278_v25 = vperm.slane %v1274_v12, %v7714_v33 }
 0xaf5   : > { %v2285_v7 = vpop.f32.mrf.mxu2 }
 0xaf6   : > { %v1290_v32 = vrot.slane %v1278_v25, 4 }
 0xafd   : > { %v7706_v9 = vpop.f32.mrf.mxu2 }
 0xb05   : > { %v2705_v36 = vpop.f32.mrf.mxu2 }
 0xb49   : > { %v7712_v14 = vpop.f32.mrf.mxu3 }
 0xb50   : > { %2821 = vrot.lane.b32.xlu2 %v7639_v46, %s7212_s23  ;;  %v1227_v46 = vsel %vm1212_vm11, %v6800_v28, %v1226_v49  ;;  %v1268_v28 = vsel %vm1212_vm11, %v1262_v60, %v1243_v59 }
 0xb51   : > { %v2304_v39 = vpop.f32.mrf.mxu3  ;;  %v1235_v53 = vperm.slane %v1227_v46, %v7714_v33  ;;  %v1272_v29 = vperm.slane %v1268_v28, %v7714_v33 }
 0xb53   : > { %v1248_v57 = vrot.slane %v1235_v53, 4  ;;  %v1251_v22 = vsel %vm1212_vm11, %v1235_v53, %v1250_v23  ;;  %v1291_v21 = vsel %vm1212_vm11, %v1290_v32, %v1272_v29 }
 0xb54   : > { %v1259_v55 = vperm.slane %v1251_v22, %v7725_v16  ;;  %v7771_v49 = vperm.slane %v1291_v21, %v7725_v16  ;;  %v1843_v22 = vrot.slane %v6793_v24, 4 }
 0xb55   : > { %v1249_v0 = vsel %vm1212_vm11, %v1248_v57, %v1223_v43  ;;  %v1857_v57 = vrot.slane %v6814_v58, 4 }
 0xb56   : > { %v1266_v4 = vrot.slane %v1259_v55, 4  ;;  %v1255_v6 = vperm.slane %v1249_v0, %v7725_v16 }
 0xb58   : > { %v1264_v7 = vrot.slane %v1255_v6, 4  ;;  %v1267_v36 = vsel %vm1212_vm11, 0.0, %v1266_v4  ;;  %v1279_v50 = vsel %vm1212_vm11, %v1266_v4, %v1255_v6 }
 0xb59   : > { %v1284_v15 = vrot.slane %v1267_v36, 4  ;;  %v7761_v34 = vperm.slane %v1279_v50, %v7714_v33 }
 0xb5a   : > { %v1265_v31 = vsel %vm1212_vm11, 0.0, %v1264_v7 }
 0xb5b   : > { %v1285_v27 = vsel %vm1212_vm11, %v1284_v15, %v1265_v31  ;;  %v1304_v21 = vrot.slane %v7761_v34, 4 }
 0xb5c   : > { %v7754_v13 = vperm.slane %v1285_v27, %v7714_v33 }
 0xb5e   : > { %v1302_v39 = vrot.slane %v7754_v13, 4 }
 0xb60   : > { %v2722_v19 = vpop.f32.mrf.mxu3  ;;  %v1303_v47 = vsel %vm1212_vm11, %v1302_v39, %v7761_v34 }
 0xb61   : > { %v2765_v42 = vmul.f32 0.35355338, %v2722_v19  ;;  %v7768_v48 = vperm.slane %v1303_v47, %v7725_v16  ;;  %v1292_v19 = vrot.slane %v1272_v29, 4 }
 0xb63   : > { %v7751_v30 = vadd.f32 %v7744_v62, %v2765_v42  ;;  %v1314_v23 = vrot.slane %v7768_v48, 4  ;;  %v1293_v29 = vsel %vm1212_vm11, %v1278_v25, %v1292_v19 }
 0xb64   : > { %v1301_v34 = vperm.slane %v1293_v29, %v7725_v16 }
 0xb65   : > { %v2776_v38 = vsel %vm796_vm3, %v7751_v30, -inf  ;;  %v7776_v56 = vsel %vm1212_vm11, %v1314_v23, %v7771_v49 }
 0xb66   : > { %2777 = vmax.xlane.f32.xlu0 %v2776_v38 }
 0xb68   : > { %v2724_v43 = vpop.f32.mrf.mxu3 }
 0xb78   : > { %v6785_v46 = vpop.trf.xlu2 }
 0xb79   : > { %v2730_v53 = vsel %vm800_vm1, %v6785_v46, 0 }
 0xb7a   : > { %2739 = vmatpush.bf16.msra.mxu1 %v2730_v53 }
 0xb7d   : > { %6641 = vmatmul.msk.bf16.vlgmr.msra.gmra.mxu1 %vm796_vm3, %v7668_v8 }
 0xb80   : > { %v6786_v63 = vpop.trf.xlu2 }
 0xb81   : > { %v2749_v26 = vsel %vm800_vm1, %v6786_v63, 0 }
 0xb82   : > { %2758 = vmatpush.bf16.msrb.mxu0 %v2749_v26 }
 0xb85   : > { %6642 = vmatmul.msk.bf16.vlgmr.msrb.gmra.mxu0 %vm796_vm3, %v7670_v17  ;;  %v7792_v17 = vpop.f32.mrf.mxu0 }
 0xb88   : > { %v6803_v59 = vpop.trf.xlu2 }
 0xb89   : > { %v6807_v55 = vunpack.i.h.bf16 %v6803_v59  ;;  %v6804_v60 = vunpack.i.l.bf16 %v6803_v59 }
 0xb8b   : > { %v1855_v0 = vrot.slane %v6807_v55, 4  ;;  %v1858_v3 = vsel %vm1212_vm11, %v6807_v55, %v1857_v57  ;;  %v1844_v8 = vsel %vm1212_vm11, %v1843_v22, %v6804_v60  ;;  %v1845_v4 = vrot.slane %v6804_v60, 4 }
 0xb8c   : > { %v1866_v5 = vperm.slane %v1858_v3, %v7714_v33  ;;  %v1850_v45 = vperm.slane %v1844_v8, %v7714_v33 }
 0xb8d   : > { %v1856_v11 = vsel %vm1212_vm11, %v1855_v0, %v6814_v58  ;;  %v1846_v6 = vsel %vm1212_vm11, %v6793_v24, %v1845_v4  ;;  %v2342_v63 = vpop.f32.mrf.mxu0  ;;  %v1305_v0 = vsel %vm1212_vm11, %v7754_v13, %v1304_v21 }
 0xb8e   : > { %v1862_v35 = vperm.slane %v1856_v11, %v7714_v33  ;;  %v1879_v37 = vrot.slane %v1866_v5, 4  ;;  %v1854_v7 = vperm.slane %v1846_v6, %v7714_v33  ;;  %v1869_v36 = vrot.slane %v1850_v45, 4 }
 0xb90   : > { %v1867_v12 = vrot.slane %v1862_v35, 4  ;;  %v1870_v15 = vsel %vm1212_vm11, %v1862_v35, %v1869_v36  ;;  %v1880_v42 = vsel %vm1212_vm11, %v1879_v37, %v1854_v7  ;;  %v1881_v31 = vrot.slane %v1854_v7, 4 }
 0xb91   : > { %v1878_v28 = vperm.slane %v1870_v15, %v7725_v16  ;;  %v1886_v27 = vperm.slane %v1880_v42, %v7725_v16  ;;  %v1313_v37 = vperm.slane %v1305_v0, %v7725_v16  ;;  %v1320_v7 = vrot.slane %v1301_v34, 4 }
 0xb92   : > { %v1868_v50 = vsel %vm1212_vm11, %v1867_v12, %v1850_v45  ;;  %v1882_v32 = vsel %vm1212_vm11, %v1866_v5, %v1881_v31  ;;  %v1316_v31 = vrot.slane %v7771_v49, 4 }
 0xb93   : > { %v1874_v38 = vperm.slane %v1868_v50, %v7725_v16  ;;  %v1890_v39 = vperm.slane %v1882_v32, %v7725_v16  ;;  %v1893_v43 = vrot.slane %v1878_v28, 4  ;;  %v1895_v53 = vrot.slane %v1886_v27, 4 }
 0xb94   : > { %v1321_v50 = vsel %vm1212_vm11, %v1313_v37, %v1320_v7  ;;  %v1317_v29 = vsel %vm1212_vm11, %v7768_v48, %v1316_v31 }
 0xb95   : > { %v1891_v47 = vrot.slane %v1874_v38, 4  ;;  %v1894_v23 = vsel %vm1212_vm11, 0.0, %v1893_v43  ;;  %v1897_v46 = vrot.slane %v1890_v39, 4  ;;  %v1899_v58 = vsel %vm1212_vm11, %v1893_v43, %v1874_v38 }
 0xb96   : > { %v1904_v26 = vrot.slane %v1894_v23, 4  ;;  %v1903_v22 = vperm.slane %v1899_v58, %v7714_v33  ;;  %v1896_v3 = vsel %vm1212_vm11, 0.0, %v1895_v53  ;;  %v1318_v53 = vrot.slane %v1313_v37, 4 }
 0xb97   : > { %v1898_v24 = vsel %vm1212_vm11, 0.0, %v1897_v46  ;;  %v1892_v57 = vsel %vm1212_vm11, 0.0, %v1891_v47  ;;  %v1910_v59 = vsel %vm1212_vm11, %v1897_v46, %v1886_v27 }
 0xb98   : > { %v1915_v25 = vrot.slane %v1898_v24, 4  ;;  %v1905_v55 = vsel %vm1212_vm11, %v1904_v26, %v1892_v57  ;;  %v1914_v60 = vperm.slane %v1910_v59, %v7714_v33  ;;  %v1923_v4 = vrot.slane %v1903_v22, 4  ;;  %v7842_v24 = vpop.f32.mrf.mxu1 }
 0xb99   : > { %v1909_v8 = vperm.slane %v1905_v55, %v7714_v33  ;;  %v1319_v58 = vsel %vm1212_vm11, %v1318_v53, %v1301_v34 }
 0xb9a   : > { %v1916_v5 = vsel %vm1212_vm11, %v1915_v25, %v1896_v3  ;;  %v1935_v45 = vrot.slane %v1914_v60, 4 }
 0xb9b   : > { %v1920_v11 = vperm.slane %v1916_v5, %v7714_v33  ;;  %v1924_v6 = vsel %vm1212_vm11, %v1909_v8, %v1923_v4  ;;  %v1921_v35 = vrot.slane %v1909_v8, 4 }
 0xb9c   : > { %v1932_v36 = vperm.slane %v1924_v6, %v7725_v16 }
 0xb9d   : > { %v1936_v13 = vsel %vm1212_vm11, %v1920_v11, %v1935_v45  ;;  %v1922_v19 = vsel %vm1212_vm11, %v1921_v35, %v1903_v22  ;;  %v1933_v12 = vrot.slane %v1920_v11, 4  ;;  %v2764_v22 = vmul.f32 0.35355338, %v7706_v9 }
 0xb9e   : > { %v1944_v15 = vperm.slane %v1936_v13, %v7725_v16  ;;  %v1951_v42 = vrot.slane %v1932_v36, 4  ;;  %v1928_v28 = vperm.slane %v1922_v19, %v7725_v16 }
 0xb9f   : > { %v1934_v27 = vsel %vm1212_vm11, %v1933_v12, %v1914_v60  ;;  %v2769_v59 = vadd.f32 %v7744_v62, %v2764_v22 }
 0xba0   : > { %v1952_v32 = vsel %vm1212_vm11, %v1944_v15, %v1951_v42  ;;  %v1940_v38 = vperm.slane %v1934_v27, %v7725_v16  ;;  %v1947_v39 = vrot.slane %v1928_v28, 4  ;;  %v1949_v23 = vrot.slane %v1944_v15, 4  ;;  %v2323_v57 = vpop.f32.mrf.mxu1 }
 0xba1   : > { %v6825_v43 = vpack.i.bf16 %v1952_v32, %v1321_v50  ;;  %v2773_v25 = vsel %vm796_vm3, %v2769_v59, -inf  ;;  %v6833_v32 = vpack.i.bf16 %v7792_v17, %v7704_v61 }
 0xba2   : > { %v1945_v21 = vrot.slane %v1940_v38, 4  ;;  %v1948_v47 = vsel %vm1212_vm11, %v1940_v38, %v1947_v39  ;;  %v1950_v63 = vsel %vm1212_vm11, %v1949_v23, %v1932_v36 }
 0xba3   : > { %6826 = vrot.lane.b32.xlu2 %v6825_v43, %s7215_s26  ;;  %v6815_v49 = vpack.i.bf16 %v1948_v47, %v1317_v29  ;;  %v6820_v48 = vpack.i.bf16 %v1950_v63, %v1319_v58 }
 0xba4   : > { %v1946_v46 = vsel %vm1212_vm11, %v1945_v21, %v1928_v28 }
 0xba5   : > { %6816 = vrot.lane.b32.xlu1 %v6815_v49, %s7216_s27 }
 0xbaa   : > { %v2822_v26 = vpop.permute.xlu2 %2821 }
 0xbab   : > { %2833 = vxpose.xlu0.c.b16.start.end [1/1] (short) (narrow) %v2822_v26, 16 }
 0xbad   : > { %6821 = vrot.lane.b32.xlu1 %v6820_v48, %s7217_s28 }
 0xbd7   : > { %2774 = vmax.xlane.f32.xlu1 %v2773_v25 }
 0xbd9   : > { %v2778_v21 = vpop.xlane.xlu0 %2777 }
 0xbda   : > { %v2786_v23 = vsub.f32 %v7751_v30, %v2778_v21 }
 0xbdc   : > { %v2791_v61 = vmul.f32 1.442695, %v2786_v23 }
 0xbfa   : > { %v2741_v55 = vpop.f32.mrf.mxu1 }
 0xbfb   : > { %v2766_v60 = vmul.f32 0.35355338, %v2741_v55  ;;  %v651_v55 = vld [vmem:[%s7875_s8 + $0x10] sm:$0xff] }
 0xbfd   : > { %v2771_v0 = vadd.f32 %v7744_v62, %v2766_v60  ;;  %v6827_v37 = vpop.permute.xlu2 %6826  ;;  %v652_v60 = vld [vmem:[%s7875_s8 + $0x18] sm:$0xff] }
 0xbfe   : > { %v6829_v19 = vunpack.i.h.bf16 %v6827_v37  ;;  %v6828_v12 = vunpack.i.l.bf16 %v6827_v37 }
 0xbff   : > { %v2779_v34 = vsel %vm796_vm3, %v2771_v0, -inf }
 0xc00   : > { %2780 = vmax.xlane.f32.xlu1 %v2779_v34 }
 0xc02   : > { %v2743_v3 = vpop.f32.mrf.mxu1  ;;  %v2760_v8 = vpop.f32.mrf.mxu0 }
 0xc03   : > { %v2767_v4 = vmul.f32 0.35355338, %v2760_v8  ;;  %v654_v8 = vpack.c.bf16 %v652_v60, %v651_v55 }
 0xc05   : > { %v2772_v5 = vadd.f32 %v7744_v62, %v2767_v4  ;;  %v649_v4 = vld [vmem:[%s7875_s8] sm:$0xff] }
 0xc07   : > { %v2782_v45 = vsel %vm796_vm3, %v2772_v5, -inf }
 0xc08   : > { %2783 = vmax.xlane.f32.xlu1 %v2782_v45 }
 0xc0a   : > { %v2762_v9 = vpop.f32.mrf.mxu0 }
 0xc17   : > { %v6817_v11 = vpop.permute.xlu1 %6816 }
 0xc18   : > { %v6819_v6 = vunpack.i.h.bf16 %v6817_v11  ;;  %v6818_v35 = vunpack.i.l.bf16 %v6817_v11 }
 0xc19   : > { %2827 = vrot.lane.b32.xlu0 %v7673_v10, %s7212_s23 }
 0xc1a   : > { %v1334_v15 = vsel %vm796_vm3, %v7776_v56, %v6818_v35  ;;  %v1965_v42 = vsel %vm796_vm3, %v1946_v46, %v6819_v6 }
 0xc1f   : > { %v6822_v7 = vpop.permute.xlu1 %6821 }
 0xc20   : > { %v6824_v36 = vunpack.i.h.bf16 %v6822_v7  ;;  %v6823_v13 = vunpack.i.l.bf16 %v6822_v7 }
 0xc21   : > { %2823 = vrot.lane.b32.xlu1 %v7660_v2, %s7212_s23 }
 0xc22   : > { %v1336_v10 = vsel %vm1335_vm12, %v1334_v15, %v6823_v13  ;;  %v1966_v31 = vsel %vm1335_vm12, %v1965_v42, %v6824_v36 }
 0xc23   : > { %v1338_v28 = vsel %vm1337_vm13, %v1336_v10, %v6828_v12  ;;  %v1967_v27 = vsel %vm1337_vm13, %v1966_v31, %v6829_v19 }
 0xc24   : > { %v3226_v50 = vpack.c.bf16 %v1967_v27, %v1338_v28 }
 0xc3b   : > { %6834 = vxpose.xlu0.b32.start.end [1/1] (short) (narrow) %v6833_v32, 8 }
 0xc4a   : > { %v2775_v38 = vpop.xlane.xlu1 %2774 }
 0xc4b   : > { %v2785_v56 = vsub.f32 %v2769_v59, %v2775_v38 }
 0xc4d   : > { %v2789_v39 = vmul.f32 1.442695, %v2785_v56  ;;  %v7888_v56 = vld [vmem:[%s7343_s18] sm:$0xff] }
 0xc4f   : > { %7068 = vpow2.f32 %v2789_v39  ;;  %v7891_v39 = vperm.slane %v7888_v56, 3 }
 0xc55   : > { %v7069_v43 = vpop.eup %7068 }
 0xc56   : > { %v2797_v2 = vsel %vm796_vm3, %v7069_v43, 0.0 }
 0xc57   : > { %2798 = vadd.xlane.f32.xlu1 %v2797_v2  ;;  %v2841_v22 = vpop.trf.xlu0 }
 0xc70   : > { %2825 = vrot.lane.b32.xlu1 %v7690_v52, %s7212_s23 }
 0xc73   : > { %v2781_v29 = vpop.xlane.xlu1 %2780 }
 0xc74   : > { %v2787_v63 = vsub.f32 %v2771_v0, %v2781_v29 }
 0xc76   : > { %v2793_v58 = vmul.f32 1.442695, %v2787_v63 }
 0xc7b   : > { %v2784_v47 = vpop.xlane.xlu1 %2783 }
 0xc7c   : > { %v2788_v49 = vsub.f32 %v2772_v5, %v2784_v47  ;;  %v650_v5 = vld [vmem:[%s7875_s8 + $0x8] sm:$0xff] }
 0xc7d   : > { %v653_v9 = vpack.c.bf16 %v650_v5, %v649_v4 }
 0xc7e   : > { %v2795_v46 = vmul.f32 1.442695, %v2788_v49 }
 0xc80   : > { %7070 = vpow2.f32 %v2795_v46 }
 0xc81   : > { %7072 = vpow2.f32 %v2791_v61 }
 0xc82   : > { %7074 = vpow2.f32 %v2793_v58 }
 0xc86   : > { %v7071_v17 = vpop.eup %7070 }
 0xc87   : > { %v2806_v53 = vsel %vm796_vm3, %v7071_v17, 0.0  ;;  %v7073_v26 = vpop.eup %7072 }
 0xc88   : > { %2807 = vadd.xlane.f32.xlu2 %v2806_v53  ;;  %v2800_v52 = vsel %vm796_vm3, %v7073_v26, 0.0  ;;  %v7075_v48 = vpop.eup %7074 }
 0xc89   : > { %v2803_v57 = vsel %vm796_vm3, %v7075_v48, 0.0 }
 0xc8b   : > { %v2828_v34 = vpop.permute.xlu0 %2827 }
 0xc90   : > { %2801 = vadd.xlane.f32.xlu2 %v2800_v52 }
 0xc93   : > { %v2824_v30 = vpop.permute.xlu1 %2823 }
 0xc9a   : > { %2804 = vadd.xlane.f32.xlu1 %v2803_v57 }
 0xcca   : > { %v2799_v59 = vpop.xlane.xlu1 %2798 }
 0xccb   : > { %7076 = vrcp.f32 %v2799_v59 }
 0xcd1   : > { %v7077_v25 = vpop.eup %7076 }
 0xcd2   : > { %v2813_v0 = vmul.f32 %v7077_v25, %v7069_v43 }
 0xcd4   : > { %2881 = vxpose.xlu1.c.b16.start.end [1/1] (short) (narrow) %v2828_v34, 16  ;;  %v2817_v3 = vpack.c.bf16 %v2813_v0, %v2813_v0 }
 0xcd6   : > { %v2901_v45 = vsel %vm796_vm3, %v2817_v3, 0 }
 0xcd7   : > { %2910 = vmatpush.bf16.xpose.msra.mxu2 %v2901_v45 }
 0xcde   : > { %6643 = vmatmul.msk.bf16.vlgmr.msra.gmra.mxu2 %vm796_vm3, %v2841_v22 }
 0xcdf   : > { %3241 = vmatpush.bf16.msrb.mxu2 %v654_v8  ;;  %v6835_v0 = vpop.trf.xlu0 }
 0xce2   : > { %v2826_v11 = vpop.permute.xlu1 %2825 }
 0xce3   : > { %3242 = vmatpush.bf16.msrb.mxu2 %v653_v9  ;;  %v6836_v9 = vunpack.i.l.bf16 %v6835_v0 }
 0xce4   : > { %6830 = vxpose.binary.xlu2.c.b16.start.end [1/2] (short) (narrow) %v2826_v11, %v2824_v30, 16 }
 0xcee   : > { %6647 = vmatmul.msk.bf16.vlgmr.msrb.gmra.mxu2 %vm535_vm4, %v3226_v50 }
 0xcfb   : > { %v2808_v6 = vpop.xlane.xlu2 %2807 }
 0xcfc   : > { %7078 = vrcp.f32 %v2808_v6 }
 0xd02   : > { %v7079_v35 = vpop.eup %7078 }
 0xd03   : > { %v2802_v37 = vpop.xlane.xlu2 %2801  ;;  %v2816_v7 = vmul.f32 %v7079_v35, %v7071_v17 }
 0xd04   : > { %7080 = vrcp.f32 %v2802_v37  ;;  %v6839_v37 = vunpack.i.h.bf16 %v6835_v0 }
 0xd05   : > { %v2820_v36 = vpack.c.bf16 %v2816_v7, %v2816_v7  ;;  %v2474_v7 = vrot.slane %v6836_v9, 4 }
 0xd07   : > { %v2958_v13 = vsel %vm796_vm3, %v2820_v36, 0 }
 0xd08   : > { %2967 = vmatpush.bf16.xpose.msra.mxu0 %v2958_v13 }
 0xd0a   : > { %v7081_v19 = vpop.eup %7080 }
 0xd0b   : > { %v2814_v12 = vmul.f32 %v7081_v19, %v7073_v26 }
 0xd0d   : > { %v2805_v15 = vpop.xlane.xlu1 %2804  ;;  %v2818_v42 = vpack.c.bf16 %v2814_v12, %v2814_v12 }
 0xd0e   : > { %7082 = vrcp.f32 %v2805_v15 }
 0xd0f   : > { %v2920_v10 = vsel %vm796_vm3, %v2818_v42, 0 }
 0xd10   : > { %2929 = vmatpush.bf16.xpose.msra.mxu3 %v2920_v10  ;;  %v2484_v10 = vrot.slane %v6839_v37, 4 }
 0xd14   : > { %v7083_v31 = vpop.eup %7082 }
 0xd15   : > { %v2815_v28 = vmul.f32 %v7083_v31, %v7075_v48 }
 0xd17   : > { %v2819_v27 = vpack.c.bf16 %v2815_v28, %v2815_v28 }
 0xd19   : > { %v2939_v50 = vsel %vm796_vm3, %v2819_v27, 0 }
 0xd1a   : > { %2948 = vmatpush.bf16.xpose.msrb.mxu1 %v2939_v50 }
 0xd61   : > { %v2912_v32 = vpop.f32.mrf.mxu2 }
 0xd69   : > { %v2914_v38 = vpop.f32.mrf.mxu2 }
 0xd71   : > { %v3244_v43 = vpop.f32.mrf.mxu2 }
 0xd72   : > { %v3245_v2 = vadd.f32 %v3244_v43, %v7891_v39 }
 0xd74   : > { %v3254_v29 = vadd.f32 %v3245_v2, %v7353_v40 }
 0xd76   : > { %v3258_v21 = vsel %vm535_vm4, %v3254_v29, 0.0 }
 0xd77   : > { %3259 = vadd.xlane.f32.xlu2 %v3258_v21 }
 0xd79   : > { %v3246_v47 = vpop.f32.mrf.mxu2 }
 0xd7a   : > { %v3247_v49 = vadd.f32 %v3246_v47, %v7891_v39 }
 0xd7c   : > { %v3255_v23 = vadd.f32 %v3247_v49, %v7356_v41 }
 0xd7e   : > { %v3261_v46 = vsel %vm535_vm4, %v3255_v23, 0.0 }
 0xd7f   : > { %3262 = vadd.xlane.f32.xlu1 %v3261_v46 }
 0xd80   : > { %v2889_v61 = vpop.trf.xlu1 }
 0xd81   : > { %6646 = vmatmul.msk.bf16.vlgmr.msra.gmra.mxu0 %vm796_vm3, %v2889_v61 }
 0xd85   : > { %v6831_v17 = vpop.trf.xlu2 }
 0xd86   : > { %6644 = vmatmul.msk.bf16.vlgmr.msra.gmra.mxu3 %vm796_vm3, %v6831_v17 }
 0xd8d   : > { %v6832_v53 = vpop.trf.xlu2 }
 0xd8e   : > { %6645 = vmatmul.msk.bf16.vlgmr.msrb.gmra.mxu1 %vm796_vm3, %v6832_v53 }
 0xdea   : > { %v3260_v40 = vpop.xlane.xlu2 %3259 }
 0xdeb   : > { %v3270_v63 = vmul.f32 %v3260_v40, %v7317_v51 }
 0xded   : > { %v7903_v26 = vsub.f32 %v3254_v29, %v3270_v63 }
 0xdef   : > { %v3278_v41 = vmul.f32 %v7903_v26, %v7903_v26 }
 0xdf1   : > { %v3282_v58 = vsel %vm535_vm4, %v3278_v41, 0.0 }
 0xdf2   : > { %3283 = vadd.xlane.f32.xlu2 %v3282_v58  ;;  %v3263_v34 = vpop.xlane.xlu1 %3262 }
 0xdf3   : > { %v3271_v3 = vmul.f32 %v3263_v34, %v7317_v51 }
 0xdf5   : > { %v7911_v8 = vsub.f32 %v3255_v23, %v3271_v3 }
 0xdf7   : > { %v3279_v4 = vmul.f32 %v7911_v8, %v7911_v8 }
 0xdf9   : > { %v3285_v5 = vsel %vm535_vm4, %v3279_v4, 0.0 }
 0xdfe   : > { %v2969_v52 = vpop.f32.mrf.mxu0 }
 0xdff   : > { %v6847_v55 = vpack.i.bf16 %v2969_v52, %v2912_v32 }
 0xe06   : > { %v2971_v48 = vpop.f32.mrf.mxu0 }
 0xe09   : > { %v2931_v57 = vpop.f32.mrf.mxu3 }
 0xe0a   : > { %v6854_v60 = vpack.i.bf16 %v2931_v57, %v7712_v14 }
 0xe0b   : > { %v2950_v30 = vpop.f32.mrf.mxu1 }
 0xe0c   : > { %v6840_v22 = vpack.i.bf16 %v2950_v30, %v7842_v24 }
 0xe0e   : > { %6841 = vxpose.xlu0.b32.start.end [1/1] (short) (narrow) %v6840_v22, 8 }
 0xe11   : > { %v2933_v59 = vpop.f32.mrf.mxu3 }
 0xe13   : > { %v2952_v25 = vpop.f32.mrf.mxu1 }
 0xe16   : > { %6848 = vxpose.xlu0.b32.start.end [1/1] (short) (narrow) %v6847_v55, 8 }
 0xe1e   : > { %6855 = vxpose.xlu0.b32.start.end [1/1] (short) (narrow) %v6854_v60, 8 }
 0xe8f   : > { %3286 = vadd.xlane.f32.xlu0 %v3285_v5 }
 0xeb2   : > { %v6842_v24 = vpop.trf.xlu0 }
 0xeb3   : > { %v6843_v45 = vunpack.i.l.bf16 %v6842_v24  ;;  %v6846_v11 = vunpack.i.h.bf16 %v6842_v24 }
 0xeb5   : > { %v2472_v35 = vrot.slane %v6843_v45, 4  ;;  %v3101_v36 = vrot.slane %v6846_v11, 4  ;;  %v2475_v15 = vsel %vm1212_vm11, %v6843_v45, %v2474_v7 }
 0xeb6   : > { %v2483_v27 = vperm.slane %v2475_v15, %v7714_v33 }
 0xeb7   : > { %v2473_v12 = vsel %vm1212_vm11, %v2472_v35, %v6836_v9 }
 0xeb8   : > { %v2479_v28 = vperm.slane %v2473_v12, %v7714_v33  ;;  %v2510_v53 = vrot.slane %v2483_v27, 4 }
 0xeba   : > { %v6849_v6 = vpop.trf.xlu0  ;;  %v2498_v46 = vrot.slane %v2479_v28, 4 }
 0xebb   : > { %v6850_v14 = vunpack.i.l.bf16 %v6849_v6  ;;  %v6853_v19 = vunpack.i.h.bf16 %v6849_v6 }
 0xebd   : > { %v3103_v13 = vrot.slane %v6850_v14, 4  ;;  %v3102_v42 = vsel %vm1212_vm11, %v3101_v36, %v6850_v14  ;;  %v3113_v50 = vrot.slane %v6853_v19, 4 }
 0xebe   : > { %v3108_v32 = vperm.slane %v3102_v42, %v7714_v33 }
 0xebf   : > { %v3104_v31 = vsel %vm1212_vm11, %v6846_v11, %v3103_v13 }
 0xec0   : > { %v3112_v29 = vperm.slane %v3104_v31, %v7714_v33  ;;  %v3127_v40 = vrot.slane %v3108_v32, 4 }
 0xec2   : > { %v6856_v38 = vpop.trf.xlu0  ;;  %v3139_v30 = vrot.slane %v3112_v29, 4 }
 0xec3   : > { %v6860_v43 = vunpack.i.h.bf16 %v6856_v38  ;;  %v6857_v2 = vunpack.i.l.bf16 %v6856_v38 }
 0xec5   : > { %v3115_v21 = vrot.slane %v6860_v43, 4  ;;  %v2485_v47 = vsel %vm1212_vm11, %v2484_v10, %v6857_v2  ;;  %v2486_v49 = vrot.slane %v6857_v2, 4  ;;  %v3114_v23 = vsel %vm1212_vm11, %v3113_v50, %v6860_v43 }
 0xec6   : > { %v2491_v61 = vperm.slane %v2485_v47, %v7714_v33  ;;  %v3120_v17 = vperm.slane %v3114_v23, %v7714_v33 }
 0xec7   : > { %v2487_v63 = vsel %vm1212_vm11, %v6839_v37, %v2486_v49  ;;  %v3116_v41 = vsel %vm1212_vm11, %v6853_v19, %v3115_v21 }
 0xec8   : > { %v2495_v58 = vperm.slane %v2487_v63, %v7714_v33  ;;  %v2496_v52 = vrot.slane %v2491_v61, 4  ;;  %v2499_v48 = vsel %vm1212_vm11, %v2491_v61, %v2498_v46  ;;  %v3124_v57 = vperm.slane %v3116_v41, %v7714_v33 }
 0xec9   : > { %v2507_v22 = vperm.slane %v2499_v48, %v7725_v16  ;;  %v3125_v59 = vrot.slane %v3120_v17, 4  ;;  %v3128_v25 = vsel %vm1212_vm11, %v3120_v17, %v3127_v40 }
 0xeca   : > { %v2497_v55 = vsel %vm1212_vm11, %v2496_v52, %v2479_v28  ;;  %v2508_v60 = vrot.slane %v2495_v58, 4  ;;  %v2511_v0 = vsel %vm1212_vm11, %v2495_v58, %v2510_v53  ;;  %v3136_v34 = vperm.slane %v3128_v25, %v7725_v16 }
 0xecb   : > { %v2503_v3 = vperm.slane %v2497_v55, %v7725_v16  ;;  %v2519_v4 = vperm.slane %v2511_v0, %v7725_v16  ;;  %v2522_v5 = vrot.slane %v2507_v22, 4  ;;  %v3126_v24 = vsel %vm1212_vm11, %v3125_v59, %v3108_v32 }
 0xecc   : > { %v2509_v45 = vsel %vm1212_vm11, %v2508_v60, %v2483_v27  ;;  %v3132_v9 = vperm.slane %v3126_v24, %v7725_v16  ;;  %v3137_v11 = vrot.slane %v3124_v57, 4  ;;  %v3140_v6 = vsel %vm1212_vm11, %v3124_v57, %v3139_v30 }
 0xecd   : > { %v2515_v35 = vperm.slane %v2509_v45, %v7725_v16  ;;  %v2523_v14 = vsel %vm1212_vm11, 0.0, %v2522_v5  ;;  %v2526_v37 = vrot.slane %v2519_v4, 4  ;;  %v3148_v7 = vperm.slane %v3140_v6, %v7725_v16 }
 0xece   : > { %v2533_v36 = vrot.slane %v2523_v14, 4  ;;  %v3138_v13 = vsel %vm1212_vm11, %v3137_v11, %v3112_v29  ;;  %v3151_v19 = vrot.slane %v3136_v34, 4  ;;  %v2520_v12 = vrot.slane %v2503_v3, 4 }
 0xecf   : > { %v2527_v15 = vsel %vm1212_vm11, 0.0, %v2526_v37  ;;  %v3144_v42 = vperm.slane %v3138_v13, %v7725_v16  ;;  %v3155_v10 = vrot.slane %v3148_v7, 4  ;;  %v2524_v31 = vrot.slane %v2515_v35, 4 }
 0xed0   : > { %v2544_v28 = vrot.slane %v2527_v15, 4  ;;  %v3152_v27 = vsel %vm1212_vm11, 0.0, %v3151_v19  ;;  %v2521_v50 = vsel %vm1212_vm11, 0.0, %v2520_v12  ;;  %v2528_v32 = vsel %vm1212_vm11, %v2522_v5, %v2503_v3 }
 0xed1   : > { %v3156_v38 = vsel %vm1212_vm11, 0.0, %v3155_v10  ;;  %v2525_v43 = vsel %vm1212_vm11, 0.0, %v2524_v31  ;;  %v2532_v2 = vperm.slane %v2528_v32, %v7714_v33  ;;  %v3162_v29 = vrot.slane %v3152_v27, 4 }
 0xed2   : > { %v2534_v21 = vsel %vm1212_vm11, %v2533_v36, %v2521_v50  ;;  %v2539_v47 = vsel %vm1212_vm11, %v2526_v37, %v2515_v35  ;;  %v2545_v49 = vsel %vm1212_vm11, %v2544_v28, %v2525_v43  ;;  %v3173_v23 = vrot.slane %v3156_v38, 4 }
 0xed3   : > { %v2538_v46 = vperm.slane %v2534_v21, %v7714_v33  ;;  %v2543_v61 = vperm.slane %v2539_v47, %v7714_v33  ;;  %v2549_v17 = vperm.slane %v2545_v49, %v7714_v33  ;;  %v3149_v53 = vrot.slane %v3132_v9, 4 }
 0xed4   : > { %v3153_v40 = vrot.slane %v3144_v42, 4  ;;  %v3157_v63 = vsel %vm1212_vm11, %v3151_v19, %v3132_v9  ;;  %v3168_v41 = vsel %vm1212_vm11, %v3155_v10, %v3144_v42  ;;  %v2552_v52 = vrot.slane %v2532_v2, 4 }
 0xed5   : > { %v2550_v58 = vrot.slane %v2538_v46, 4  ;;  %v2564_v48 = vrot.slane %v2543_v61, 4  ;;  %v3161_v57 = vperm.slane %v3157_v63, %v7714_v33  ;;  %v3150_v30 = vsel %vm1212_vm11, 0.0, %v3149_v53 }
 0xed6   : > { %v3154_v22 = vsel %vm1212_vm11, 0.0, %v3153_v40  ;;  %v3172_v59 = vperm.slane %v3168_v41, %v7714_v33  ;;  %v3163_v55 = vsel %vm1212_vm11, %v3162_v29, %v3150_v30  ;;  %v2553_v5 = vsel %vm1212_vm11, %v2538_v46, %v2552_v52  ;;  %v3284_v41 = vpop.xlane.xlu2 %3283  ;;  %v657_v30 = vld [vmem:[%s8008_s12 + $0x10] sm:$0xff] }
 0xed7   : > { %v2565_v25 = vsel %vm1212_vm11, %v2549_v17, %v2564_v48  ;;  %v3174_v60 = vsel %vm1212_vm11, %v3173_v23, %v3154_v22  ;;  %v3181_v0 = vrot.slane %v3161_v57, 4  ;;  %v3167_v3 = vperm.slane %v3163_v55, %v7714_v33  ;;  %v658_v22 = vld [vmem:[%s8008_s12 + $0x18] sm:$0xff] }
 0xed8   : > { %v2573_v34 = vperm.slane %v2565_v25, %v7725_v16  ;;  %v3178_v4 = vperm.slane %v3174_v60, %v7714_v33  ;;  %v3193_v24 = vrot.slane %v3172_v59, 4  ;;  %v2551_v45 = vsel %vm1212_vm11, %v2550_v58, %v2532_v2  ;;  %v656_v60 = vld [vmem:[%s8008_s12 + $0x8] sm:$0xff] }
 0xed9   : > { %v2562_v9 = vrot.slane %v2549_v17, 4  ;;  %v3182_v6 = vsel %vm1212_vm11, %v3167_v3, %v3181_v0  ;;  %v3179_v35 = vrot.slane %v3167_v3, 4  ;;  %v2557_v14 = vperm.slane %v2551_v45, %v7725_v16 }
 0xeda   : > { %v2578_v11 = vrot.slane %v2573_v34, 4  ;;  %v3194_v37 = vsel %vm1212_vm11, %v3178_v4, %v3193_v24  ;;  %v3191_v36 = vrot.slane %v3178_v4, 4  ;;  %v2561_v13 = vperm.slane %v2553_v5, %v7725_v16 }
 0xedb   : > { %v2563_v7 = vsel %vm1212_vm11, %v2562_v9, %v2543_v61  ;;  %v3202_v19 = vperm.slane %v3194_v37, %v7725_v16  ;;  %v2576_v15 = vrot.slane %v2557_v14, 4  ;;  %v3190_v42 = vperm.slane %v3182_v6, %v7725_v16 }
 0xedc   : > { %v2569_v12 = vperm.slane %v2563_v7, %v7725_v16  ;;  %v3180_v10 = vsel %vm1212_vm11, %v3179_v35, %v3161_v57  ;;  %v3192_v31 = vsel %vm1212_vm11, %v3191_v36, %v3172_v59  ;;  %v2579_v28 = vsel %vm1212_vm11, %v2578_v11, %v2561_v13  ;;  %v655_v59 = vld [vmem:[%s8008_s12] sm:$0xff] }
 0xedd   : > { %v3207_v27 = vrot.slane %v3202_v19, 4  ;;  %v3186_v50 = vperm.slane %v3180_v10, %v7725_v16  ;;  %v3198_v32 = vperm.slane %v3192_v31, %v7725_v16  ;;  %v2580_v17 = vrot.slane %v2561_v13, 4 }
 0xede   : > { %v2574_v38 = vrot.slane %v2569_v12, 4  ;;  %v2577_v2 = vsel %vm1212_vm11, %v2569_v12, %v2576_v15  ;;  %v3209_v53 = vrot.slane %v3190_v42, 4  ;;  %v3294_v52 = vmul.f32 %v3284_v41, %v7317_v51 }
 0xedf   : > { %v3208_v43 = vsel %vm1212_vm11, %v3207_v27, %v3190_v42  ;;  %v3205_v29 = vrot.slane %v3186_v50, 4  ;;  %v3203_v21 = vrot.slane %v3198_v32, 4  ;;  %v2581_v40 = vsel %vm1212_vm11, %v2573_v34, %v2580_v17 }
 0xee0   : > { %v6866_v47 = vpack.i.bf16 %v3208_v43, %v2579_v28  ;;  %v7992_v49 = vsel %vm1212_vm11, %v2574_v38, %v2557_v14  ;;  %v3210_v63 = vsel %vm1212_vm11, %v3202_v19, %v3209_v53  ;;  %v3298_v48 = vadd.f32 1e-12, %v3294_v52  ;;  %v665_v52 = vld [vmem:[%s8047_s16 + $0x20] sm:$0xff] }
 0xee1   : > { %v3206_v23 = vsel %vm1212_vm11, %v3198_v32, %v3205_v29  ;;  %v7996_v46 = vsel %vm1212_vm11, %v3203_v21, %v3186_v50  ;;  %v6871_v58 = vpack.i.bf16 %v3210_v63, %v2581_v40  ;;  %v660_v55 = vpack.c.bf16 %v658_v22, %v657_v30 }
 0xee2   : > { %6867 = vrot.lane.b32.xlu1 %v6866_v47, %s7217_s28  ;;  %v6861_v61 = vpack.i.bf16 %v3206_v23, %v2577_v2  ;;  %7084 = vrsqrt.f32 %v3298_v48  ;;  %v659_v0 = vpack.c.bf16 %v656_v60, %v655_v59  ;;  %vm3308_vm15 = vweird.f32 %v3298_v48  ;;  %v664_v59 = vld [vmem:[%s8047_s16 + $0x18] sm:$0xff]  ;;  %v661_v60 = vld [vmem:[%s8047_s16] sm:$0xff] }
 0xee3   : > { %3371 = vmatpush.bf16.msrb.mxu3 %v660_v55  ;;  %v8016_v36 = vperm.slane %v7888_v56, 4  ;;  %v8021_v42 = vperm.slane %v7888_v56, 5  ;;  %v8055_v30 = vperm.slane %v7888_v56, 6 }
 0xee4   : > { %6862 = vrot.lane.b32.xlu2 %v6861_v61, %s7216_s27 }
 0xee7   : > { %3372 = vmatpush.bf16.msrb.mxu3 %v659_v0  ;;  %v662_v0 = vld [vmem:[%s8047_s16 + $0x8] sm:$0xff] }
 0xee8   : > { %v7085_v57 = vpop.eup %7084 }
 0xee9   : > { %v3303_v25 = vmul.f32 %v7085_v57, %v3298_v48  ;;  %vm3309_vm14 = vweird.f32 %v7085_v57  ;;  %v666_v48 = vld [vmem:[%s8047_s16 + $0x28] sm:$0xff] }
 0xeea   : > { %vm3310_vm0 = vmor %vm3308_vm15, %vm3309_vm14  ;;  %v671_v22 = vpack.c.bf16 %v666_v48, %v665_v52 }
 0xeeb   : > { %v3304_v34 = vmul.f32 %v7085_v57, %v3303_v25 }
 0xeec   : > { %6872 = vrot.lane.b32.xlu2 %v6871_v58, %s7215_s26 }
 0xeed   : > { %v3305_v24 = vmul.f32 0.5, %v3304_v34 }
 0xeef   : > { %v3306_v45 = vsub.f32 1.5, %v3305_v24 }
 0xef1   : > { %v3307_v11 = vmul.f32 %v7085_v57, %v3306_v45 }
 0xef3   : > { %v3311_v14 = vsel %vm3310_vm0, %v7085_v57, %v3307_v11  ;;  %v663_v57 = vld [vmem:[%s8047_s16 + $0x10] sm:$0xff] }
 0xef4   : > { %v3342_v13 = vmul.f32 %v3311_v14, %v7903_v26  ;;  %v670_v25 = vpack.c.bf16 %v664_v59, %v663_v57 }
 0xef6   : > { %v3347_v15 = vmul.f32 %v8016_v36, %v3342_v13 }
 0xef8   : > { %v8029_v27 = vadd.f32 %v8021_v42, %v3347_v15 }
 0xf02   : > { %v3287_v3 = vpop.xlane.xlu0 %3286 }
 0xf03   : > { %v3295_v4 = vmul.f32 %v3287_v3, %v7317_v51 }
 0xf05   : > { %v3299_v5 = vadd.f32 1e-12, %v3295_v4  ;;  %v669_v4 = vpack.c.bf16 %v662_v0, %v661_v60 }
 0xf07   : > { %7086 = vrsqrt.f32 %v3299_v5  ;;  %vm3318_vm6 = vweird.f32 %v3299_v5 }
 0xf0d   : > { %v7087_v9 = vpop.eup %7086 }
 0xf0e   : > { %v3313_v6 = vmul.f32 %v7087_v9, %v3299_v5  ;;  %vm3319_vm5 = vweird.f32 %v7087_v9 }
 0xf0f   : > { %vm3320_vm7 = vmor %vm3318_vm6, %vm3319_vm5 }
 0xf10   : > { %v3314_v35 = vmul.f32 %v7087_v9, %v3313_v6 }
 0xf12   : > { %v3315_v37 = vmul.f32 0.5, %v3314_v35 }
 0xf14   : > { %v3316_v7 = vsub.f32 1.5, %v3315_v37 }
 0xf16   : > { %v3317_v19 = vmul.f32 %v7087_v9, %v3316_v7 }
 0xf18   : > { %v3321_v12 = vsel %vm3320_vm7, %v7087_v9, %v3317_v19 }
 0xf19   : > { %v3343_v10 = vmul.f32 %v3321_v12, %v7911_v8 }
 0xf1b   : > { %v3348_v31 = vmul.f32 %v8016_v36, %v3343_v10 }
 0xf1d   : > { %v8026_v28 = vadd.f32 %v8021_v42, %v3348_v31 }
 0xf1f   : > { %v3356_v26 = vpack.c.bf16 %v8026_v28, %v8029_v27 }
 0xf21   : > { %6649 = vmatmul.msk.bf16.vlgmr.msrb.gmra.mxu3 %vm535_vm4, %v3356_v26 }
 0xf3e   : > { %v6863_v50 = vpop.permute.xlu2 %6862 }
 0xf3f   : > { %v6865_v32 = vunpack.i.h.bf16 %v6863_v50  ;;  %v6864_v38 = vunpack.i.l.bf16 %v6863_v50 }
 0xf41   : > { %v3223_v21 = vsel %vm796_vm3, %v7996_v46, %v6865_v32  ;;  %v2594_v47 = vsel %vm796_vm3, %v7992_v49, %v6864_v38  ;;  %v667_v49 = vld [vmem:[%s8047_s16 + $0x30] sm:$0xff]  ;;  %v668_v46 = vld [vmem:[%s8047_s16 + $0x38] sm:$0xff] }
 0xf42   : > { %v672_v58 = vpack.c.bf16 %v668_v46, %v667_v49 }
 0xf44   : > { %3433 = vmatpush.bf16.msra.mxu1 %v672_v58 }
 0xf46   : > { %v6873_v43 = vpop.permute.xlu2 %6872 }
 0xf47   : > { %v6875_v23 = vunpack.i.h.bf16 %v6873_v43  ;;  %v6874_v61 = vunpack.i.l.bf16 %v6873_v43 }
 0xf48   : > { %3434 = vmatpush.bf16.msra.mxu1 %v671_v22 }
 0xf4c   : > { %3435 = vmatpush.bf16.msra.mxu1 %v670_v25 }
 0xf50   : > { %3436 = vmatpush.bf16.msra.mxu1 %v669_v4 }
 0xf54   : > { %v6868_v2 = vpop.permute.xlu1 %6867 }
 0xf55   : > { %v6870_v8 = vunpack.i.h.bf16 %v6868_v2  ;;  %v6869_v29 = vunpack.i.l.bf16 %v6868_v2 }
 0xf57   : > { %v2595_v17 = vsel %vm1335_vm12, %v2594_v47, %v6869_v29  ;;  %v3224_v53 = vsel %vm1335_vm12, %v3223_v21, %v6870_v8 }
 0xf58   : > { %v2596_v40 = vsel %vm1337_vm13, %v2595_v17, %v6874_v61  ;;  %v3225_v63 = vsel %vm1337_vm13, %v3224_v53, %v6875_v23 }
 0xf59   : > { %v3227_v41 = vpack.c.bf16 %v3225_v63, %v2596_v40  ;;  %v8071_v63 = vperm.slane %v7888_v56, 7 }
 0xf5b   : > { %6648 = vmatmul.msk.bf16.gmra.mxu2 %vm535_vm4, %v3227_v41 }
 0xfa4   : > { %v3374_v55 = vpop.f32.mrf.mxu3 }
 0xfa5   : > { %v3375_v34 = vadd.f32 %v3374_v55, %v8055_v30 }
 0xfa7   : > { %v3388_v3 = vmul.f32 0.044715, %v3375_v34  ;;  %v3384_v10 = vmul.f32 0.5, %v3375_v34 }
 0xfa9   : > { %v3392_v5 = vmul.f32 %v3388_v3, %v3375_v34 }
 0xfab   : > { %v3396_v24 = vmul.f32 %v3392_v5, %v3375_v34 }
 0xfac   : > { %v3376_v45 = vpop.f32.mrf.mxu3 }
 0xfad   : > { %v3400_v9 = vadd.f32 %v3396_v24, %v3375_v34  ;;  %v3377_v11 = vadd.f32 %v3376_v45, %v8055_v30 }
 0xfaf   : > { %v3389_v6 = vmul.f32 0.044715, %v3377_v11  ;;  %v3404_v35 = vmul.f32 0.7978846, %v3400_v9  ;;  %v3385_v31 = vmul.f32 0.5, %v3377_v11 }
 0xfb1   : > { %v3393_v14 = vmul.f32 %v3389_v6, %v3377_v11  ;;  %7088 = vtanh.f32 %v3404_v35 }
 0xfb3   : > { %v3397_v37 = vmul.f32 %v3393_v14, %v3377_v11 }
 0xfb5   : > { %v3401_v7 = vadd.f32 %v3397_v37, %v3377_v11 }
 0xfb7   : > { %v3405_v13 = vmul.f32 0.7978846, %v3401_v7  ;;  %v7089_v19 = vpop.eup %7088 }
 0xfb8   : > { %v3412_v12 = vadd.f32 1.0, %v7089_v19 }
 0xfb9   : > { %7090 = vtanh.f32 %v3405_v13 }
 0xfba   : > { %v3416_v50 = vmul.f32 %v3412_v12, %v3384_v10 }
 0xfbf   : > { %v7091_v15 = vpop.eup %7090 }
 0xfc0   : > { %v3413_v26 = vadd.f32 1.0, %v7091_v15 }
 0xfc2   : > { %v3417_v32 = vmul.f32 %v3413_v26, %v3385_v31 }
 0xfc4   : > { %v3420_v38 = vpack.c.bf16 %v3417_v32, %v3416_v50 }
 0xfc6   : > { %6651 = vmatmul.msk.bf16.vlgmr.msra.gmra.mxu1 %vm505_vm2, %v3420_v38 }
 0xfde   : > { %v3249_v43 = vpop.f32.mrf.mxu2 }
 0xfdf   : > { %v3250_v2 = vadd.f32 %v3249_v43, %v7891_v39 }
 0xfe1   : > { %v3256_v8 = vadd.f32 %v3250_v2, %v7472_v18 }
 0xfe3   : > { %v3264_v29 = vsel %vm535_vm4, %v3256_v8, 0.0 }
 0xfe4   : > { %3265 = vadd.xlane.f32.xlu1 %v3264_v29 }
 0xfe6   : > { %v3251_v21 = vpop.f32.mrf.mxu2 }
 0xfe7   : > { %v3252_v47 = vadd.f32 %v3251_v21, %v7891_v39 }
 0xfe9   : > { %v3257_v23 = vadd.f32 %v3252_v47, %v7475_v20 }
 0xfeb   : > { %v3267_v61 = vsel %vm535_vm4, %v3257_v23, 0.0 }
 0xfec   : > { %3268 = vadd.xlane.f32.xlu2 %v3267_v61 }
0x1043   : > { %v3438_v40 = vpop.f32.mrf.mxu1 }
0x1044   : > { %v3439_v49 = vadd.f32 %v3438_v40, %v8071_v63  ;;  %v6655_v40 = vld [vmem:[%s7331_s14 + $0x30] sm:$0xff] }
0x1046   : > { %v3448_v52 = vadd.f32 %v3439_v49, %v8029_v27 }
0x1048   : > { %v3452_v59 = vsel %vm535_vm4, %v3448_v52, 0.0 }
0x104b   : > { %v3440_v48 = vpop.f32.mrf.mxu1 }
0x104c   : > { %v3441_v22 = vadd.f32 %v3440_v48, %v8071_v63 }
0x104e   : > { %v3449_v25 = vadd.f32 %v3441_v22, %v8026_v28 }
0x1050   : > { %v3455_v55 = vsel %vm535_vm4, %v3449_v25, 0.0 }
0x1057   : > { %v3266_v17 = vpop.xlane.xlu1 %3265 }
0x1058   : > { %v3272_v53 = vmul.f32 %v3266_v17, %v7317_v51 }
0x105a   : > { %v3276_v41 = vsub.f32 %v3256_v8, %v3272_v53 }
0x105c   : > { %v3280_v18 = vmul.f32 %v3276_v41, %v3276_v41 }
0x105e   : > { %v3288_v46 = vsel %vm535_vm4, %v3280_v18, 0.0 }
0x105f   : > { %v3269_v58 = vpop.xlane.xlu2 %3268  ;;  %3289 = vadd.xlane.f32.xlu1 %v3288_v46 }
0x1060   : > { %v3273_v20 = vmul.f32 %v3269_v58, %v7317_v51  ;;  %v6653_v58 = vld [vmem:[%s7331_s14 + $0x20] sm:$0xff] }
0x1062   : > { %v3277_v39 = vsub.f32 %v3257_v23, %v3273_v20  ;;  %v6654_v20 = vld [vmem:[%s7331_s14 + $0x28] sm:$0xff] }
0x1064   : > { %v3281_v57 = vmul.f32 %v3277_v39, %v3277_v39 }
0x1066   : > { %v3291_v56 = vsel %vm535_vm4, %v3281_v57, 0.0 }
0x1067   : > { %3292 = vadd.xlane.f32.xlu2 %v3291_v56  ;;  %3453 = vadd.xlane.f32.xlu1 %v3452_v59 }
0x106f   : > { %3456 = vadd.xlane.f32.xlu2 %v3455_v55 }
0x10d2   : > { %v3290_v60 = vpop.xlane.xlu1 %3289 }
0x10d3   : > { %v3296_v0 = vmul.f32 %v3290_v60, %v7317_v51 }
0x10d5   : > { %v3300_v34 = vadd.f32 1e-12, %v3296_v0 }
0x10d7   : > { %7092 = vrsqrt.f32 %v3300_v34  ;;  %vm3328_vm9 = vweird.f32 %v3300_v34 }
0x10da   : > { %v3293_v27 = vpop.xlane.xlu2 %3292  ;;  %v3454_v3 = vpop.xlane.xlu1 %3453 }
0x10db   : > { %v3297_v4 = vmul.f32 %v3293_v27, %v7317_v51  ;;  %v3464_v5 = vmul.f32 %v3454_v3, %v7317_v51  ;;  %v412_v27 = vld [vmem:[%s7343_s18 + $0x8] sm:$0xff] }
0x10dd   : > { %v7093_v24 = vpop.eup %7092  ;;  %v3301_v45 = vadd.f32 1e-12, %v3297_v4  ;;  %v8085_v9 = vsub.f32 %v3448_v52, %v3464_v5 }
0x10de   : > { %v3323_v11 = vmul.f32 %v7093_v24, %v3300_v34  ;;  %vm3329_vm8 = vweird.f32 %v7093_v24 }
0x10df   : > { %7094 = vrsqrt.f32 %v3301_v45  ;;  %v3472_v28 = vmul.f32 %v8085_v9, %v8085_v9  ;;  %vm3330_vm10 = vmor %vm3328_vm9, %vm3329_vm8  ;;  %vm3338_vm15 = vweird.f32 %v3301_v45 }
0x10e0   : > { %v3324_v6 = vmul.f32 %v7093_v24, %v3323_v11 }
0x10e1   : > { %v3476_v35 = vsel %vm535_vm4, %v3472_v28, 0.0 }
0x10e2   : > { %v3325_v14 = vmul.f32 0.5, %v3324_v6  ;;  %v3457_v37 = vpop.xlane.xlu2 %3456  ;;  %3477 = vadd.xlane.f32.xlu1 %v3476_v35  ;;  %v8117_v6 = vperm.slane %v412_v27, 1 }
0x10e3   : > { %v3465_v7 = vmul.f32 %v3457_v37, %v7317_v51 }
0x10e4   : > { %v3326_v13 = vsub.f32 1.5, %v3325_v14 }
0x10e5   : > { %v7095_v19 = vpop.eup %7094  ;;  %v8091_v12 = vsub.f32 %v3449_v25, %v3465_v7 }
0x10e6   : > { %v3327_v15 = vmul.f32 %v7093_v24, %v3326_v13  ;;  %v3333_v10 = vmul.f32 %v7095_v19, %v3301_v45  ;;  %vm3339_vm14 = vweird.f32 %v7095_v19 }
0x10e7   : > { %v3473_v31 = vmul.f32 %v8091_v12, %v8091_v12  ;;  %vm3340_vm0 = vmor %vm3338_vm15, %vm3339_vm14 }
0x10e8   : > { %v3334_v26 = vmul.f32 %v7095_v19, %v3333_v10  ;;  %v3331_v32 = vsel %vm3330_vm10, %v7093_v24, %v3327_v15  ;;  %v8114_v24 = vperm.slane %v412_v27, 0 }
0x10e9   : > { %v3479_v50 = vsel %vm535_vm4, %v3473_v31, 0.0  ;;  %v3344_v2 = vmul.f32 %v3331_v32, %v3276_v41  ;;  %v6656_v41 = vld [vmem:[%s7331_s14 + $0x38] sm:$0xff]  ;;  %s6610_s14 = sshll.u32 %s8851_s25, 2 }
0x10ea   : > { %v3335_v38 = vmul.f32 0.5, %v3334_v26  ;;  %3480 = vadd.xlane.f32.xlu2 %v3479_v50  ;;  %v3556_v49 = vpack.c.bf16 %v6656_v41, %v6655_v40 }
0x10eb   : > { %v3349_v47 = vmul.f32 %v8016_v36, %v3344_v2 }
0x10ec   : > { %v3336_v43 = vsub.f32 1.5, %v3335_v38  ;;  %3599 = vmatpush.bf16.msrb.mxu0 %v3556_v49 }
0x10ed   : > { %v8099_v61 = vadd.f32 %v8021_v42, %v3349_v47 }
0x10ee   : > { %v3337_v8 = vmul.f32 %v7095_v19, %v3336_v43 }
0x10f0   : > { %v3341_v29 = vsel %vm3340_vm0, %v7095_v19, %v3337_v8 }
0x10f1   : > { %v3345_v21 = vmul.f32 %v3341_v29, %v3277_v39 }
0x10f3   : > { %v3350_v23 = vmul.f32 %v8016_v36, %v3345_v21  ;;  %v3555_v36 = vpack.c.bf16 %v6654_v20, %v6653_v58 }
0x10f5   : > { %v8102_v17 = vadd.f32 %v8021_v42, %v3350_v23  ;;  %3600 = vmatpush.bf16.msrb.mxu0 %v3555_v36 }
0x10f7   : > { %v3357_v53 = vpack.c.bf16 %v8102_v17, %v8099_v61 }
0x10f9   : > { %6650 = vmatmul.msk.bf16.gmra.mxu3 %vm535_vm4, %v3357_v53 }
0x1155   : > { %v3478_v18 = vpop.xlane.xlu1 %3477 }
0x1156   : > { %v3488_v46 = vmul.f32 %v3478_v18, %v7317_v51 }
0x1158   : > { %v3492_v39 = vadd.f32 1e-12, %v3488_v46 }
0x115a   : > { %7096 = vrsqrt.f32 %v3492_v39  ;;  %vm3502_vm6 = vweird.f32 %v3492_v39 }
0x115d   : > { %v3481_v42 = vpop.xlane.xlu2 %3480 }
0x115e   : > { %v3489_v52 = vmul.f32 %v3481_v42, %v7317_v51 }
0x1160   : > { %v7097_v48 = vpop.eup %7096  ;;  %v3493_v57 = vadd.f32 1e-12, %v3489_v52 }
0x1161   : > { %v3497_v22 = vmul.f32 %v7097_v48, %v3492_v39  ;;  %vm3503_vm5 = vweird.f32 %v7097_v48 }
0x1162   : > { %7098 = vrsqrt.f32 %v3493_v57  ;;  %vm3504_vm7 = vmor %vm3502_vm6, %vm3503_vm5  ;;  %vm3512_vm9 = vweird.f32 %v3493_v57 }
0x1163   : > { %v3498_v56 = vmul.f32 %v7097_v48, %v3497_v22 }
0x1165   : > { %v3499_v59 = vmul.f32 0.5, %v3498_v56 }
0x1167   : > { %v3500_v25 = vsub.f32 1.5, %v3499_v59 }
0x1168   : > { %v7099_v55 = vpop.eup %7098 }
0x1169   : > { %v3501_v60 = vmul.f32 %v7097_v48, %v3500_v25  ;;  %v3507_v0 = vmul.f32 %v7099_v55, %v3493_v57  ;;  %vm3513_vm8 = vweird.f32 %v7099_v55 }
0x116a   : > { %vm3514_vm10 = vmor %vm3512_vm9, %vm3513_vm8 }
0x116b   : > { %v3508_v34 = vmul.f32 %v7099_v55, %v3507_v0  ;;  %v3505_v3 = vsel %vm3504_vm7, %v7097_v48, %v3501_v60 }
0x116c   : > { %v3536_v45 = vmul.f32 %v3505_v3, %v8085_v9 }
0x116d   : > { %v3509_v4 = vmul.f32 0.5, %v3508_v34 }
0x116e   : > { %v3541_v35 = vmul.f32 %v8114_v24, %v3536_v45 }
0x116f   : > { %v3510_v5 = vsub.f32 1.5, %v3509_v4 }
0x1170   : > { %v8123_v7 = vadd.f32 %v8117_v6, %v3541_v35 }
0x1171   : > { %v3511_v11 = vmul.f32 %v7099_v55, %v3510_v5 }
0x1173   : > { %v3515_v28 = vsel %vm3514_vm10, %v7099_v55, %v3511_v11 }
0x1174   : > { %v3537_v14 = vmul.f32 %v3515_v28, %v8091_v12 }
0x1176   : > { %v3542_v37 = vmul.f32 %v8114_v24, %v3537_v14 }
0x1178   : > { %v8126_v13 = vadd.f32 %v8117_v6, %v3542_v37 }
0x117a   : > { %v3584_v9 = vpack.c.bf16 %v8126_v13, %v8123_v7 }
0x117c   : > { %v3379_v19 = vpop.f32.mrf.mxu3  ;;  %6673 = vmatmul.msk.bf16.vlgmr.msrb.gmra.mxu0 %vm535_vm4, %v3584_v9 }
0x117d   : > { %v3380_v15 = vadd.f32 %v3379_v19, %v8055_v30 }
0x117f   : > { %v3390_v10 = vmul.f32 0.044715, %v3380_v15  ;;  %v3386_v40 = vmul.f32 0.5, %v3380_v15 }
0x1181   : > { %v3394_v31 = vmul.f32 %v3390_v10, %v3380_v15 }
0x1183   : > { %v3398_v26 = vmul.f32 %v3394_v31, %v3380_v15 }
0x1184   : > { %v3381_v12 = vpop.f32.mrf.mxu3 }
0x1185   : > { %v3382_v50 = vadd.f32 %v3381_v12, %v8055_v30  ;;  %v3402_v32 = vadd.f32 %v3398_v26, %v3380_v15  ;;  %v8134_v30 = vperm.slane %v412_v27, 2 }
0x1187   : > { %v3391_v38 = vmul.f32 0.044715, %v3382_v50  ;;  %v3406_v2 = vmul.f32 0.7978846, %v3402_v32  ;;  %v3387_v41 = vmul.f32 0.5, %v3382_v50 }
0x1189   : > { %v3395_v43 = vmul.f32 %v3391_v38, %v3382_v50  ;;  %7100 = vtanh.f32 %v3406_v2 }
0x118b   : > { %v3399_v8 = vmul.f32 %v3395_v43, %v3382_v50 }
0x118d   : > { %v3403_v29 = vadd.f32 %v3399_v8, %v3382_v50 }
0x118f   : > { %v3407_v21 = vmul.f32 0.7978846, %v3403_v29  ;;  %v7101_v47 = vpop.eup %7100 }
0x1190   : > { %v3414_v23 = vadd.f32 1.0, %v7101_v47 }
0x1191   : > { %7102 = vtanh.f32 %v3407_v21 }
0x1192   : > { %v3418_v49 = vmul.f32 %v3414_v23, %v3386_v40 }
0x1197   : > { %v7103_v53 = vpop.eup %7102 }
0x1198   : > { %v3415_v18 = vadd.f32 1.0, %v7103_v53 }
0x119a   : > { %v3419_v46 = vmul.f32 %v3415_v18, %v3387_v41 }
0x119c   : > { %v3421_v58 = vpack.c.bf16 %v3419_v46, %v3418_v49 }
0x119e   : > { %6652 = vmatmul.msk.bf16.gmra.mxu1 %vm505_vm2, %v3421_v58 }
0x11f9   : > { %v3602_v20 = vpop.f32.mrf.mxu0 }
0x11fa   : > { %v3603_v36 = vadd.f32 %v3602_v20, %v8134_v30 }
0x11fc   : > { %v8137_v39 = vpack.c.bf16 %v3603_v36, %v3603_v36 }
0x11fe   : > { %3621 = vrot.lane.b32.xlu2 %v8137_v39, %s7208_s19  ;;  %3619 = vrot.lane.b32.xlu0 %v8137_v39, %s7209_s20  ;;  %v3623_v42 = vunpack.c.l.b16 %v8137_v39 }
0x11ff   : > { %3617 = vrot.lane.b32.xlu1 %v8137_v39, %s7210_s21 }
0x1200   : > { %v3627_v52 = vpack.c.b16 %v3623_v42, %v3623_v42 }
0x1201   : > { %v3604_v31 = vpop.f32.mrf.mxu0 }
0x1202   : > { %v3605_v26 = vadd.f32 %v3604_v31, %v8134_v30 }
0x1204   : > { %v8176_v12 = vpack.c.bf16 %v3605_v26, %v3605_v26 }
0x1206   : > { %v4251_v32 = vunpack.c.l.b16 %v8176_v12 }
0x1207   : > { %3631 = vrot.lane.b32.xlu1 %v3627_v52, %s7211_s22 }
0x1208   : > { %v8183_v43 = vpack.c.b16 %v4251_v32, %v4251_v32 }
0x121b   : > { %v3443_v48 = vpop.f32.mrf.mxu1 }
0x121c   : > { %v3444_v57 = vadd.f32 %v3443_v48, %v8071_v63 }
0x121e   : > { %v3450_v22 = vadd.f32 %v3444_v57, %v8099_v61 }
0x1220   : > { %v3458_v25 = vsel %vm535_vm4, %v3450_v22, 0.0 }
0x1223   : > { %v3445_v56 = vpop.f32.mrf.mxu1 }
0x1224   : > { %v3446_v59 = vadd.f32 %v3445_v56, %v8071_v63 }
0x1226   : > { %v3451_v55 = vadd.f32 %v3446_v59, %v8102_v17 }
0x1227   : > { %3459 = vadd.xlane.f32.xlu2 %v3458_v25 }
0x1228   : > { %v3461_v60 = vsel %vm535_vm4, %v3451_v55, 0.0 }
0x122f   : > { %3462 = vadd.xlane.f32.xlu2 %v3461_v60 }
0x1258   : > { %v8161_v4 = vpop.permute.xlu2 %3621 }
0x1259   : > { %v3626_v17 = vunpack.c.l.b16 %v8161_v4 }
0x125b   : > { %v8167_v5 = vpack.c.b16 %v3626_v17, %v3626_v17 }
0x1270   : > { %v8153_v0 = vpop.permute.xlu0 %3619 }
0x1271   : > { %v3625_v34 = vunpack.c.l.b16 %v8153_v0  ;;  %v8156_v27 = vpop.permute.xlu1 %3617 }
0x1272   : > { %v3624_v3 = vunpack.c.l.b16 %v8156_v27 }
0x1273   : > { %v8159_v61 = vpack.c.b16 %v3625_v34, %v3625_v34 }
0x1274   : > { %v3628_v63 = vpack.c.b16 %v3624_v3, %v3624_v3 }
0x1275   : > { %3635 = vrot.lane.b32.xlu2 %v8159_v61, %s7211_s22 }
0x1276   : > { %3633 = vrot.lane.b32.xlu1 %v3628_v63, %s7211_s22 }
0x1279   : > { %v3632_v2 = vpop.permute.xlu1 %3631 }
0x127d   : > { %3637 = vrot.lane.b32.xlu2 %v8167_v5, %s7211_s22 }
0x129a   : > { %v3460_v45 = vpop.xlane.xlu2 %3459 }
0x129b   : > { %v3466_v11 = vmul.f32 %v3460_v45, %v7317_v51 }
0x129d   : > { %v3470_v28 = vsub.f32 %v3450_v22, %v3466_v11 }
0x129f   : > { %v3474_v35 = vmul.f32 %v3470_v28, %v3470_v28 }
0x12a1   : > { %v3482_v14 = vsel %vm535_vm4, %v3474_v35, 0.0 }
0x12a2   : > { %v3463_v37 = vpop.xlane.xlu2 %3462  ;;  %3483 = vadd.xlane.f32.xlu0 %v3482_v14 }
0x12a3   : > { %v3467_v9 = vmul.f32 %v3463_v37, %v7317_v51 }
0x12a5   : > { %v3471_v19 = vsub.f32 %v3451_v55, %v3467_v9 }
0x12a7   : > { %v3475_v15 = vmul.f32 %v3471_v19, %v3471_v19 }
0x12a9   : > { %v3485_v10 = vsel %vm535_vm4, %v3475_v15, 0.0 }
0x12aa   : > { %3486 = vadd.xlane.f32.xlu1 %v3485_v10 }
0x12c3   : > { %4247 = vrot.lane.b32.xlu1 %v8176_v12, %s7209_s20 }
0x12cb   : > { %3839 = vrot.lane.b32.xlu1 %v3627_v52, %s7212_s23 }
0x12cf   : > { %v3636_v50 = vpop.permute.xlu2 %3635 }
0x12d3   : > { %3841 = vrot.lane.b32.xlu1 %v3628_v63, %s7212_s23 }
0x12d7   : > { %v3638_v38 = vpop.permute.xlu2 %3637 }
0x12d8   : > { %6879 = vxpose.binary.xlu0.c.b16.start.end [1/2] (short) (narrow) %v3638_v38, %v3636_v50, 16 }
0x12db   : > { %4259 = vrot.lane.b32.xlu1 %v8183_v43, %s7211_s22 }
0x12e8   : > { %v3634_v8 = vpop.permute.xlu1 %3633 }
0x12e9   : > { %6876 = vxpose.binary.xlu2.c.b16.start.end [1/2] (short) (narrow) %v3634_v8, %v3632_v2, 16 }
0x1315   : > { %v3484_v29 = vpop.xlane.xlu0 %3483 }
0x1316   : > { %v3490_v21 = vmul.f32 %v3484_v29, %v7317_v51 }
0x1318   : > { %v3494_v47 = vadd.f32 1e-12, %v3490_v21 }
0x131a   : > { %7104 = vrsqrt.f32 %v3494_v47  ;;  %vm3522_vm15 = vweird.f32 %v3494_v47 }
0x131d   : > { %v3487_v23 = vpop.xlane.xlu1 %3486 }
0x131e   : > { %v3491_v53 = vmul.f32 %v3487_v23, %v7317_v51 }
0x1320   : > { %v7105_v40 = vpop.eup %7104  ;;  %v3495_v41 = vadd.f32 1e-12, %v3491_v53 }
0x1321   : > { %v3517_v18 = vmul.f32 %v7105_v40, %v3494_v47  ;;  %vm3523_vm14 = vweird.f32 %v7105_v40 }
0x1322   : > { %7106 = vrsqrt.f32 %v3495_v41  ;;  %vm3524_vm0 = vmor %vm3522_vm15, %vm3523_vm14  ;;  %vm3532_vm6 = vweird.f32 %v3495_v41 }
0x1323   : > { %v3518_v49 = vmul.f32 %v7105_v40, %v3517_v18 }
0x1325   : > { %v3519_v46 = vmul.f32 0.5, %v3518_v49 }
0x1327   : > { %v3520_v58 = vsub.f32 1.5, %v3519_v46 }
0x1328   : > { %v7107_v20 = vpop.eup %7106 }
0x1329   : > { %v3521_v36 = vmul.f32 %v7105_v40, %v3520_v58  ;;  %v3527_v42 = vmul.f32 %v7107_v20, %v3495_v41  ;;  %vm3533_vm5 = vweird.f32 %v7107_v20 }
0x132a   : > { %vm3534_vm7 = vmor %vm3532_vm6, %vm3533_vm5 }
0x132b   : > { %v3528_v52 = vmul.f32 %v7107_v20, %v3527_v42  ;;  %v3525_v48 = vsel %vm3524_vm0, %v7105_v40, %v3521_v36 }
0x132c   : > { %v3538_v56 = vmul.f32 %v3525_v48, %v3470_v28 }
0x132d   : > { %v3529_v57 = vmul.f32 0.5, %v3528_v52 }
0x132e   : > { %v3543_v60 = vmul.f32 %v8114_v24, %v3538_v56 }
0x132f   : > { %v3530_v22 = vsub.f32 1.5, %v3529_v57 }
0x1330   : > { %v8192_v3 = vadd.f32 %v8117_v6, %v3543_v60 }
0x1331   : > { %v3531_v59 = vmul.f32 %v7107_v20, %v3530_v22 }
0x1333   : > { %v3535_v25 = vsel %vm3534_vm7, %v7107_v20, %v3531_v59 }
0x1334   : > { %v3539_v55 = vmul.f32 %v3535_v25, %v3471_v19 }
0x1336   : > { %v3544_v34 = vmul.f32 %v8114_v24, %v3539_v55  ;;  %v8206_v24 = vpop.permute.xlu1 %4247 }
0x1338   : > { %v8195_v63 = vadd.f32 %v8117_v6, %v3544_v34  ;;  %v4253_v6 = vunpack.c.l.b16 %v8206_v24 }
0x133a   : > { %v3585_v17 = vpack.c.bf16 %v8195_v63, %v8192_v3  ;;  %v8211_v45 = vpack.c.b16 %v4253_v6, %v4253_v6 }
0x133c   : > { %6674 = vmatmul.msk.bf16.gmra.mxu0 %vm535_vm4, %v3585_v17 }
0x133e   : > { %v3840_v11 = vpop.permute.xlu1 %3839 }
0x1346   : > { %4249 = vrot.lane.b32.xlu0 %v8176_v12, %s7208_s19  ;;  %v3842_v28 = vpop.permute.xlu1 %3841 }
0x134e   : > { %3843 = vrot.lane.b32.xlu0 %v8159_v61, %s7212_s23  ;;  %v4260_v55 = vpop.permute.xlu1 %4259 }
0x1352   : > { %4245 = vrot.lane.b32.xlu2 %v8176_v12, %s7210_s21 }
0x1356   : > { %3845 = vrot.lane.b32.xlu0 %v8167_v5, %s7212_s23 }
0x135e   : > { %4263 = vrot.lane.b32.xlu0 %v8211_v45, %s7211_s22 }
0x1380   : > { %6882 = vxpose.binary.xlu0.c.b16.start.end [1/2] (short) (narrow) %v3842_v28, %v3840_v11, 16 }
0x1384   : > { %v6880_v35 = vpop.trf.xlu0 }
0x1385   : > { %v3749_v61 = vsel %vm800_vm1, %v6880_v35, 0 }
0x1386   : > { %3758 = vmatpush.bf16.msrb.mxu1 %v3749_v61 }
0x1389   : > { %6677 = vmatmul.msk.bf16.vlgmr.msrb.gmra.mxu1 %vm796_vm3, %v8153_v0 }
0x138a   : > { %v6877_v14 = vpop.trf.xlu2 }
0x138b   : > { %v3711_v5 = vsel %vm800_vm1, %v6877_v14, 0 }
0x138c   : > { %3720 = vmatpush.bf16.msra.mxu2 %v3711_v5  ;;  %v6881_v37 = vpop.trf.xlu0 }
0x138d   : > { %v3768_v9 = vsel %vm800_vm1, %v6881_v37, 0 }
0x138e   : > { %3777 = vmatpush.bf16.msra.mxu0 %v3768_v9 }
0x138f   : > { %6675 = vmatmul.msk.bf16.vlgmr.msra.gmra.mxu2 %vm796_vm3, %v8137_v39 }
0x1391   : > { %6678 = vmatmul.msk.bf16.vlgmr.msra.gmra.mxu0 %vm796_vm3, %v8161_v4 }
0x1392   : > { %v6878_v19 = vpop.trf.xlu2 }
0x1393   : > { %v3730_v15 = vsel %vm800_vm1, %v6878_v19, 0 }
0x1394   : > { %3739 = vmatpush.bf16.msra.mxu3 %v3730_v15 }
0x1397   : > { %6676 = vmatmul.msk.bf16.vlgmr.msra.gmra.mxu3 %vm796_vm3, %v8156_v27 }
0x13ac   : > { %v8240_v27 = vpop.permute.xlu2 %4245 }
0x13ad   : > { %v4252_v56 = vunpack.c.l.b16 %v8240_v27 }
0x13af   : > { %v8251_v59 = vpack.c.b16 %v4252_v56, %v4252_v56 }
0x13b8   : > { %v8227_v0 = vpop.permute.xlu0 %4249 }
0x13b9   : > { %v4254_v10 = vunpack.c.l.b16 %v8227_v0  ;;  %v3607_v39 = vpop.f32.mrf.mxu0 }
0x13ba   : > { %v3608_v25 = vadd.f32 %v3607_v39, %v8134_v30 }
0x13bb   : > { %v8230_v31 = vpack.c.b16 %v4254_v10, %v4254_v10 }
0x13bc   : > { %v8256_v60 = vpack.c.bf16 %v3608_v25, %v3608_v25 }
0x13bd   : > { %4265 = vrot.lane.b32.xlu2 %v8230_v31, %s7211_s22 }
0x13c0   : > { %v8234_v26 = vpop.permute.xlu0 %3843 }
0x13c1   : > { %v8236_v4 = vpop.f32.mrf.mxu0 }
0x13c8   : > { %v8238_v32 = vpop.permute.xlu0 %3845 }
0x13d0   : > { %v4264_v41 = vpop.permute.xlu0 %4263 }
0x1406   : > { %v3760_v50 = vpop.f32.mrf.mxu1 }
0x1407   : > { %v3785_v23 = vmul.f32 0.35355338, %v3760_v50 }
0x1409   : > { %v3789_v46 = vadd.f32 %v3785_v23, %v7452_v54 }
0x140b   : > { %v3797_v20 = vsel %vm796_vm3, %v3789_v46, -inf }
0x140e   : > { %v3762_v38 = vpop.f32.mrf.mxu1  ;;  %v3779_v2 = vpop.f32.mrf.mxu0 }
0x140f   : > { %v3786_v58 = vmul.f32 0.35355338, %v3779_v2 }
0x1411   : > { %v3790_v42 = vadd.f32 %v3786_v58, %v7452_v54 }
0x1412   : > { %v3722_v8 = vpop.f32.mrf.mxu2 }
0x1413   : > { %v3783_v29 = vmul.f32 0.35355338, %v3722_v8  ;;  %v3800_v48 = vsel %vm796_vm3, %v3790_v42, -inf }
0x1415   : > { %v3787_v21 = vadd.f32 %v3783_v29, %v7452_v54 }
0x1416   : > { %v3781_v47 = vpop.f32.mrf.mxu0 }
0x1417   : > { %v3791_v53 = vsel %vm796_vm3, %v3787_v21, -inf  ;;  %v4266_v40 = vpop.permute.xlu2 %4265 }
0x1418   : > { %3792 = vmax.xlane.f32.xlu1 %v3791_v53 }
0x1419   : > { %6891 = vxpose.binary.xlu0.c.b16.start.end [1/2] (short) (narrow) %v4266_v40, %v4264_v41, 16 }
0x141a   : > { %v3724_v18 = vpop.f32.mrf.mxu2  ;;  %v3741_v49 = vpop.f32.mrf.mxu3 }
0x141b   : > { %v3784_v52 = vmul.f32 0.35355338, %v3741_v49 }
0x141d   : > { %v3788_v57 = vadd.f32 %v3784_v52, %v7452_v54 }
0x141f   : > { %v3794_v22 = vsel %vm796_vm3, %v3788_v57, -inf }
0x1420   : > { %3798 = vmax.xlane.f32.xlu1 %v3797_v20 }
0x1422   : > { %v3743_v36 = vpop.f32.mrf.mxu3 }
0x1428   : > { %3801 = vmax.xlane.f32.xlu1 %v3800_v48 }
0x142c   : > { %v6883_v29 = vpop.trf.xlu0 }
0x1430   : > { %3795 = vmax.xlane.f32.xlu1 %v3794_v22 }
0x1434   : > { %v6884_v47 = vpop.trf.xlu0 }
0x1449   : > { %4261 = vrot.lane.b32.xlu1 %v8251_v59, %s7211_s22 }
0x1487   : > { %4873 = vrot.lane.b32.xlu0 %v8256_v60, %s7210_s21 }
0x148b   : > { %v3793_v34 = vpop.xlane.xlu1 %3792 }
0x148c   : > { %v3803_v54 = vsub.f32 %v3787_v21, %v3793_v34 }
0x148e   : > { %v3807_v17 = vmul.f32 1.442695, %v3803_v54 }
0x148f   : > { %4467 = vrot.lane.b32.xlu0 %v8183_v43, %s7212_s23 }
0x1490   : > { %7108 = vpow2.f32 %v3807_v17 }
0x1493   : > { %v3799_v6 = vpop.xlane.xlu1 %3798 }
0x1494   : > { %v3805_v11 = vsub.f32 %v3789_v46, %v3799_v6  ;;  %v4879_v6 = vunpack.c.l.b16 %v8256_v60 }
0x1496   : > { %v7109_v28 = vpop.eup %7108  ;;  %v3811_v35 = vmul.f32 1.442695, %v3805_v11  ;;  %v8285_v11 = vpack.c.b16 %v4879_v6, %v4879_v6 }
0x1497   : > { %v3815_v61 = vsel %vm796_vm3, %v7109_v28, 0.0 }
0x1498   : > { %7110 = vpow2.f32 %v3811_v35  ;;  %3816 = vadd.xlane.f32.xlu1 %v3815_v61 }
0x149b   : > { %v3802_v14 = vpop.xlane.xlu1 %3801 }
0x149c   : > { %v3806_v5 = vsub.f32 %v3790_v42, %v3802_v14 }
0x149e   : > { %v7111_v37 = vpop.eup %7110  ;;  %v3813_v9 = vmul.f32 1.442695, %v3806_v5 }
0x149f   : > { %v3821_v19 = vsel %vm796_vm3, %v7111_v37, 0.0 }
0x14a0   : > { %7112 = vpow2.f32 %v3813_v9  ;;  %3822 = vadd.xlane.f32.xlu1 %v3821_v19 }
0x14a3   : > { %v3796_v15 = vpop.xlane.xlu1 %3795 }
0x14a4   : > { %v3804_v10 = vsub.f32 %v3788_v57, %v3796_v15 }
0x14a6   : > { %v7113_v43 = vpop.eup %7112  ;;  %v3809_v39 = vmul.f32 1.442695, %v3804_v10 }
0x14a7   : > { %v3824_v50 = vsel %vm796_vm3, %v7113_v43, 0.0 }
0x14a8   : > { %7114 = vpow2.f32 %v3809_v39  ;;  %3825 = vadd.xlane.f32.xlu2 %v3824_v50 }
0x14ae   : > { %v7115_v38 = vpop.eup %7114 }
0x14af   : > { %v3818_v2 = vsel %vm796_vm3, %v7115_v38, 0.0 }
0x14b0   : > { %3819 = vadd.xlane.f32.xlu2 %v3818_v2 }
0x14bb   : > { %v4262_v8 = vpop.permute.xlu1 %4261 }
0x14c5   : > { %v6892_v46 = vpop.trf.xlu0 }
0x14cd   : > { %v6893_v57 = vpop.trf.xlu0 }
0x14ce   : > { %v4396_v56 = vsel %vm800_vm1, %v6893_v57, 0 }
0x14d9   : > { %6888 = vxpose.binary.xlu2.c.b16.start.end [1/2] (short) (narrow) %v8238_v32, %v8234_v26, 16  ;;  %v4377_v26 = vsel %vm800_vm1, %v6892_v46, 0 }
0x14da   : > { %6885 = vxpose.binary.xlu1.c.b16.start.end [1/2] (short) (narrow) %v4262_v8, %v4260_v55, 16 }
0x150b   : > { %v3817_v21 = vpop.xlane.xlu1 %3816 }
0x150c   : > { %7116 = vrcp.f32 %v3817_v21 }
0x1512   : > { %v7117_v23 = vpop.eup %7116 }
0x1513   : > { %v3823_v53 = vpop.xlane.xlu1 %3822  ;;  %v3831_v40 = vmul.f32 %v7117_v23, %v7109_v28  ;;  %v8287_v28 = vpop.permute.xlu0 %4873 }
0x1514   : > { %7118 = vrcp.f32 %v3823_v53  ;;  %v4880_v35 = vunpack.c.l.b16 %v8287_v28 }
0x1515   : > { %v3835_v41 = vpack.c.bf16 %v3831_v40, %v3831_v40 }
0x1516   : > { %v8292_v61 = vpack.c.b16 %v4880_v35, %v4880_v35 }
0x1517   : > { %v3919_v18 = vsel %vm796_vm3, %v3835_v41, 0 }
0x1518   : > { %3928 = vmatpush.bf16.xpose.msrb.mxu2 %v3919_v18 }
0x151a   : > { %v7119_v49 = vpop.eup %7118 }
0x151b   : > { %v3826_v58 = vpop.xlane.xlu2 %3825  ;;  %v3833_v20 = vmul.f32 %v7119_v49, %v7111_v37 }
0x151c   : > { %7120 = vrcp.f32 %v3826_v58 }
0x151d   : > { %v3837_v36 = vpack.c.bf16 %v3833_v20, %v3833_v20 }
0x151f   : > { %v3957_v32 = vsel %vm796_vm3, %v3837_v36, 0  ;;  %6679 = vmatmul.msk.bf16.vlgmr.msrb.gmra.mxu2 %vm796_vm3, %v6883_v29 }
0x1520   : > { %3966 = vmatpush.bf16.xpose.msra.mxu1 %v3957_v32 }
0x1522   : > { %v7121_v42 = vpop.eup %7120 }
0x1523   : > { %v3820_v52 = vpop.xlane.xlu2 %3819  ;;  %v3834_v48 = vmul.f32 %v7121_v42, %v7113_v43 }
0x1524   : > { %7122 = vrcp.f32 %v3820_v52 }
0x1525   : > { %v3838_v22 = vpack.c.bf16 %v3834_v48, %v3834_v48 }
0x1527   : > { %v3976_v25 = vsel %vm796_vm3, %v3838_v22, 0 }
0x1528   : > { %4386 = vmatpush.bf16.msrb.mxu1 %v4377_v26  ;;  %3985 = vmatpush.bf16.xpose.msrb.mxu0 %v3976_v25 }
0x152a   : > { %v7123_v55 = vpop.eup %7122 }
0x152b   : > { %v3832_v34 = vmul.f32 %v7123_v55, %v7115_v38 }
0x152d   : > { %v3836_v54 = vpack.c.bf16 %v3832_v34, %v3832_v34 }
0x152f   : > { %v3938_v17 = vsel %vm796_vm3, %v3836_v54, 0  ;;  %v4468_v54 = vpop.permute.xlu0 %4467 }
0x1530   : > { %4405 = vmatpush.bf16.msra.mxu0 %v4396_v56  ;;  %3947 = vmatpush.bf16.xpose.msrb.mxu3 %v3938_v17 }
0x1534   : > { %4875 = vrot.lane.b32.xlu1 %v8256_v60, %s7209_s20 }
0x1537   : > { %6680 = vmatmul.msk.bf16.vlgmr.msrb.gmra.mxu3 %vm796_vm3, %v6884_v47 }
0x153c   : > { %4473 = vrot.lane.b32.xlu1 %v8230_v31, %s7212_s23 }
0x1542   : > { %4877 = vrot.lane.b32.xlu2 %v8256_v60, %s7208_s19 }
0x154a   : > { %4469 = vrot.lane.b32.xlu2 %v8251_v59, %s7212_s23 }
0x1552   : > { %4887 = vrot.lane.b32.xlu2 %v8285_v11, %s7211_s22 }
0x155a   : > { %4889 = vrot.lane.b32.xlu2 %v8292_v61, %s7211_s22 }
0x1562   : > { %4471 = vrot.lane.b32.xlu2 %v8211_v45, %s7212_s23 }
0x157a   : > { %v6889_v31 = vpop.trf.xlu2 }
0x157b   : > { %6681 = vmatmul.msk.bf16.vlgmr.msra.gmra.mxu1 %vm796_vm3, %v6889_v31 }
0x1582   : > { %v6890_v59 = vpop.trf.xlu2 }
0x1583   : > { %6682 = vmatmul.msk.bf16.vlgmr.msrb.gmra.mxu0 %vm796_vm3, %v6890_v59 }
0x1586   : > { %v6886_v14 = vpop.trf.xlu1 }
0x1587   : > { %v4339_v5 = vsel %vm800_vm1, %v6886_v14, 0 }
0x1588   : > { %4348 = vmatpush.bf16.msra.mxu2 %v4339_v5 }
0x158b   : > { %6683 = vmatmul.msk.bf16.vlgmr.msra.gmra.mxu2 %vm796_vm3, %v8176_v12  ;;  %6685 = vmatmul.msk.bf16.vlgmr.msrb.gmra.mxu1 %vm796_vm3, %v8206_v24 }
0x158e   : > { %v6887_v37 = vpop.trf.xlu1 }
0x158f   : > { %v4358_v9 = vsel %vm800_vm1, %v6887_v37, 0 }
0x1590   : > { %4367 = vmatpush.bf16.msra.mxu3 %v4358_v9 }
0x1593   : > { %6684 = vmatmul.msk.bf16.vlgmr.msra.gmra.mxu3 %vm796_vm3, %v8240_v27  ;;  %6686 = vmatmul.msk.bf16.vlgmr.msra.gmra.mxu0 %vm796_vm3, %v8227_v0 }
0x159c   : > { %v8328_v32 = vpop.permute.xlu2 %4877 }
0x159d   : > { %v4882_v52 = vunpack.c.l.b16 %v8328_v32 }
0x159f   : > { %v8331_v48 = vpack.c.b16 %v4882_v52, %v4882_v52 }
0x15a2   : > { %v8310_v45 = vpop.f32.mrf.mxu2 }
0x15a4   : > { %v4470_v56 = vpop.permute.xlu2 %4469 }
0x15a6   : > { %v8333_v57 = vpop.permute.xlu1 %4875 }
0x15aa   : > { %v3932_v19 = vpop.f32.mrf.mxu2 }
0x15ac   : > { %v4888_v25 = vpop.permute.xlu2 %4887 }
0x15ae   : > { %v4474_v55 = vpop.permute.xlu1 %4473 }
0x15b4   : > { %v4890_v34 = vpop.permute.xlu2 %4889 }
0x15ba   : > { %v8312_v15 = vpop.f32.mrf.mxu3 }
0x15bc   : > { %v4472_v31 = vpop.permute.xlu2 %4471 }
0x15c2   : > { %v3951_v10 = vpop.f32.mrf.mxu3 }
0x15f8   : > { %v8314_v12 = vpop.f32.mrf.mxu1 }
0x1600   : > { %v3970_v43 = vpop.f32.mrf.mxu1  ;;  %v8316_v24 = vpop.f32.mrf.mxu0 }
0x1601   : > { %v6931_v39 = vpack.i.bf16 %v8316_v24, %v8310_v45 }
0x1608   : > { %v3989_v50 = vpop.f32.mrf.mxu0  ;;  %v4388_v38 = vpop.f32.mrf.mxu1 }
0x1609   : > { %v4413_v27 = vmul.f32 0.35355338, %v4388_v38 }
0x160b   : > { %v4417_v2 = vadd.f32 %v4413_v27, %v7531_v1 }
0x160d   : > { %v4425_v0 = vsel %vm796_vm3, %v4417_v2, -inf }
0x160e   : > { %4426 = vmax.xlane.f32.xlu1 %v4425_v0  ;;  %v4350_v8 = vpop.f32.mrf.mxu2 }
0x160f   : > { %v4411_v29 = vmul.f32 0.35355338, %v4350_v8 }
0x1610   : > { %v4390_v21 = vpop.f32.mrf.mxu1  ;;  %v4407_v47 = vpop.f32.mrf.mxu0 }
0x1611   : > { %v4415_v23 = vadd.f32 %v4411_v29, %v7531_v1  ;;  %v4414_v53 = vmul.f32 0.35355338, %v4407_v47 }
0x1613   : > { %v4419_v40 = vsel %vm796_vm3, %v4415_v23, -inf  ;;  %v4418_v49 = vadd.f32 %v4414_v53, %v7531_v1 }
0x1614   : > { %4420 = vmax.xlane.f32.xlu0 %v4419_v40 }
0x1615   : > { %v4428_v36 = vsel %vm796_vm3, %v4418_v49, -inf }
0x1616   : > { %v4352_v41 = vpop.f32.mrf.mxu2  ;;  %v4369_v18 = vpop.f32.mrf.mxu3 }
0x1617   : > { %v4412_v46 = vmul.f32 0.35355338, %v4369_v18 }
0x1618   : > { %v4409_v58 = vpop.f32.mrf.mxu0 }
0x1619   : > { %v4416_v20 = vadd.f32 %v4412_v46, %v7531_v1  ;;  %v4881_v1 = vunpack.c.l.b16 %v8333_v57 }
0x161b   : > { %v4422_v26 = vsel %vm796_vm3, %v4416_v20, -inf  ;;  %v8338_v22 = vpack.c.b16 %v4881_v1, %v4881_v1 }
0x161c   : > { %4429 = vmax.xlane.f32.xlu0 %v4428_v36  ;;  %4423 = vmax.xlane.f32.xlu2 %v4422_v26 }
0x161e   : > { %v4371_v42 = vpop.f32.mrf.mxu3 }
0x1627   : > { %4893 = vrot.lane.b32.xlu1 %v8331_v48, %s7211_s22 }
0x1630   : > { %4891 = vrot.lane.b32.xlu0 %v8338_v22, %s7211_s22 }
0x1681   : > { %v4427_v17 = vpop.xlane.xlu1 %4426 }
0x1682   : > { %v4433_v6 = vsub.f32 %v4417_v2, %v4427_v17 }
0x1684   : > { %v4439_v35 = vmul.f32 1.442695, %v4433_v6 }
0x1686   : > { %7124 = vpow2.f32 %v4439_v35 }
0x1687   : > { %v4421_v59 = vpop.xlane.xlu0 %4420 }
0x1688   : > { %v4431_v14 = vsub.f32 %v4415_v23, %v4421_v59 }
0x168a   : > { %v4435_v5 = vmul.f32 1.442695, %v4431_v14 }
0x168c   : > { %v7125_v37 = vpop.eup %7124  ;;  %7126 = vpow2.f32 %v4435_v5 }
0x168d   : > { %v4449_v9 = vsel %vm796_vm3, %v7125_v37, 0.0 }
0x168e   : > { %4450 = vadd.xlane.f32.xlu2 %v4449_v9 }
0x168f   : > { %v4430_v19 = vpop.xlane.xlu0 %4429  ;;  %v4424_v10 = vpop.xlane.xlu2 %4423 }
0x1690   : > { %v4434_v43 = vsub.f32 %v4418_v49, %v4430_v19  ;;  %v4432_v27 = vsub.f32 %v4416_v20, %v4424_v10 }
0x1692   : > { %v7127_v50 = vpop.eup %7126  ;;  %v4441_v38 = vmul.f32 1.442695, %v4434_v43  ;;  %v4437_v2 = vmul.f32 1.442695, %v4432_v27 }
0x1693   : > { %v4443_v0 = vsel %vm796_vm3, %v7127_v50, 0.0 }
0x1694   : > { %7128 = vpow2.f32 %v4441_v38  ;;  %4444 = vadd.xlane.f32.xlu1 %v4443_v0 }
0x1695   : > { %7130 = vpow2.f32 %v4437_v2 }
0x1699   : > { %v4894_v23 = vpop.permute.xlu1 %4893 }
0x169a   : > { %v7129_v8 = vpop.eup %7128 }
0x169b   : > { %v4452_v29 = vsel %vm796_vm3, %v7129_v8, 0.0  ;;  %v7131_v21 = vpop.eup %7130 }
0x169c   : > { %4453 = vadd.xlane.f32.xlu0 %v4452_v29  ;;  %v4446_v47 = vsel %vm796_vm3, %v7131_v21, 0.0 }
0x16a2   : > { %v4892_v53 = vpop.permute.xlu0 %4891 }
0x16a4   : > { %4447 = vadd.xlane.f32.xlu0 %v4446_v47 }
0x16b7   : > { %6897 = vxpose.binary.xlu2.c.b16.start.end [1/2] (short) (narrow) %v4890_v34, %v4888_v25, 16  ;;  %v3610_v34 = vadd.f32 %v8236_v4, %v8134_v30 }
0x16b9   : > { %v8351_v6 = vpack.c.bf16 %v3610_v34, %v3610_v34 }
0x16cd   : > { %6894 = vxpose.binary.xlu0.c.b16.start.end [1/2] (short) (narrow) %v4470_v56, %v4468_v54, 16 }
0x16ce   : > { %6900 = vxpose.binary.xlu1.c.b16.start.end [1/2] (short) (narrow) %v4474_v55, %v4472_v31, 16 }
0x16dd   : > { %6903 = vxpose.binary.xlu0.c.b16.start.end [1/2] (short) (narrow) %v4894_v23, %v4892_v53, 16 }
0x1701   : > { %v4451_v40 = vpop.xlane.xlu2 %4450 }
0x1702   : > { %7132 = vrcp.f32 %v4451_v40 }
0x1707   : > { %v4445_v41 = vpop.xlane.xlu1 %4444 }
0x1708   : > { %v7133_v18 = vpop.eup %7132  ;;  %7134 = vrcp.f32 %v4445_v41 }
0x1709   : > { %v4461_v49 = vmul.f32 %v7133_v18, %v7125_v37 }
0x170b   : > { %v4465_v46 = vpack.c.bf16 %v4461_v49, %v4461_v49 }
0x170d   : > { %v4585_v58 = vsel %vm796_vm3, %v4465_v46, 0 }
0x170e   : > { %v7135_v20 = vpop.eup %7134  ;;  %4594 = vmatpush.bf16.xpose.msra.mxu1 %v4585_v58 }
0x170f   : > { %v4454_v36 = vpop.xlane.xlu0 %4453  ;;  %v4459_v26 = vmul.f32 %v7135_v20, %v7127_v50 }
0x1710   : > { %7136 = vrcp.f32 %v4454_v36 }
0x1711   : > { %v4463_v42 = vpack.c.bf16 %v4459_v26, %v4459_v26 }
0x1713   : > { %v4547_v52 = vsel %vm796_vm3, %v4463_v42, 0 }
0x1714   : > { %4556 = vmatpush.bf16.xpose.msrb.mxu2 %v4547_v52 }
0x1716   : > { %v7137_v1 = vpop.eup %7136 }
0x1717   : > { %v4448_v56 = vpop.xlane.xlu0 %4447  ;;  %v4462_v25 = vmul.f32 %v7137_v1, %v7129_v8 }
0x1718   : > { %7138 = vrcp.f32 %v4448_v56 }
0x1719   : > { %v4466_v55 = vpack.c.bf16 %v4462_v25, %v4462_v25 }
0x171b   : > { %v4604_v54 = vsel %vm796_vm3, %v4466_v55, 0 }
0x171c   : > { %4613 = vmatpush.bf16.xpose.msrb.mxu0 %v4604_v54 }
0x171e   : > { %v7139_v17 = vpop.eup %7138 }
0x171f   : > { %v4460_v35 = vmul.f32 %v7139_v17, %v7131_v21 }
0x1720   : > { %5501 = vrot.lane.b32.xlu2 %v8351_v6, %s7210_s21 }
0x1721   : > { %v4464_v31 = vpack.c.bf16 %v4460_v35, %v4460_v35 }
0x1723   : > { %v4566_v59 = vsel %vm796_vm3, %v4464_v31, 0 }
0x1724   : > { %4575 = vmatpush.bf16.xpose.msrb.mxu3 %v4566_v59 }
0x1728   : > { %5503 = vrot.lane.b32.xlu1 %v8351_v6, %s7209_s20  ;;  %5095 = vrot.lane.b32.xlu2 %v8285_v11, %s7212_s23 }
0x1730   : > { %5097 = vrot.lane.b32.xlu1 %v8292_v61, %s7212_s23 }
0x1738   : > { %5099 = vrot.lane.b32.xlu1 %v8338_v22, %s7212_s23 }
0x174b   : > { %5505 = vrot.lane.b32.xlu0 %v8351_v6, %s7208_s19  ;;  %s396_s19 = scalar_lea.vmem %s8849_s7, %s6610_s14 }
0x1753   : > { %5101 = vrot.lane.b32.xlu0 %v8331_v48, %s7212_s23 }
0x1758   : > { %v6898_v30 = vpop.trf.xlu2 }
0x1759   : > { %v4967_v4 = vsel %vm800_vm1, %v6898_v30, 0 }
0x175a   : > { %4976 = vmatpush.bf16.msra.mxu2 %v4967_v4 }
0x1760   : > { %v6899_v14 = vpop.trf.xlu2 }
0x1761   : > { %v4986_v5 = vsel %vm800_vm1, %v6899_v14, 0 }
0x1762   : > { %4995 = vmatpush.bf16.msra.mxu3 %v4986_v5 }
0x1779   : > { %v6895_v11 = vpop.trf.xlu0 }
0x177a   : > { %6687 = vmatmul.msk.bf16.vlgmr.msrb.gmra.mxu2 %vm796_vm3, %v6895_v11  ;;  %v6901_v61 = vpop.trf.xlu1  ;;  %v8402_v25 = vpop.permute.xlu2 %5501 }
0x177b   : > { %6689 = vmatmul.msk.bf16.vlgmr.msra.gmra.mxu1 %vm796_vm3, %v6901_v61  ;;  %v5508_v34 = vunpack.c.l.b16 %v8402_v25 }
0x177d   : > { %v8408_v17 = vpack.c.b16 %v5508_v34, %v5508_v34 }
0x1781   : > { %v6896_v22 = vpop.trf.xlu0 }
0x1782   : > { %6688 = vmatmul.msk.bf16.vlgmr.msrb.gmra.mxu3 %vm796_vm3, %v6896_v22  ;;  %v6902_v37 = vpop.trf.xlu1  ;;  %v5096_v4 = vpop.permute.xlu2 %5095 }
0x1783   : > { %6690 = vmatmul.msk.bf16.vlgmr.msrb.gmra.mxu0 %vm796_vm3, %v6902_v37 }
0x1789   : > { %v6904_v48 = vpop.trf.xlu0 }
0x178a   : > { %v5005_v9 = vsel %vm800_vm1, %v6904_v48, 0  ;;  %6691 = vmatmul.msk.bf16.vlgmr.msra.gmra.mxu2 %vm796_vm3, %v8256_v60 }
0x178b   : > { %5014 = vmatpush.bf16.msrb.mxu1 %v5005_v9 }
0x178e   : > { %6693 = vmatmul.msk.bf16.vlgmr.msrb.gmra.mxu1 %vm796_vm3, %v8333_v57 }
0x1791   : > { %v6905_v19 = vpop.trf.xlu0 }
0x1792   : > { %v5024_v10 = vsel %vm800_vm1, %v6905_v19, 0  ;;  %6692 = vmatmul.msk.bf16.vlgmr.msra.gmra.mxu3 %vm796_vm3, %v8287_v28 }
0x1793   : > { %5033 = vmatpush.bf16.msra.mxu0 %v5024_v10 }
0x1796   : > { %6694 = vmatmul.msk.bf16.vlgmr.msra.gmra.mxu0 %vm796_vm3, %v8328_v32 }
0x179a   : > { %v8404_v55 = vpop.permute.xlu1 %5503 }
0x179b   : > { %v5509_v54 = vunpack.c.l.b16 %v8404_v55 }
0x17a2   : > { %v5098_v35 = vpop.permute.xlu1 %5097 }
0x17aa   : > { %v5100_v59 = vpop.permute.xlu1 %5099 }
0x17bd   : > { %v8412_v31 = vpop.permute.xlu0 %5505 }
0x17c5   : > { %v5102_v30 = vpop.permute.xlu0 %5101 }
0x17f8   : > { %v8384_v43 = vpop.f32.mrf.mxu1 }
0x17fd   : > { %v8386_v50 = vpop.f32.mrf.mxu2 }
0x1800   : > { %v4598_v38 = vpop.f32.mrf.mxu1  ;;  %v8388_v60 = vpop.f32.mrf.mxu0 }
0x1801   : > { %v6938_v57 = vpack.i.bf16 %v8388_v60, %v8386_v50 }
0x1805   : > { %v4560_v27 = vpop.f32.mrf.mxu2  ;;  %v8392_v0 = vpop.f32.mrf.mxu3 }
0x1808   : > { %v4617_v2 = vpop.f32.mrf.mxu0 }
0x180b   : > { %v5016_v8 = vpop.f32.mrf.mxu1 }
0x180c   : > { %v5041_v28 = vmul.f32 0.35355338, %v5016_v8 }
0x180d   : > { %v4579_v29 = vpop.f32.mrf.mxu3  ;;  %v4978_v21 = vpop.f32.mrf.mxu2 }
0x180e   : > { %v5045_v32 = vadd.f32 %v5041_v28, %v7601_v44  ;;  %v5039_v47 = vmul.f32 0.35355338, %v4978_v21  ;;  %v5507_v29 = vunpack.c.l.b16 %v8351_v6 }
0x1810   : > { %v5043_v23 = vadd.f32 %v5039_v47, %v7601_v44  ;;  %v5053_v53 = vsel %vm796_vm3, %v5045_v32, -inf  ;;  %v5511_v21 = vpack.c.b16 %v5507_v29, %v5507_v29 }
0x1811   : > { %5054 = vmax.xlane.f32.xlu1 %v5053_v53 }
0x1812   : > { %v5047_v40 = vsel %vm796_vm3, %v5043_v23, -inf }
0x1813   : > { %5048 = vmax.xlane.f32.xlu2 %v5047_v40  ;;  %v5018_v41 = vpop.f32.mrf.mxu1  ;;  %v5035_v18 = vpop.f32.mrf.mxu0 }
0x1814   : > { %v5042_v49 = vmul.f32 0.35355338, %v5035_v18 }
0x1815   : > { %v4980_v46 = vpop.f32.mrf.mxu2  ;;  %v4997_v58 = vpop.f32.mrf.mxu3 }
0x1816   : > { %v5046_v20 = vadd.f32 %v5042_v49, %v7601_v44  ;;  %v5040_v36 = vmul.f32 0.35355338, %v4997_v58 }
0x1818   : > { %v5044_v26 = vadd.f32 %v5040_v36, %v7601_v44  ;;  %v5056_v42 = vsel %vm796_vm3, %v5046_v20, -inf  ;;  %v5513_v44 = vpack.c.b16 %v5509_v54, %v5509_v54 }
0x1819   : > { %5057 = vmax.xlane.f32.xlu1 %v5056_v42 }
0x181a   : > { %v5050_v52 = vsel %vm796_vm3, %v5044_v26, -inf }
0x181b   : > { %5051 = vmax.xlane.f32.xlu0 %v5050_v52  ;;  %v5037_v1 = vpop.f32.mrf.mxu0 }
0x181d   : > { %v4999_v56 = vpop.f32.mrf.mxu3 }
0x182f   : > { %5517 = vrot.lane.b32.xlu0 %v8408_v17, %s7211_s22 }
0x1832   : > { %5519 = vrot.lane.b32.xlu1 %v5513_v44, %s7211_s22 }
0x183c   : > { %6909 = vxpose.binary.xlu2.c.b16.start.end [1/2] (short) (narrow) %v5102_v30, %v5100_v59, 16 }
0x1884   : > { %v5055_v14 = vpop.xlane.xlu1 %5054 }
0x1885   : > { %v5061_v5 = vsub.f32 %v5045_v32, %v5055_v14  ;;  %v5510_v32 = vunpack.c.l.b16 %v8412_v31 }
0x1886   : > { %v5049_v11 = vpop.xlane.xlu2 %5048 }
0x1887   : > { %v5067_v61 = vmul.f32 1.442695, %v5061_v5  ;;  %v5059_v22 = vsub.f32 %v5043_v23, %v5049_v11  ;;  %v8421_v47 = vpack.c.b16 %v5510_v32, %v5510_v32 }
0x1889   : > { %7140 = vpow2.f32 %v5067_v61  ;;  %v5063_v37 = vmul.f32 1.442695, %v5059_v22 }
0x188b   : > { %7142 = vpow2.f32 %v5063_v37 }
0x188c   : > { %v5058_v48 = vpop.xlane.xlu1 %5057 }
0x188d   : > { %v5062_v9 = vsub.f32 %v5046_v20, %v5058_v48 }
0x188e   : > { %v5052_v23 = vpop.xlane.xlu0 %5051 }
0x188f   : > { %v7141_v19 = vpop.eup %7140  ;;  %v5069_v10 = vmul.f32 1.442695, %v5062_v9  ;;  %v5060_v53 = vsub.f32 %v5044_v26, %v5052_v23 }
0x1890   : > { %v5077_v38 = vsel %vm796_vm3, %v7141_v19, 0.0 }
0x1891   : > { %v7143_v27 = vpop.eup %7142  ;;  %7144 = vpow2.f32 %v5069_v10  ;;  %5078 = vadd.xlane.f32.xlu1 %v5077_v38  ;;  %v5065_v40 = vmul.f32 1.442695, %v5060_v53 }
0x1892   : > { %v5071_v2 = vsel %vm796_vm3, %v7143_v27, 0.0 }
0x1893   : > { %5072 = vadd.xlane.f32.xlu0 %v5071_v2  ;;  %7146 = vpow2.f32 %v5065_v40 }
0x1897   : > { %v7145_v8 = vpop.eup %7144 }
0x1898   : > { %v5080_v28 = vsel %vm796_vm3, %v7145_v8, 0.0 }
0x1899   : > { %5081 = vadd.xlane.f32.xlu1 %v5080_v28  ;;  %v7147_v41 = vpop.eup %7146 }
0x189a   : > { %v5074_v18 = vsel %vm796_vm3, %v7147_v41, 0.0 }
0x18a1   : > { %v5518_v20 = vpop.permute.xlu0 %5517 }
0x18a4   : > { %v5520_v58 = vpop.permute.xlu1 %5519 }
0x18a5   : > { %5515 = vrot.lane.b32.xlu2 %v5511_v21, %s7211_s22 }
0x18ad   : > { %5521 = vrot.lane.b32.xlu2 %v8421_v47, %s7211_s22 }
0x18b5   : > { %5727 = vrot.lane.b32.xlu2 %v5513_v44, %s7212_s23 }
0x18bc   : > { %6906 = vxpose.binary.xlu0.c.b16.start.end [1/2] (short) (narrow) %v5098_v35, %v5096_v4, 16 }
0x18dd   : > { %v6910_v49 = vpop.trf.xlu2 }
0x18de   : > { %5075 = vadd.xlane.f32.xlu2 %v5074_v18 }
0x18e5   : > { %v6911_v46 = vpop.trf.xlu2 }
0x18ff   : > { %v5516_v36 = vpop.permute.xlu2 %5515 }
0x1900   : > { %6912 = vxpose.binary.xlu1.c.b16.start.end [1/2] (short) (narrow) %v5518_v20, %v5516_v36, 16 }
0x1904   : > { %v5079_v42 = vpop.xlane.xlu1 %5078 }
0x1905   : > { %7148 = vrcp.f32 %v5079_v42 }
0x1906   : > { %v5073_v52 = vpop.xlane.xlu0 %5072 }
0x1907   : > { %7150 = vrcp.f32 %v5073_v52  ;;  %v5522_v1 = vpop.permute.xlu2 %5521 }
0x1908   : > { %6915 = vxpose.binary.xlu0.c.b16.start.end [1/2] (short) (narrow) %v5522_v1, %v5520_v58, 16 }
0x190b   : > { %v7149_v56 = vpop.eup %7148 }
0x190c   : > { %v5082_v26 = vpop.xlane.xlu1 %5081  ;;  %v5089_v34 = vmul.f32 %v7149_v56, %v7141_v19 }
0x190d   : > { %v7151_v54 = vpop.eup %7150  ;;  %7152 = vrcp.f32 %v5082_v26 }
0x190e   : > { %v5093_v44 = vpack.c.bf16 %v5089_v34, %v5089_v34  ;;  %v5087_v35 = vmul.f32 %v7151_v54, %v7143_v27 }
0x190f   : > { %v8432_v22 = vpop.permute.xlu2 %5727 }
0x1910   : > { %v5213_v59 = vsel %vm796_vm3, %v5093_v44, 0  ;;  %v5091_v30 = vpack.c.bf16 %v5087_v35, %v5087_v35 }
0x1911   : > { %5222 = vmatpush.bf16.xpose.msra.mxu1 %v5213_v59 }
0x1912   : > { %v5175_v4 = vsel %vm796_vm3, %v5091_v30, 0 }
0x1913   : > { %v7153_v14 = vpop.eup %7152  ;;  %5184 = vmatpush.bf16.xpose.msrb.mxu2 %v5175_v4 }
0x1914   : > { %v5090_v5 = vmul.f32 %v7153_v14, %v7145_v8 }
0x1916   : > { %v5094_v11 = vpack.c.bf16 %v5090_v5, %v5090_v5 }
0x1918   : > { %6697 = vmatmul.msk.bf16.vlgmr.msra.gmra.mxu1 %vm796_vm3, %v6910_v49  ;;  %v5232_v61 = vsel %vm796_vm3, %v5094_v11, 0 }
0x1919   : > { %5241 = vmatpush.bf16.xpose.msrb.mxu0 %v5232_v61 }
0x1920   : > { %6698 = vmatmul.msk.bf16.vlgmr.msrb.gmra.mxu0 %vm796_vm3, %v6911_v46 }
0x1951   : > { %v5076_v37 = vpop.xlane.xlu2 %5075 }
0x1952   : > { %7154 = vrcp.f32 %v5076_v37 }
0x1958   : > { %v7155_v48 = vpop.eup %7154 }
0x1959   : > { %v5088_v9 = vmul.f32 %v7155_v48, %v7147_v41 }
0x195a   : > { %5725 = vrot.lane.b32.xlu1 %v8408_v17, %s7212_s23 }
0x195b   : > { %v5092_v19 = vpack.c.bf16 %v5088_v9, %v5088_v9 }
0x195d   : > { %v5194_v10 = vsel %vm796_vm3, %v5092_v19, 0 }
0x195e   : > { %5203 = vmatpush.bf16.xpose.msrb.mxu3 %v5194_v10 }
0x1968   : > { %v6907_v38 = vpop.trf.xlu0 }
0x1969   : > { %6695 = vmatmul.msk.bf16.vlgmr.msrb.gmra.mxu2 %vm796_vm3, %v6907_v38 }
0x1970   : > { %v6908_v27 = vpop.trf.xlu0 }
0x1971   : > { %6696 = vmatmul.msk.bf16.vlgmr.msrb.gmra.mxu3 %vm796_vm3, %v6908_v27 }
0x1976   : > { %5723 = vrot.lane.b32.xlu0 %v5511_v21, %s7212_s23 }
0x1995   : > { %v8440_v2 = vpop.f32.mrf.mxu1 }
0x199d   : > { %v5226_v8 = vpop.f32.mrf.mxu1  ;;  %v8442_v28 = vpop.f32.mrf.mxu0 }
0x19a5   : > { %v5245_v29 = vpop.f32.mrf.mxu0 }
0x19ac   : > { %v6913_v32 = vpop.trf.xlu1 }
0x19ad   : > { %v5595_v17 = vsel %vm800_vm1, %v6913_v32, 0 }
0x19ae   : > { %5604 = vmatpush.bf16.msra.mxu2 %v5595_v17 }
0x19b1   : > { %6699 = vmatmul.msk.bf16.vlgmr.msra.gmra.mxu2 %vm796_vm3, %v8351_v6 }
0x19b4   : > { %v6916_v23 = vpop.trf.xlu0  ;;  %v6914_v53 = vpop.trf.xlu1 }
0x19b5   : > { %v5633_v21 = vsel %vm800_vm1, %v6916_v23, 0  ;;  %v5614_v40 = vsel %vm800_vm1, %v6914_v53, 0 }
0x19b6   : > { %5623 = vmatpush.bf16.msra.mxu3 %v5614_v40  ;;  %5642 = vmatpush.bf16.msrb.mxu1 %v5633_v21 }
0x19b9   : > { %6700 = vmatmul.msk.bf16.vlgmr.msra.gmra.mxu3 %vm796_vm3, %v8402_v25  ;;  %6701 = vmatmul.msk.bf16.vlgmr.msrb.gmra.mxu1 %vm796_vm3, %v8404_v55 }
0x19bc   : > { %v6917_v41 = vpop.trf.xlu0 }
0x19bd   : > { %v5652_v18 = vsel %vm800_vm1, %v6917_v41, 0  ;;  %v6924_v41 = vpack.i.bf16 %v8384_v43, %v8314_v12 }
0x19be   : > { %5661 = vmatpush.bf16.msra.mxu0 %v5652_v18  ;;  %v6945_v18 = vpack.i.bf16 %v8392_v0, %v8312_v15 }
0x19c1   : > { %6702 = vmatmul.msk.bf16.vlgmr.msra.gmra.mxu0 %vm796_vm3, %v8412_v31 }
0x19cc   : > { %v5726_v61 = vpop.permute.xlu1 %5725 }
0x19e8   : > { %v5724_v21 = vpop.permute.xlu0 %5723 }
0x19ec   : > { %v8456_v6 = vpop.f32.mrf.mxu2 }
0x19f4   : > { %v5188_v49 = vpop.f32.mrf.mxu2  ;;  %v8458_v46 = vpop.f32.mrf.mxu3 }
0x19fc   : > { %v5207_v58 = vpop.f32.mrf.mxu3 }
0x1a34   : > { %v5606_v20 = vpop.f32.mrf.mxu2 }
0x1a35   : > { %v5667_v36 = vmul.f32 0.35355338, %v5606_v20 }
0x1a36   : > { %v5644_v42 = vpop.f32.mrf.mxu1 }
0x1a37   : > { %v5671_v25 = vadd.f32 %v5667_v36, %v7744_v62  ;;  %v5669_v52 = vmul.f32 0.35355338, %v5644_v42 }
0x1a39   : > { %v5673_v55 = vadd.f32 %v5669_v52, %v7744_v62  ;;  %v5675_v1 = vsel %vm796_vm3, %v5671_v25, -inf }
0x1a3a   : > { %5676 = vmax.xlane.f32.xlu2 %v5675_v1 }
0x1a3b   : > { %v5681_v56 = vsel %vm796_vm3, %v5673_v55, -inf }
0x1a3c   : > { %5682 = vmax.xlane.f32.xlu1 %v5681_v56  ;;  %v5608_v31 = vpop.f32.mrf.mxu2  ;;  %v5625_v26 = vpop.f32.mrf.mxu3 }
0x1a3d   : > { %v5668_v34 = vmul.f32 0.35355338, %v5625_v26 }
0x1a3e   : > { %v5646_v54 = vpop.f32.mrf.mxu1  ;;  %v5663_v44 = vpop.f32.mrf.mxu0 }
0x1a3f   : > { %v8465_v35 = vadd.f32 %v5668_v34, %v7744_v62  ;;  %v5670_v59 = vmul.f32 0.35355338, %v5663_v44 }
0x1a41   : > { %v5674_v30 = vadd.f32 %v5670_v59, %v7744_v62  ;;  %v5678_v4 = vsel %vm796_vm3, %v8465_v35, -inf }
0x1a42   : > { %5679 = vmax.xlane.f32.xlu0 %v5678_v4 }
0x1a43   : > { %v5684_v14 = vsel %vm796_vm3, %v5674_v30, -inf }
0x1a44   : > { %5685 = vmax.xlane.f32.xlu2 %v5684_v14  ;;  %v5627_v5 = vpop.f32.mrf.mxu3 }
0x1a46   : > { %v5665_v11 = vpop.f32.mrf.mxu0 }
0x1a55   : > { %5729 = vrot.lane.b32.xlu1 %v8421_v47, %s7212_s23 }
0x1aad   : > { %v5677_v37 = vpop.xlane.xlu2 %5676 }
0x1aae   : > { %v5687_v48 = vsub.f32 %v5671_v25, %v5677_v37 }
0x1aaf   : > { %v5683_v9 = vpop.xlane.xlu1 %5682 }
0x1ab0   : > { %v5691_v19 = vmul.f32 1.442695, %v5687_v48  ;;  %v5689_v10 = vsub.f32 %v5673_v55, %v5683_v9 }
0x1ab2   : > { %7156 = vpow2.f32 %v5691_v19  ;;  %v5695_v62 = vmul.f32 1.442695, %v5689_v10 }
0x1ab4   : > { %7158 = vpow2.f32 %v5695_v62 }
0x1ab5   : > { %v5680_v49 = vpop.xlane.xlu0 %5679 }
0x1ab6   : > { %v5688_v1 = vsub.f32 %v8465_v35, %v5680_v49 }
0x1ab7   : > { %v5686_v38 = vpop.xlane.xlu2 %5685 }
0x1ab8   : > { %v7157_v27 = vpop.eup %7156  ;;  %v5690_v8 = vsub.f32 %v5674_v30, %v5686_v38  ;;  %v5693_v56 = vmul.f32 1.442695, %v5688_v1 }
0x1ab9   : > { %v5699_v29 = vsel %vm796_vm3, %v7157_v27, 0.0 }
0x1aba   : > { %v7159_v32 = vpop.eup %7158  ;;  %v5697_v17 = vmul.f32 1.442695, %v5690_v8  ;;  %5700 = vadd.xlane.f32.xlu2 %v5699_v29 }
0x1abb   : > { %v5705_v23 = vsel %vm796_vm3, %v7159_v32, 0.0 }
0x1abc   : > { %7160 = vpow2.f32 %v5697_v17  ;;  %5706 = vadd.xlane.f32.xlu0 %v5705_v23 }
0x1ac2   : > { %v7161_v47 = vpop.eup %7160 }
0x1ac3   : > { %v5708_v53 = vsel %vm796_vm3, %v7161_v47, 0.0 }
0x1ac4   : > { %5709 = vadd.xlane.f32.xlu1 %v5708_v53 }
0x1ac7   : > { %v5730_v40 = vpop.permute.xlu1 %5729 }
0x1ae3   : > { %6918 = vxpose.binary.xlu2.c.b16.start.end [1/2] (short) (narrow) %v5726_v61, %v5724_v21, 16 }
0x1ae5   : > { %6921 = vxpose.binary.xlu0.c.b16.start.end [1/2] (short) (narrow) %v5730_v40, %v8432_v22, 16 }
0x1af3   : > { %6925 = vxpose.xlu2.b32.start.end [1/1] (short) (narrow) %v6924_v41, 8 }
0x1af5   : > { %6946 = vxpose.xlu0.b32.start.end [1/1] (short) (narrow) %v6945_v18, 8 }
0x1afe   : > { %6932 = vxpose.xlu1.b32.start.end [1/1] (short) (narrow) %v6931_v39, 8 }
0x1b2d   : > { %v5701_v58 = vpop.xlane.xlu2 %5700 }
0x1b2e   : > { %7162 = vrcp.f32 %v5701_v58 }
0x1b2f   : > { %v5707_v20 = vpop.xlane.xlu0 %5706 }
0x1b30   : > { %7164 = vrcp.f32 %v5707_v20 }
0x1b34   : > { %v7163_v36 = vpop.eup %7162 }
0x1b35   : > { %v5715_v42 = vmul.f32 %v7163_v36, %v7157_v27 }
0x1b36   : > { %v7165_v22 = vpop.eup %7164 }
0x1b37   : > { %v5710_v25 = vpop.xlane.xlu1 %5709  ;;  %v5719_v52 = vpack.c.bf16 %v5715_v42, %v5715_v42  ;;  %v5717_v12 = vmul.f32 %v7165_v22, %v7159_v32 }
0x1b38   : > { %7166 = vrcp.f32 %v5710_v25 }
0x1b39   : > { %v5803_v15 = vsel %vm796_vm3, %v5719_v52, 0  ;;  %v5721_v43 = vpack.c.bf16 %v5717_v12, %v5717_v12  ;;  %7168 = vpow2.f32 %v5693_v56 }
0x1b3a   : > { %5812 = vmatpush.bf16.xpose.msrb.mxu2 %v5803_v15 }
0x1b3b   : > { %v5841_v0 = vsel %vm796_vm3, %v5721_v43, 0 }
0x1b3c   : > { %5850 = vmatpush.bf16.xpose.msra.mxu1 %v5841_v0 }
0x1b3e   : > { %v7167_v45 = vpop.eup %7166 }
0x1b3f   : > { %v5718_v24 = vmul.f32 %v7167_v45, %v7161_v47  ;;  %v8488_v31 = vpop.eup %7168 }
0x1b40   : > { %v5702_v26 = vsel %vm796_vm3, %v8488_v31, 0.0 }
0x1b41   : > { %v5722_v39 = vpack.c.bf16 %v5718_v24, %v5718_v24 }
0x1b43   : > { %v5860_v55 = vsel %vm796_vm3, %v5722_v39, 0 }
0x1b44   : > { %5869 = vmatpush.bf16.xpose.msrb.mxu0 %v5860_v55 }
0x1b64   : > { %5703 = vadd.xlane.f32.xlu2 %v5702_v26 }
0x1b84   : > { %v6919_v34 = vpop.trf.xlu2 }
0x1b85   : > { %6703 = vmatmul.msk.bf16.vlgmr.msrb.gmra.mxu2 %vm796_vm3, %v6919_v34 }
0x1b8c   : > { %v8493_v54 = vpop.trf.xlu2 }
0x1b8d   : > { %6939 = vxpose.xlu2.b32.start.end [1/1] (short) (narrow) %v6938_v57, 8 }
0x1b91   : > { %v6922_v44 = vpop.trf.xlu0 }
0x1b92   : > { %6705 = vmatmul.msk.bf16.vlgmr.msra.gmra.mxu1 %vm796_vm3, %v6922_v44 }
0x1b94   : > { %v8499_v35 = vpop.trf.xlu2 }
0x1b95   : > { %v6927_v30 = vunpack.i.l.bf16 %v8499_v35 }
0x1b97   : > { %v4119_v4 = vrot.slane %v6927_v30, 4 }
0x1b99   : > { %v6923_v59 = vpop.trf.xlu0 }
0x1b9a   : > { %6706 = vmatmul.msk.bf16.vlgmr.msrb.gmra.mxu0 %vm796_vm3, %v6923_v59 }
0x1ba1   : > { %v8503_v61 = vpop.trf.xlu0 }
0x1ba2   : > { %v6933_v14 = vpop.trf.xlu1  ;;  %v6948_v48 = vunpack.i.l.bf16 %v8503_v61 }
0x1ba3   : > { %v6937_v5 = vunpack.i.h.bf16 %v6933_v14  ;;  %v6934_v11 = vunpack.i.l.bf16 %v6933_v14 }
0x1ba4   : > { %v4133_v38 = vrot.slane %v6948_v48, 4 }
0x1ba5   : > { %v4131_v37 = vrot.slane %v6937_v5, 4  ;;  %v4120_v50 = vsel %vm1212_vm11, %v4119_v4, %v6934_v11  ;;  %v4121_v60 = vrot.slane %v6934_v11, 4 }
0x1ba6   : > { %v4126_v57 = vperm.slane %v4120_v50, %v7714_v33  ;;  %v4134_v29 = vsel %vm1212_vm11, %v6937_v5, %v4133_v38  ;;  %v6930_v38 = vunpack.i.h.bf16 %v8499_v35 }
0x1ba7   : > { %v4122_v9 = vsel %vm1212_vm11, %v6927_v30, %v4121_v60  ;;  %v4132_v62 = vsel %vm1212_vm11, %v4131_v37, %v6948_v48  ;;  %v4142_v32 = vperm.slane %v4134_v29, %v7714_v33 }
0x1ba8   : > { %v4130_v19 = vperm.slane %v4122_v9, %v7714_v33  ;;  %v4145_v10 = vrot.slane %v4126_v57, 4  ;;  %v4138_v27 = vperm.slane %v4132_v62, %v7714_v33  ;;  %v6951_v62 = vunpack.i.h.bf16 %v8503_v61 }
0x1ba9   : > { %v4155_v21 = vrot.slane %v4142_v32, 4 }
0x1baa   : > { %v4157_v8 = vrot.slane %v4130_v19, 4  ;;  %v4143_v17 = vrot.slane %v4138_v27, 4  ;;  %v4146_v23 = vsel %vm1212_vm11, %v4138_v27, %v4145_v10 }
0x1bab   : > { %v4154_v47 = vperm.slane %v4146_v23, %v7725_v16  ;;  %v4156_v58 = vsel %vm1212_vm11, %v4155_v21, %v4130_v19 }
0x1bac   : > { %v4144_v53 = vsel %vm1212_vm11, %v4143_v17, %v4126_v57  ;;  %v4158_v40 = vsel %vm1212_vm11, %v4142_v32, %v4157_v8  ;;  %v4162_v20 = vperm.slane %v4156_v58, %v7725_v16  ;;  %v4761_v8 = vrot.slane %v6951_v62, 4 }
0x1bad   : > { %v4150_v41 = vperm.slane %v4144_v53, %v7725_v16  ;;  %v4166_v18 = vperm.slane %v4158_v40, %v7725_v16  ;;  %v4169_v49 = vrot.slane %v4154_v47, 4 }
0x1bae   : > { %v4171_v12 = vrot.slane %v4162_v20, 4 }
0x1baf   : > { %v4167_v36 = vrot.slane %v4150_v41, 4  ;;  %v4170_v42 = vsel %vm1212_vm11, 0.0, %v4169_v49  ;;  %v4173_v22 = vrot.slane %v4166_v18, 4  ;;  %v4175_v43 = vsel %vm1212_vm11, %v4169_v49, %v4150_v41 }
0x1bb0   : > { %v4180_v25 = vrot.slane %v4170_v42, 4  ;;  %v4172_v24 = vsel %vm1212_vm11, 0.0, %v4171_v12  ;;  %v4179_v1 = vperm.slane %v4175_v43, %v7714_v33 }
0x1bb1   : > { %v4168_v52 = vsel %vm1212_vm11, 0.0, %v4167_v36  ;;  %v4174_v15 = vsel %vm1212_vm11, 0.0, %v4173_v22  ;;  %v4186_v56 = vsel %vm1212_vm11, %v4173_v22, %v4162_v20 }
0x1bb2   : > { %v4191_v0 = vrot.slane %v4174_v15, 4  ;;  %v4181_v45 = vsel %vm1212_vm11, %v4180_v25, %v4168_v52  ;;  %v8536_v44 = vperm.slane %v4186_v56, %v7714_v33  ;;  %v4199_v18 = vrot.slane %v4179_v1, 4 }
0x1bb3   : > { %v4185_v39 = vperm.slane %v4181_v45, %v7714_v33 }
0x1bb4   : > { %v4192_v55 = vsel %vm1212_vm11, %v4191_v0, %v4172_v24 }
0x1bb5   : > { %v8533_v26 = vperm.slane %v4192_v55, %v7714_v33  ;;  %v4197_v34 = vrot.slane %v4185_v39, 4  ;;  %v4200_v55 = vsel %vm1212_vm11, %v4185_v39, %v4199_v18 }
0x1bb7   : > { %v4209_v59 = vrot.slane %v8533_v26, 4  ;;  %v4198_v30 = vsel %vm1212_vm11, %v4197_v34, %v4179_v1 }
0x1bb8   : > { %v8546_v5 = vperm.slane %v4198_v30, %v7725_v16 }
0x1bb9   : > { %v4210_v4 = vsel %vm1212_vm11, %v4209_v59, %v8536_v44  ;;  %v4211_v59 = vrot.slane %v8536_v44, 4 }
0x1bba   : > { %v8543_v14 = vperm.slane %v4210_v4, %v7725_v16  ;;  %v4223_v18 = vrot.slane %v8546_v5, 4 }
0x1bbc   : > { %v4221_v11 = vrot.slane %v8543_v14, 4 }
0x1bbe   : > { %v8551_v37 = vsel %vm1212_vm11, %v4221_v11, %v8546_v5 }
0x1bd7   : > { %v5704_v50 = vpop.xlane.xlu2 %5703 }
0x1bd8   : > { %7170 = vrcp.f32 %v5704_v50 }
0x1bde   : > { %v7171_v60 = vpop.eup %7170 }
0x1bdf   : > { %v5716_v57 = vmul.f32 %v7171_v60, %v8488_v31  ;;  %v4747_v31 = vrot.slane %v6930_v38, 4 }
0x1be1   : > { %v5720_v48 = vpack.c.bf16 %v5716_v57, %v5716_v57 }
0x1be3   : > { %v5822_v9 = vsel %vm796_vm3, %v5720_v48, 0 }
0x1be4   : > { %5831 = vmatpush.bf16.xpose.msrb.mxu3 %v5822_v9  ;;  %v4208_v9 = vperm.slane %v4200_v55, %v7725_v16 }
0x1beb   : > { %6704 = vmatmul.msk.bf16.vlgmr.msrb.gmra.mxu3 %vm796_vm3, %v8493_v54 }
0x1c08   : > { %v8561_v27 = vpop.f32.mrf.mxu2 }
0x1c0f   : > { %v8557_v19 = vpop.f32.mrf.mxu1 }
0x1c10   : > { %v5816_v49 = vpop.f32.mrf.mxu2 }
0x1c17   : > { %v5854_v10 = vpop.f32.mrf.mxu1  ;;  %v8563_v29 = vpop.f32.mrf.mxu0 }
0x1c1f   : > { %v5873_v22 = vpop.f32.mrf.mxu0 }
0x1c26   : > { %v6940_v32 = vpop.trf.xlu2 }
0x1c27   : > { %v6944_v17 = vunpack.i.h.bf16 %v6940_v32  ;;  %v6941_v23 = vunpack.i.l.bf16 %v6940_v32 }
0x1c29   : > { %v4759_v47 = vrot.slane %v6944_v17, 4  ;;  %v4748_v53 = vsel %vm1212_vm11, %v4747_v31, %v6941_v23  ;;  %v4749_v54 = vrot.slane %v6941_v23, 4  ;;  %v4762_v21 = vsel %vm1212_vm11, %v6944_v17, %v4761_v8 }
0x1c2a   : > { %v4754_v40 = vperm.slane %v4748_v53, %v7714_v33  ;;  %v4770_v61 = vperm.slane %v4762_v21, %v7714_v33  ;;  %v4227_v21 = vrot.slane %v4208_v9, 4 }
0x1c2b   : > { %v4750_v35 = vsel %vm1212_vm11, %v6930_v38, %v4749_v54  ;;  %v4760_v41 = vsel %vm1212_vm11, %v4759_v47, %v6951_v62  ;;  %v4212_v62 = vsel %vm1212_vm11, %v8533_v26, %v4211_v59 }
0x1c2c   : > { %v4758_v58 = vperm.slane %v4750_v35, %v7714_v33  ;;  %v4766_v20 = vperm.slane %v4760_v41, %v7714_v33  ;;  %v4773_v36 = vrot.slane %v4754_v40, 4  ;;  %v4783_v42 = vrot.slane %v4770_v61, 4 }
0x1c2d   : > { %v4220_v47 = vperm.slane %v4212_v62, %v7725_v16 }
0x1c2e   : > { %v4771_v25 = vrot.slane %v4766_v20, 4  ;;  %v4774_v52 = vsel %vm1212_vm11, %v4766_v20, %v4773_v36  ;;  %v4784_v12 = vsel %vm1212_vm11, %v4783_v42, %v4758_v58  ;;  %v4785_v15 = vrot.slane %v4758_v58, 4 }
0x1c2f   : > { %v4782_v43 = vperm.slane %v4774_v52, %v7725_v16  ;;  %v4790_v0 = vperm.slane %v4784_v12, %v7725_v16  ;;  %v4225_v42 = vrot.slane %v4220_v47, 4 }
0x1c30   : > { %v4772_v45 = vsel %vm1212_vm11, %v4771_v25, %v4754_v40  ;;  %v4786_v24 = vsel %vm1212_vm11, %v4770_v61, %v4785_v15  ;;  %v4228_v25 = vsel %vm1212_vm11, %v4220_v47, %v4227_v21 }
0x1c31   : > { %v4778_v1 = vperm.slane %v4772_v45, %v7725_v16  ;;  %v4794_v56 = vperm.slane %v4786_v24, %v7725_v16  ;;  %v4797_v34 = vrot.slane %v4782_v43, 4  ;;  %v4799_v30 = vrot.slane %v4790_v0, 4 }
0x1c32   : > { %v4224_v45 = vsel %vm1212_vm11, %v8543_v14, %v4223_v18  ;;  %v4226_v24 = vsel %vm1212_vm11, %v4225_v42, %v4208_v9  ;;  %v6981_v14 = vpack.i.bf16 %v8563_v29, %v8561_v27  ;;  %v6660_v9 = vld [vmem:[%s7875_s8 + $0x38] sm:$0xff]  ;;  %v6658_v27 = vld [vmem:[%s7875_s8 + $0x28] sm:$0xff] }
0x1c33   : > { %v4795_v4 = vrot.slane %v4778_v1, 4  ;;  %v4798_v11 = vsel %vm1212_vm11, 0.0, %v4797_v34  ;;  %v4801_v50 = vrot.slane %v4794_v56, 4  ;;  %v4803_v60 = vsel %vm1212_vm11, %v4797_v34, %v4778_v1 }
0x1c34   : > { %v4807_v57 = vperm.slane %v4803_v60, %v7714_v33  ;;  %v4808_v48 = vrot.slane %v4798_v11, 4  ;;  %v4800_v17 = vsel %vm1212_vm11, 0.0, %v4799_v30 }
0x1c35   : > { %v4796_v39 = vsel %vm1212_vm11, 0.0, %v4795_v4  ;;  %v4802_v10 = vsel %vm1212_vm11, 0.0, %v4801_v50  ;;  %v4814_v44 = vsel %vm1212_vm11, %v4801_v50, %v4790_v0  ;;  %v6962_v4 = vpack.i.bf16 %v8442_v28, %v8456_v6 }
0x1c36   : > { %v4819_v38 = vrot.slane %v4802_v10, 4  ;;  %v4809_v8 = vsel %vm1212_vm11, %v4808_v48, %v4796_v39  ;;  %v4818_v31 = vperm.slane %v4814_v44, %v7714_v33  ;;  %v4827_v32 = vrot.slane %v4807_v57, 4  ;;  %v6659_v48 = vld [vmem:[%s7875_s8 + $0x30] sm:$0xff]  ;;  %v6657_v10 = vld [vmem:[%s7875_s8 + $0x20] sm:$0xff] }
0x1c37   : > { %v4813_v23 = vperm.slane %v4809_v8, %v7714_v33  ;;  %v6974_v50 = vpack.i.bf16 %v8557_v19, %v8440_v2  ;;  %v3563_v39 = vpack.c.bf16 %v6660_v9, %v6659_v48  ;;  %v3562_v29 = vpack.c.bf16 %v6658_v27, %v6657_v10 }
0x1c38   : > { %v4820_v53 = vsel %vm1212_vm11, %v4819_v38, %v4800_v17  ;;  %v4839_v54 = vrot.slane %v4818_v31, 4 }
0x1c39   : > { %v4824_v26 = vperm.slane %v4820_v53, %v7714_v33  ;;  %v4828_v40 = vsel %vm1212_vm11, %v4813_v23, %v4827_v32  ;;  %v4825_v61 = vrot.slane %v4813_v23, 4  ;;  %6143 = vmatpush.bf16.msra.mxu2 %v3563_v39 }
0x1c3a   : > { %v4836_v35 = vperm.slane %v4828_v40, %v7725_v16 }
0x1c3b   : > { %v4840_v41 = vsel %vm1212_vm11, %v4824_v26, %v4839_v54  ;;  %v4826_v49 = vsel %vm1212_vm11, %v4825_v61, %v4807_v57  ;;  %v4837_v58 = vrot.slane %v4824_v26, 4 }
0x1c3c   : > { %v4848_v20 = vperm.slane %v4840_v41, %v7725_v16  ;;  %v4855_v36 = vrot.slane %v4836_v35, 4  ;;  %v4832_v22 = vperm.slane %v4826_v49, %v7725_v16 }
0x1c3d   : > { %v4838_v52 = vsel %vm1212_vm11, %v4837_v58, %v4818_v31  ;;  %6144 = vmatpush.bf16.msra.mxu2 %v3562_v29 }
0x1c3e   : > { %v4856_v12 = vsel %vm1212_vm11, %v4848_v20, %v4855_v36  ;;  %v4853_v15 = vrot.slane %v4848_v20, 4  ;;  %v4844_v43 = vperm.slane %v4838_v52, %v7725_v16  ;;  %v4851_v0 = vrot.slane %v4832_v22, 4 }
0x1c3f   : > { %v6969_v5 = vpack.i.bf16 %v4856_v12, %v4228_v25 }
0x1c40   : > { %v4854_v55 = vsel %vm1212_vm11, %v4853_v15, %v4836_v35  ;;  %v4852_v1 = vsel %vm1212_vm11, %v4844_v43, %v4851_v0  ;;  %v4849_v56 = vrot.slane %v4844_v43, 4 }
0x1c41   : > { %6970 = vrot.lane.b32.xlu1 %v6969_v5, %s7215_s26  ;;  %v6957_v34 = vpack.i.bf16 %v4854_v55, %v4226_v24  ;;  %v6952_v59 = vpack.i.bf16 %v4852_v1, %v4224_v45 }
0x1c42   : > { %v4850_v30 = vsel %vm1212_vm11, %v4849_v56, %v4832_v22 }
0x1c43   : > { %6958 = vrot.lane.b32.xlu2 %v6957_v34, %s7217_s28  ;;  %6953 = vrot.lane.b32.xlu0 %v6952_v59, %s7216_s27 }
0x1c65   : > { %6982 = vxpose.xlu0.b32.start.end [1/1] (short) (narrow) %v6981_v14, 8 }
0x1c69   : > { %6963 = vxpose.xlu2.b32.start.end [1/1] (short) (narrow) %v6962_v4, 8 }
0x1c6e   : > { %v5833_v11 = vpop.f32.mrf.mxu3 }
0x1c6f   : > { %v6988_v57 = vpack.i.bf16 %v5833_v11, %v8458_v46 }
0x1c71   : > { %6975 = vxpose.xlu2.b32.start.end [1/1] (short) (narrow) %v6974_v50, 8 }
0x1c76   : > { %v5835_v60 = vpop.f32.mrf.mxu3 }
0x1c79   : > { %6989 = vxpose.xlu2.b32.start.end [1/1] (short) (narrow) %v6988_v57, 8 }
0x1c9d   : > { %v6959_v62 = vpop.permute.xlu2 %6958 }
0x1c9e   : > { %v6961_v8 = vunpack.i.h.bf16 %v6959_v62  ;;  %v6960_v2 = vunpack.i.l.bf16 %v6959_v62 }
0x1cb3   : > { %v6971_v28 = vpop.permute.xlu1 %6970 }
0x1cb4   : > { %v6973_v19 = vunpack.i.h.bf16 %v6971_v28  ;;  %v6972_v31 = vunpack.i.l.bf16 %v6971_v28 }
0x1cb5   : > { %v6954_v6 = vpop.permute.xlu0 %6953 }
0x1cb6   : > { %v6956_v44 = vunpack.i.h.bf16 %v6954_v6  ;;  %v6955_v38 = vunpack.i.l.bf16 %v6954_v6 }
0x1cb8   : > { %v4869_v46 = vsel %vm796_vm3, %v4850_v30, %v6956_v44  ;;  %v4241_v32 = vsel %vm796_vm3, %v8551_v37, %v6955_v38 }
0x1cb9   : > { %v4870_v17 = vsel %vm1335_vm12, %v4869_v46, %v6961_v8  ;;  %v4242_v23 = vsel %vm1335_vm12, %v4241_v32, %v6960_v2 }
0x1cba   : > { %v4871_v47 = vsel %vm1337_vm13, %v4870_v17, %v6973_v19  ;;  %v4243_v53 = vsel %vm1337_vm13, %v4242_v23, %v6972_v31 }
0x1cbb   : > { %v6128_v54 = vpack.c.bf16 %v4871_v47, %v4243_v53 }
0x1cbd   : > { %6707 = vmatmul.msk.bf16.vlgmr.msra.gmra.mxu2 %vm535_vm4, %v6128_v54 }
0x1d02   : > { %v6964_v21 = vpop.trf.xlu2 }
0x1d03   : > { %v6965_v26 = vunpack.i.l.bf16 %v6964_v21  ;;  %v6968_v42 = vunpack.i.h.bf16 %v6964_v21 }
0x1d05   : > { %v5377_v49 = vrot.slane %v6965_v26, 4  ;;  %v5387_v43 = vrot.slane %v6968_v42, 4 }
0x1d09   : > { %v6983_v40 = vpop.trf.xlu0 }
0x1d0a   : > { %v6976_v61 = vpop.trf.xlu2  ;;  %v6984_v35 = vunpack.i.l.bf16 %v6983_v40  ;;  %v6987_v20 = vunpack.i.h.bf16 %v6983_v40 }
0x1d0b   : > { %v6980_v41 = vunpack.i.h.bf16 %v6976_v61  ;;  %v6977_v18 = vunpack.i.l.bf16 %v6976_v61 }
0x1d0c   : > { %v6005_v36 = vrot.slane %v6984_v35, 4  ;;  %v6015_v12 = vrot.slane %v6987_v20, 4 }
0x1d0d   : > { %v6003_v37 = vrot.slane %v6980_v41, 4  ;;  %v5375_v58 = vrot.slane %v6977_v18, 4  ;;  %v5378_v25 = vsel %vm1212_vm11, %v6977_v18, %v5377_v49 }
0x1d0e   : > { %v6006_v15 = vsel %vm1212_vm11, %v6980_v41, %v6005_v36  ;;  %v5386_v5 = vperm.slane %v5378_v25, %v7714_v33 }
0x1d0f   : > { %v5376_v22 = vsel %vm1212_vm11, %v5375_v58, %v6965_v26  ;;  %v6004_v52 = vsel %vm1212_vm11, %v6003_v37, %v6984_v35  ;;  %v6014_v56 = vperm.slane %v6006_v15, %v7714_v33 }
0x1d10   : > { %v5382_v0 = vperm.slane %v5376_v22, %v7714_v33  ;;  %v6010_v45 = vperm.slane %v6004_v52, %v7714_v33  ;;  %v5413_v60 = vrot.slane %v5386_v5, 4 }
0x1d11   : > { %v6041_v62 = vrot.slane %v6014_v56, 4 }
0x1d12   : > { %v6990_v24 = vpop.trf.xlu2  ;;  %v5401_v4 = vrot.slane %v5382_v0, 4  ;;  %v6029_v57 = vrot.slane %v6010_v45, 4 }
0x1d13   : > { %v6994_v55 = vunpack.i.h.bf16 %v6990_v24  ;;  %v6991_v1 = vunpack.i.l.bf16 %v6990_v24 }
0x1d15   : > { %v6017_v34 = vrot.slane %v6994_v55, 4  ;;  %v5388_v59 = vsel %vm1212_vm11, %v5387_v43, %v6991_v1  ;;  %v5389_v30 = vrot.slane %v6991_v1, 4  ;;  %v6016_v14 = vsel %vm1212_vm11, %v6015_v12, %v6994_v55 }
0x1d16   : > { %v5394_v11 = vperm.slane %v5388_v59, %v7714_v33  ;;  %v6022_v50 = vperm.slane %v6016_v14, %v7714_v33 }
0x1d17   : > { %v5390_v48 = vsel %vm1212_vm11, %v6968_v42, %v5389_v30  ;;  %v6018_v9 = vsel %vm1212_vm11, %v6987_v20, %v6017_v34 }
0x1d18   : > { %v5398_v39 = vperm.slane %v5390_v48, %v7714_v33  ;;  %v5399_v10 = vrot.slane %v5394_v11, 4  ;;  %v5402_v27 = vsel %vm1212_vm11, %v5394_v11, %v5401_v4  ;;  %v6026_v29 = vperm.slane %v6018_v9, %v7714_v33 }
0x1d19   : > { %v5410_v28 = vperm.slane %v5402_v27, %v7725_v16  ;;  %v6027_v6 = vrot.slane %v6022_v50, 4  ;;  %v6030_v44 = vsel %vm1212_vm11, %v6022_v50, %v6029_v57 }
0x1d1a   : > { %v5400_v38 = vsel %vm1212_vm11, %v5399_v10, %v5382_v0  ;;  %v5411_v8 = vrot.slane %v5398_v39, 4  ;;  %v5414_v2 = vsel %vm1212_vm11, %v5398_v39, %v5413_v60  ;;  %v6038_v19 = vperm.slane %v6030_v44, %v7725_v16 }
0x1d1b   : > { %v5406_v31 = vperm.slane %v5400_v38, %v7725_v16  ;;  %v5422_v46 = vperm.slane %v5414_v2, %v7725_v16  ;;  %v5425_v32 = vrot.slane %v5410_v28, 4  ;;  %v6028_v17 = vsel %vm1212_vm11, %v6027_v6, %v6010_v45 }
0x1d1c   : > { %v5412_v23 = vsel %vm1212_vm11, %v5411_v8, %v5386_v5  ;;  %v6034_v47 = vperm.slane %v6028_v17, %v7725_v16  ;;  %v6039_v53 = vrot.slane %v6026_v29, 4  ;;  %v6042_v54 = vsel %vm1212_vm11, %v6026_v29, %v6041_v62 }
0x1d1d   : > { %v5418_v21 = vperm.slane %v5412_v23, %v7725_v16  ;;  %v5423_v26 = vrot.slane %v5406_v31, 4  ;;  %v5426_v40 = vsel %vm1212_vm11, 0.0, %v5425_v32  ;;  %v5429_v61 = vrot.slane %v5422_v46, 4 }
0x1d1e   : > { %v5436_v35 = vrot.slane %v5426_v40, 4  ;;  %v6040_v41 = vsel %vm1212_vm11, %v6039_v53, %v6014_v56  ;;  %v6050_v18 = vperm.slane %v6042_v54, %v7725_v16  ;;  %v6051_v49 = vrot.slane %v6034_v47, 4 }
0x1d1f   : > { %v5427_v37 = vrot.slane %v5418_v21, 4  ;;  %v5430_v58 = vsel %vm1212_vm11, 0.0, %v5429_v61  ;;  %v6046_v20 = vperm.slane %v6040_v41, %v7725_v16  ;;  %v6053_v36 = vrot.slane %v6038_v19, 4 }
0x1d20   : > { %v5447_v42 = vrot.slane %v5430_v58, 4  ;;  %v6057_v22 = vrot.slane %v6050_v18, 4  ;;  %v5424_v25 = vsel %vm1212_vm11, 0.0, %v5423_v26  ;;  %v5431_v52 = vsel %vm1212_vm11, %v5425_v32, %v5406_v31 }
0x1d21   : > { %v6054_v12 = vsel %vm1212_vm11, 0.0, %v6053_v36  ;;  %v6055_v15 = vrot.slane %v6046_v20, 4  ;;  %v5428_v43 = vsel %vm1212_vm11, 0.0, %v5427_v37  ;;  %v5435_v0 = vperm.slane %v5431_v52, %v7714_v33 }
0x1d22   : > { %v6058_v5 = vsel %vm1212_vm11, 0.0, %v6057_v22  ;;  %v6064_v45 = vrot.slane %v6054_v12, 4  ;;  %v5437_v24 = vsel %vm1212_vm11, %v5436_v35, %v5424_v25  ;;  %v5442_v55 = vsel %vm1212_vm11, %v5429_v61, %v5418_v21 }
0x1d23   : > { %v6075_v1 = vrot.slane %v6058_v5, 4  ;;  %v5441_v56 = vperm.slane %v5437_v24, %v7714_v33  ;;  %v5446_v34 = vperm.slane %v5442_v55, %v7714_v33  ;;  %v5448_v59 = vsel %vm1212_vm11, %v5447_v42, %v5428_v43 }
0x1d24   : > { %v5452_v30 = vperm.slane %v5448_v59, %v7714_v33  ;;  %v5455_v14 = vrot.slane %v5435_v0, 4  ;;  %v6052_v4 = vsel %vm1212_vm11, 0.0, %v6051_v49  ;;  %v6056_v11 = vsel %vm1212_vm11, 0.0, %v6055_v15 }
0x1d25   : > { %v5467_v50 = vrot.slane %v5446_v34, 4  ;;  %v6059_v60 = vsel %vm1212_vm11, %v6053_v36, %v6034_v47  ;;  %v6065_v57 = vsel %vm1212_vm11, %v6064_v45, %v6052_v4  ;;  %v6070_v48 = vsel %vm1212_vm11, %v6057_v22, %v6046_v20 }
0x1d26   : > { %v5456_v9 = vsel %vm1212_vm11, %v5441_v56, %v5455_v14  ;;  %v6063_v39 = vperm.slane %v6059_v60, %v7714_v33  ;;  %v6069_v10 = vperm.slane %v6065_v57, %v7714_v33  ;;  %v6074_v27 = vperm.slane %v6070_v48, %v7714_v33 }
0x1d27   : > { %v5464_v29 = vperm.slane %v5456_v9, %v7725_v16  ;;  %v5468_v62 = vsel %vm1212_vm11, %v5452_v30, %v5467_v50  ;;  %v6076_v28 = vsel %vm1212_vm11, %v6075_v1, %v6056_v11  ;;  %v5453_v6 = vrot.slane %v5441_v56, 4 }
0x1d28   : > { %v5476_v44 = vperm.slane %v5468_v62, %v7725_v16  ;;  %v6080_v38 = vperm.slane %v6076_v28, %v7714_v33  ;;  %v6083_v8 = vrot.slane %v6063_v39, 4  ;;  %v6095_v2 = vrot.slane %v6074_v27, 4 }
0x1d29   : > { %v5454_v19 = vsel %vm1212_vm11, %v5453_v6, %v5435_v0  ;;  %v5465_v31 = vrot.slane %v5452_v30, 4  ;;  %v6081_v46 = vrot.slane %v6069_v10, 4  ;;  %v5483_v32 = vrot.slane %v5464_v29, 4 }
0x1d2a   : > { %v5481_v17 = vrot.slane %v5476_v44, 4  ;;  %v6084_v23 = vsel %vm1212_vm11, %v6069_v10, %v6083_v8  ;;  %v6096_v47 = vsel %vm1212_vm11, %v6080_v38, %v6095_v2  ;;  %v5460_v53 = vperm.slane %v5454_v19, %v7725_v16 }
0x1d2b   : > { %v6092_v54 = vperm.slane %v6084_v23, %v7725_v16  ;;  %v6104_v21 = vperm.slane %v6096_v47, %v7725_v16  ;;  %v5466_v33 = vsel %vm1212_vm11, %v5465_v31, %v5446_v34  ;;  %v6082_v26 = vsel %vm1212_vm11, %v6081_v46, %v6063_v39  ;;  %v8722_v34 = vld [vmem:[%s7343_s18 + $0x8] sm:$0xff] }
0x1d2c   : > { %v5482_v40 = vsel %vm1212_vm11, %v5481_v17, %v5464_v29  ;;  %v5472_v61 = vperm.slane %v5466_v33, %v7725_v16  ;;  %v5479_v35 = vrot.slane %v5460_v53, 4  ;;  %v6088_v41 = vperm.slane %v6082_v26, %v7725_v16 }
0x1d2d   : > { %v6109_v18 = vrot.slane %v6104_v21, 4  ;;  %v6093_v49 = vrot.slane %v6080_v38, 4  ;;  %v5484_v37 = vsel %vm1212_vm11, %v5476_v44, %v5483_v32  ;;  %v6111_v58 = vrot.slane %v6092_v54, 4 }
0x1d2e   : > { %v6107_v20 = vrot.slane %v6088_v41, 4  ;;  %v5477_v36 = vrot.slane %v5472_v61, 4  ;;  %v5480_v22 = vsel %vm1212_vm11, %v5472_v61, %v5479_v35 }
0x1d2f   : > { %v6110_v42 = vsel %vm1212_vm11, %v6109_v18, %v6092_v54  ;;  %v6094_v25 = vsel %vm1212_vm11, %v6093_v49, %v6074_v27  ;;  %v6112_v52 = vsel %vm1212_vm11, %v6104_v21, %v6111_v58  ;;  %v6663_v58 = vld [vmem:[%s8008_s12 + $0x30] sm:$0xff] }
0x1d30   : > { %v7000_v12 = vpack.i.bf16 %v6110_v42, %v5482_v40  ;;  %v6100_v15 = vperm.slane %v6094_v25, %v7725_v16  ;;  %v7005_v43 = vpack.i.bf16 %v6112_v52, %v5484_v37  ;;  %v5478_v0 = vsel %vm1212_vm11, %v5477_v36, %v5460_v53  ;;  %v6661_v25 = vld [vmem:[%s8008_s12 + $0x20] sm:$0xff]  ;;  %v6662_v52 = vld [vmem:[%s8008_s12 + $0x28] sm:$0xff] }
0x1d31   : > { %v6130_v16 = vperm.slane %v8722_v34, 3 }
0x1d32   : > { %7001 = vrot.lane.b32.xlu2 %v7000_v12, %s7217_s28  ;;  %v6108_v5 = vsel %vm1212_vm11, %v6100_v15, %v6107_v20  ;;  %7006 = vrot.lane.b32.xlu0 %v7005_v43, %s7215_s26  ;;  %v6105_v45 = vrot.slane %v6100_v15, 4  ;;  %v6664_v20 = vld [vmem:[%s8008_s12 + $0x38] sm:$0xff]  ;;  %v3569_v12 = vpack.c.bf16 %v6662_v52, %v6661_v25 }
0x1d33   : > { %v6995_v24 = vpack.i.bf16 %v6108_v5, %v5480_v22  ;;  %v3570_v36 = vpack.c.bf16 %v6664_v20, %v6663_v58 }
0x1d34   : > { %v6106_v55 = vsel %vm1212_vm11, %v6105_v45, %v6088_v41 }
0x1d35   : > { %6996 = vrot.lane.b32.xlu1 %v6995_v24, %s7216_s27  ;;  %6273 = vmatpush.bf16.msra.mxu3 %v3570_v36 }
0x1d39   : > { %6274 = vmatpush.bf16.msra.mxu3 %v3569_v12 }
0x1d40   : > { %v6146_v1 = vpop.f32.mrf.mxu2 }
0x1d41   : > { %v6147_v30 = vadd.f32 %v6146_v1, %v6130_v16 }
0x1d43   : > { %v6156_v4 = vadd.f32 %v6147_v30, %v8123_v7 }
0x1d45   : > { %v6160_v50 = vsel %vm535_vm4, %v6156_v4, 0.0 }
0x1d48   : > { %v6148_v56 = vpop.f32.mrf.mxu2 }
0x1d49   : > { %v6149_v59 = vadd.f32 %v6148_v56, %v6130_v16 }
0x1d4b   : > { %v6157_v14 = vadd.f32 %v6149_v59, %v8126_v13 }
0x1d4d   : > { %v6163_v11 = vsel %vm535_vm4, %v6157_v14, 0.0 }
0x1d5b   : > { %6164 = vadd.xlane.f32.xlu2 %v6163_v11 }
0x1d5f   : > { %6161 = vadd.xlane.f32.xlu1 %v6160_v50 }
0x1d8c   : > { %v7002_v60 = vpop.permute.xlu2 %7001 }
0x1d8d   : > { %v7004_v10 = vunpack.i.h.bf16 %v7002_v60  ;;  %v7003_v27 = vunpack.i.l.bf16 %v7002_v60 }
0x1da4   : > { %v7007_v48 = vpop.permute.xlu0 %7006 }
0x1da5   : > { %v7009_v13 = vunpack.i.h.bf16 %v7007_v48  ;;  %v7008_v28 = vunpack.i.l.bf16 %v7007_v48 }
0x1da7   : > { %v6997_v57 = vpop.permute.xlu1 %6996 }
0x1da8   : > { %v6999_v9 = vunpack.i.h.bf16 %v6997_v57  ;;  %v6998_v39 = vunpack.i.l.bf16 %v6997_v57 }
0x1daa   : > { %v5497_v29 = vsel %vm796_vm3, %v5478_v0, %v6998_v39  ;;  %v6125_v62 = vsel %vm796_vm3, %v6106_v55, %v6999_v9 }
0x1dab   : > { %v5498_v7 = vsel %vm1335_vm12, %v5497_v29, %v7003_v27  ;;  %v6126_v6 = vsel %vm1335_vm12, %v6125_v62, %v7004_v10  ;;  %v6248_v27 = vperm.slane %v8722_v34, 4 }
0x1dac   : > { %v5499_v44 = vsel %vm1337_vm13, %v5498_v7, %v7008_v28  ;;  %v6127_v38 = vsel %vm1337_vm13, %v6126_v6, %v7009_v13  ;;  %v6253_v28 = vperm.slane %v8722_v34, 5 }
0x1dad   : > { %v6129_v8 = vpack.c.bf16 %v6127_v38, %v5499_v44 }
0x1daf   : > { %6708 = vmatmul.msk.bf16.gmra.mxu2 %vm535_vm4, %v6129_v8 }
0x1dce   : > { %v6165_v17 = vpop.xlane.xlu2 %6164 }
0x1dcf   : > { %v6173_v47 = vmul.f32 %v6165_v17, %v7317_v51 }
0x1dd1   : > { %v8744_v21 = vsub.f32 %v6157_v14, %v6173_v47 }
0x1dd2   : > { %v6162_v2 = vpop.xlane.xlu1 %6161 }
0x1dd3   : > { %v6172_v19 = vmul.f32 %v6162_v2, %v7317_v51  ;;  %v6181_v61 = vmul.f32 %v8744_v21, %v8744_v21 }
0x1dd5   : > { %v8737_v31 = vsub.f32 %v6156_v4, %v6172_v19  ;;  %v6187_v41 = vsel %vm535_vm4, %v6181_v61, 0.0 }
0x1dd7   : > { %v6180_v46 = vmul.f32 %v8737_v31, %v8737_v31 }
0x1dd9   : > { %v6184_v32 = vsel %vm535_vm4, %v6180_v46, 0.0 }
0x1dda   : > { %6185 = vadd.xlane.f32.xlu2 %v6184_v32 }
0x1e32   : > { %v6151_v23 = vpop.f32.mrf.mxu2 }
0x1e33   : > { %v6152_v53 = vadd.f32 %v6151_v23, %v6130_v16 }
0x1e35   : > { %v6158_v54 = vadd.f32 %v6152_v53, %v8192_v3 }
0x1e37   : > { %v6166_v33 = vsel %vm535_vm4, %v6158_v54, 0.0 }
0x1e38   : > { %6167 = vadd.xlane.f32.xlu0 %v6166_v33 }
0x1e3a   : > { %v6153_v26 = vpop.f32.mrf.mxu2 }
0x1e3b   : > { %v6154_v40 = vadd.f32 %v6153_v26, %v6130_v16 }
0x1e3d   : > { %v6159_v35 = vadd.f32 %v6154_v40, %v8195_v63 }
0x1e3f   : > { %v6169_v3 = vsel %vm535_vm4, %v6159_v35, 0.0 }
0x1e40   : > { %6188 = vadd.xlane.f32.xlu0 %v6187_v41  ;;  %6170 = vadd.xlane.f32.xlu1 %v6169_v3 }
0x1e4d   : > { %v6186_v18 = vpop.xlane.xlu2 %6185 }
0x1e4e   : > { %v6196_v49 = vmul.f32 %v6186_v18, %v7317_v51 }
0x1e50   : > { %v6200_v37 = vadd.f32 1e-12, %v6196_v49 }
0x1e52   : > { %7172 = vrsqrt.f32 %v6200_v37  ;;  %vm6210_vm3 = vweird.f32 %v6200_v37 }
0x1e58   : > { %v7173_v22 = vpop.eup %7172 }
0x1e59   : > { %v6205_v43 = vmul.f32 %v7173_v22, %v6200_v37  ;;  %vm6211_vm1 = vweird.f32 %v7173_v22 }
0x1e5a   : > { %vm6212_vm11 = vmor %vm6210_vm3, %vm6211_vm1 }
0x1e5b   : > { %v6206_v45 = vmul.f32 %v7173_v22, %v6205_v43  ;;  %v6670_v43 = vld [vmem:[%s8047_s16 + $0x68] sm:$0xff] }
0x1e5d   : > { %v6207_v30 = vmul.f32 0.5, %v6206_v45  ;;  %v6667_v45 = vld [vmem:[%s8047_s16 + $0x50] sm:$0xff] }
0x1e5f   : > { %v6208_v11 = vsub.f32 1.5, %v6207_v30 }
0x1e61   : > { %v6209_v60 = vmul.f32 %v7173_v22, %v6208_v11 }
0x1e63   : > { %v6213_v9 = vsel %vm6212_vm11, %v7173_v22, %v6209_v60  ;;  %v6672_v22 = vld [vmem:[%s8047_s16 + $0x78] sm:$0xff] }
0x1e64   : > { %v6244_v29 = vmul.f32 %v6213_v9, %v8737_v31 }
0x1e66   : > { %v6249_v7 = vmul.f32 %v6248_v27, %v6244_v29 }
0x1e68   : > { %v8770_v38 = vadd.f32 %v6253_v28, %v6249_v7 }
0x1eab   : > { %v6168_v42 = vpop.xlane.xlu0 %6167 }
0x1eac   : > { %v6174_v63 = vmul.f32 %v6168_v42, %v7317_v51  ;;  %v6671_v42 = vld [vmem:[%s8047_s16 + $0x70] sm:$0xff] }
0x1eae   : > { %v8758_v15 = vsub.f32 %v6158_v54, %v6174_v63  ;;  %v3583_v63 = vpack.c.bf16 %v6672_v22, %v6671_v42 }
0x1eb0   : > { %v6182_v0 = vmul.f32 %v8758_v15, %v8758_v15  ;;  %6335 = vmatpush.bf16.msrb.mxu1 %v3583_v63 }
0x1eb2   : > { %v6190_v5 = vsel %vm535_vm4, %v6182_v0, 0.0 }
0x1eb3   : > { %v6189_v24 = vpop.xlane.xlu0 %6188  ;;  %6191 = vadd.xlane.f32.xlu1 %v6190_v5  ;;  %v6171_v55 = vpop.xlane.xlu1 %6170 }
0x1eb4   : > { %v6197_v1 = vmul.f32 %v6189_v24, %v7317_v51  ;;  %v6175_v56 = vmul.f32 %v6171_v55, %v7317_v51  ;;  %v6668_v24 = vld [vmem:[%s8047_s16 + $0x58] sm:$0xff] }
0x1eb5   : > { %v3581_v55 = vpack.c.bf16 %v6668_v24, %v6667_v45 }
0x1eb6   : > { %v6201_v16 = vadd.f32 1e-12, %v6197_v1  ;;  %v6179_v59 = vsub.f32 %v6159_v35, %v6175_v56  ;;  %v6665_v1 = vld [vmem:[%s8047_s16 + $0x40] sm:$0xff]  ;;  %v6666_v56 = vld [vmem:[%s8047_s16 + $0x48] sm:$0xff] }
0x1eb8   : > { %7174 = vrsqrt.f32 %v6201_v16  ;;  %v6183_v14 = vmul.f32 %v6179_v59, %v6179_v59  ;;  %vm6220_vm13 = vweird.f32 %v6201_v16 }
0x1eba   : > { %v6193_v4 = vsel %vm535_vm4, %v6183_v14, 0.0 }
0x1ebb   : > { %6194 = vadd.xlane.f32.xlu2 %v6193_v4 }
0x1ebe   : > { %v7175_v50 = vpop.eup %7174 }
0x1ebf   : > { %v6215_v57 = vmul.f32 %v7175_v50, %v6201_v16  ;;  %vm6221_vm12 = vweird.f32 %v7175_v50  ;;  %v6260_v16 = vperm.slane %v8722_v34, 6 }
0x1ec0   : > { %vm6222_vm8 = vmor %vm6220_vm13, %vm6221_vm12 }
0x1ec1   : > { %v6216_v48 = vmul.f32 %v7175_v50, %v6215_v57 }
0x1ec3   : > { %v6217_v39 = vmul.f32 0.5, %v6216_v48 }
0x1ec5   : > { %v6218_v10 = vsub.f32 1.5, %v6217_v39 }
0x1ec7   : > { %v6219_v62 = vmul.f32 %v7175_v50, %v6218_v10 }
0x1ec9   : > { %v6223_v13 = vsel %vm6222_vm8, %v7175_v50, %v6219_v62 }
0x1eca   : > { %v6245_v6 = vmul.f32 %v6223_v13, %v8744_v21 }
0x1ecc   : > { %v6250_v44 = vmul.f32 %v6248_v27, %v6245_v6 }
0x1ece   : > { %v8772_v8 = vadd.f32 %v6253_v28, %v6250_v44 }
0x1ed0   : > { %v6258_v2 = vpack.c.bf16 %v8772_v8, %v8770_v38 }
0x1ed2   : > { %6709 = vmatmul.msk.bf16.vlgmr.msra.gmra.mxu3 %vm535_vm4, %v6258_v2 }
0x1f26   : > { %v6192_v19 = vpop.xlane.xlu1 %6191 }
0x1f27   : > { %v6198_v31 = vmul.f32 %v6192_v19, %v7317_v51 }
0x1f29   : > { %v6202_v46 = vadd.f32 1e-12, %v6198_v31 }
0x1f2b   : > { %7176 = vrsqrt.f32 %v6202_v46  ;;  %vm6230_vm10 = vweird.f32 %v6202_v46 }
0x1f2e   : > { %v6195_v32 = vpop.xlane.xlu2 %6194 }
0x1f2f   : > { %v6199_v17 = vmul.f32 %v6195_v32, %v7317_v51 }
0x1f31   : > { %v7177_v23 = vpop.eup %7176  ;;  %v6203_v47 = vadd.f32 1e-12, %v6199_v17 }
0x1f32   : > { %v6225_v53 = vmul.f32 %v7177_v23, %v6202_v46  ;;  %vm6231_vm9 = vweird.f32 %v7177_v23 }
0x1f33   : > { %7178 = vrsqrt.f32 %v6203_v47  ;;  %vm6232_vm14 = vmor %vm6230_vm10, %vm6231_vm9  ;;  %vm6240_vm0 = vweird.f32 %v6203_v47 }
0x1f34   : > { %v6226_v54 = vmul.f32 %v7177_v23, %v6225_v53 }
0x1f36   : > { %v6227_v21 = vmul.f32 0.5, %v6226_v54 }
0x1f38   : > { %v6228_v33 = vsub.f32 1.5, %v6227_v21 }
0x1f39   : > { %v7179_v26 = vpop.eup %7178 }
0x1f3a   : > { %v6229_v40 = vmul.f32 %v7177_v23, %v6228_v33  ;;  %v6235_v61 = vmul.f32 %v7179_v26, %v6203_v47  ;;  %vm6241_vm15 = vweird.f32 %v7179_v26 }
0x1f3b   : > { %vm6242_vm5 = vmor %vm6240_vm0, %vm6241_vm15  ;;  %vm6463_vm15 = vcmask 1041408   ;;  %vm6465_vm0 = vcmask 1042432  }
0x1f3c   : > { %v6236_v35 = vmul.f32 %v7179_v26, %v6235_v61  ;;  %v6233_v41 = vsel %vm6232_vm14, %v7177_v23, %v6229_v40  ;;  %vm6461_vm14 = vcmask 1040384  }
0x1f3d   : > { %v6246_v49 = vmul.f32 %v6233_v41, %v8758_v15  ;;  %v6669_v15 = vld [vmem:[%s8047_s16 + $0x60] sm:$0xff] }
0x1f3e   : > { %v6237_v3 = vmul.f32 0.5, %v6236_v35  ;;  %v3582_v0 = vpack.c.bf16 %v6670_v43, %v6669_v15 }
0x1f3f   : > { %v6251_v36 = vmul.f32 %v6248_v27, %v6246_v49 }
0x1f40   : > { %v6238_v18 = vsub.f32 1.5, %v6237_v3  ;;  %6336 = vmatpush.bf16.msrb.mxu1 %v3582_v0 }
0x1f41   : > { %v8782_v52 = vadd.f32 %v6253_v28, %v6251_v36 }
0x1f42   : > { %v6239_v37 = vmul.f32 %v7179_v26, %v6238_v18 }
0x1f44   : > { %v6243_v58 = vsel %vm6242_vm5, %v7179_v26, %v6239_v37  ;;  %6337 = vmatpush.bf16.msrb.mxu1 %v3581_v55  ;;  %vm6467_vm5 = vcmask 257024  }
0x1f45   : > { %v6247_v20 = vmul.f32 %v6243_v58, %v6179_v59  ;;  %v3580_v59 = vpack.c.bf16 %v6666_v56, %v6665_v1 }
0x1f47   : > { %v6252_v25 = vmul.f32 %v6248_v27, %v6247_v20 }
0x1f48   : > { %6338 = vmatpush.bf16.msrb.mxu1 %v3580_v59 }
0x1f49   : > { %v8784_v12 = vadd.f32 %v6253_v28, %v6252_v25  ;;  %v6324_v25 = vperm.slane %v8722_v34, 7 }
0x1f4b   : > { %v6259_v5 = vpack.c.bf16 %v8784_v12, %v8782_v52 }
0x1f4d   : > { %6710 = vmatmul.msk.bf16.gmra.mxu3 %vm535_vm4, %v6259_v5 }
0x1f55   : > { %v6276_v30 = vpop.f32.mrf.mxu3 }
0x1f56   : > { %v6277_v14 = vadd.f32 %v6276_v30, %v6260_v16 }
0x1f58   : > { %v6290_v4 = vmul.f32 0.044715, %v6277_v14  ;;  %v6286_v6 = vmul.f32 0.5, %v6277_v14 }
0x1f5a   : > { %v6294_v11 = vmul.f32 %v6290_v4, %v6277_v14 }
0x1f5c   : > { %v6298_v50 = vmul.f32 %v6294_v11, %v6277_v14 }
0x1f5d   : > { %v6278_v60 = vpop.f32.mrf.mxu3 }
0x1f5e   : > { %v6302_v57 = vadd.f32 %v6298_v50, %v6277_v14  ;;  %v6279_v48 = vadd.f32 %v6278_v60, %v6260_v16 }
0x1f60   : > { %v6291_v9 = vmul.f32 0.044715, %v6279_v48  ;;  %v6306_v39 = vmul.f32 0.7978846, %v6302_v57  ;;  %v6287_v44 = vmul.f32 0.5, %v6279_v48 }
0x1f62   : > { %v6295_v10 = vmul.f32 %v6291_v9, %v6279_v48  ;;  %7180 = vtanh.f32 %v6306_v39 }
0x1f64   : > { %v6299_v27 = vmul.f32 %v6295_v10, %v6279_v48 }
0x1f66   : > { %v6303_v29 = vadd.f32 %v6299_v27, %v6279_v48 }
0x1f68   : > { %v6307_v62 = vmul.f32 0.7978846, %v6303_v29  ;;  %v7181_v13 = vpop.eup %7180 }
0x1f69   : > { %v6314_v28 = vadd.f32 1.0, %v7181_v13 }
0x1f6a   : > { %7182 = vtanh.f32 %v6307_v62 }
0x1f6b   : > { %v6318_v19 = vmul.f32 %v6314_v28, %v6286_v6 }
0x1f70   : > { %v7183_v7 = vpop.eup %7182 }
0x1f71   : > { %v6315_v2 = vadd.f32 1.0, %v7183_v7 }
0x1f73   : > { %v6319_v31 = vmul.f32 %v6315_v2, %v6287_v44 }
0x1f75   : > { %v6322_v46 = vpack.c.bf16 %v6319_v31, %v6318_v19 }
0x1f77   : > { %6711 = vmatmul.msk.bf16.vlgmr.msrb.gmra.mxu1 %vm505_vm2, %v6322_v46 }
0x1fd0   : > { %v6281_v32 = vpop.f32.mrf.mxu3 }
0x1fd1   : > { %v6282_v17 = vadd.f32 %v6281_v32, %v6260_v16 }
0x1fd3   : > { %v6292_v23 = vmul.f32 0.044715, %v6282_v17  ;;  %v6288_v58 = vmul.f32 0.5, %v6282_v17 }
0x1fd5   : > { %v6296_v47 = vmul.f32 %v6292_v23, %v6282_v17 }
0x1fd7   : > { %v6300_v53 = vmul.f32 %v6296_v47, %v6282_v17 }
0x1fd8   : > { %v6283_v54 = vpop.f32.mrf.mxu3 }
0x1fd9   : > { %v6304_v21 = vadd.f32 %v6300_v53, %v6282_v17  ;;  %v6284_v33 = vadd.f32 %v6283_v54, %v6260_v16 }
0x1fdb   : > { %v6293_v26 = vmul.f32 0.044715, %v6284_v33  ;;  %v6308_v40 = vmul.f32 0.7978846, %v6304_v21  ;;  %v6289_v20 = vmul.f32 0.5, %v6284_v33 }
0x1fdd   : > { %v6297_v61 = vmul.f32 %v6293_v26, %v6284_v33  ;;  %7184 = vtanh.f32 %v6308_v40 }
0x1fdf   : > { %v6301_v35 = vmul.f32 %v6297_v61, %v6284_v33 }
0x1fe1   : > { %v6305_v41 = vadd.f32 %v6301_v35, %v6284_v33 }
0x1fe3   : > { %v6309_v3 = vmul.f32 0.7978846, %v6305_v41  ;;  %v7185_v18 = vpop.eup %7184 }
0x1fe4   : > { %v6316_v49 = vadd.f32 1.0, %v7185_v18 }
0x1fe5   : > { %7186 = vtanh.f32 %v6309_v3 }
0x1fe6   : > { %v6320_v42 = vmul.f32 %v6316_v49, %v6288_v58 }
0x1feb   : > { %v7187_v37 = vpop.eup %7186 }
0x1fec   : > { %v6317_v36 = vadd.f32 1.0, %v7187_v37 }
0x1fee   : > { %v6321_v22 = vmul.f32 %v6317_v36, %v6289_v20 }
0x1ff0   : > { %v6323_v63 = vpack.c.bf16 %v6321_v22, %v6320_v42 }
0x1ff2   : > { %6712 = vmatmul.msk.bf16.gmra.mxu1 %vm505_vm2, %v6323_v63 }
0x1ff4   : > { %v6340_v15 = vpop.f32.mrf.mxu1 }
0x1ff5   : > { %v6341_v43 = vadd.f32 %v6340_v15, %v6324_v25 }
0x1ff7   : > { %v6350_v0 = vadd.f32 %v6341_v43, %v8770_v38 }
0x1ff9   : > { %v6354_v5 = vsel %vm535_vm4, %v6350_v0, 0.0 }
0x1ffa   : > { %6355 = vadd.xlane.f32.xlu2 %v6354_v5 }
0x1ffc   : > { %v6342_v45 = vpop.f32.mrf.mxu1 }
0x1ffd   : > { %v6343_v24 = vadd.f32 %v6342_v45, %v6324_v25 }
0x1fff   : > { %v6351_v55 = vadd.f32 %v6343_v24, %v8772_v8 }
0x2001   : > { %v6357_v1 = vsel %vm535_vm4, %v6351_v55, 0.0 }
0x2002   : > { %6358 = vadd.xlane.f32.xlu0 %v6357_v1 }
0x206d   : > { %v6356_v30 = vpop.xlane.xlu2 %6355 }
0x206e   : > { %v6366_v11 = vmul.f32 %v6356_v30, %v7317_v51 }
0x206f   : > { %v6345_v56 = vpop.f32.mrf.mxu1 }
0x2070   : > { %v6346_v16 = vadd.f32 %v6345_v56, %v6324_v25  ;;  %v8812_v48 = vsub.f32 %v6350_v0, %v6366_v11 }
0x2072   : > { %v6352_v34 = vadd.f32 %v6346_v16, %v8782_v52  ;;  %v6374_v39 = vmul.f32 %v8812_v48, %v8812_v48 }
0x2074   : > { %v6360_v59 = vsel %vm535_vm4, %v6352_v34, 0.0  ;;  %v6378_v10 = vsel %vm535_vm4, %v6374_v39, 0.0 }
0x2075   : > { %v6359_v14 = vpop.xlane.xlu0 %6358  ;;  %6361 = vadd.xlane.f32.xlu1 %v6360_v59 }
0x2076   : > { %v6367_v38 = vmul.f32 %v6359_v14, %v7317_v51 }
0x2077   : > { %v6347_v4 = vpop.f32.mrf.mxu1 }
0x2078   : > { %v8807_v50 = vsub.f32 %v6351_v55, %v6367_v38  ;;  %v6348_v8 = vadd.f32 %v6347_v4, %v6324_v25 }
0x207a   : > { %v6353_v60 = vadd.f32 %v6348_v8, %v8784_v12  ;;  %v6375_v57 = vmul.f32 %v8807_v50, %v8807_v50 }
0x207c   : > { %v6363_v52 = vsel %vm535_vm4, %v6353_v60, 0.0  ;;  %v6381_v9 = vsel %vm535_vm4, %v6375_v57, 0.0 }
0x207d   : > { %6364 = vadd.xlane.f32.xlu0 %v6363_v52  ;;  %6382 = vadd.xlane.f32.xlu1 %v6381_v9 }
0x2085   : > { %6379 = vadd.xlane.f32.xlu0 %v6378_v10 }
0x20e8   : > { %v6362_v27 = vpop.xlane.xlu1 %6361 }
0x20e9   : > { %v6368_v12 = vmul.f32 %v6362_v27, %v7317_v51 }
0x20eb   : > { %v6372_v29 = vsub.f32 %v6352_v34, %v6368_v12 }
0x20ed   : > { %v6376_v62 = vmul.f32 %v6372_v29, %v6372_v29 }
0x20ef   : > { %v6384_v13 = vsel %vm535_vm4, %v6376_v62, 0.0 }
0x20f0   : > { %v6365_v28 = vpop.xlane.xlu0 %6364  ;;  %6385 = vadd.xlane.f32.xlu2 %v6384_v13  ;;  %v6383_v19 = vpop.xlane.xlu1 %6382 }
0x20f1   : > { %v6369_v7 = vmul.f32 %v6365_v28, %v7317_v51  ;;  %v6391_v46 = vmul.f32 %v6383_v19, %v7317_v51 }
0x20f3   : > { %v8822_v6 = vsub.f32 %v6353_v60, %v6369_v7  ;;  %v6395_v17 = vadd.f32 1e-12, %v6391_v46 }
0x20f5   : > { %v6377_v44 = vmul.f32 %v8822_v6, %v8822_v6  ;;  %7188 = vrsqrt.f32 %v6395_v17  ;;  %vm6414_vm6 = vweird.f32 %v6395_v17 }
0x20f7   : > { %v6387_v2 = vsel %vm535_vm4, %v6377_v44, 0.0 }
0x20f8   : > { %6388 = vadd.xlane.f32.xlu1 %v6387_v2  ;;  %v6380_v31 = vpop.xlane.xlu0 %6379 }
0x20f9   : > { %v6390_v32 = vmul.f32 %v6380_v31, %v7317_v51 }
0x20fb   : > { %v6394_v23 = vadd.f32 1e-12, %v6390_v32  ;;  %v7189_v47 = vpop.eup %7188 }
0x20fc   : > { %v6409_v54 = vmul.f32 %v7189_v47, %v6395_v17  ;;  %vm6415_vm2 = vweird.f32 %v7189_v47 }
0x20fd   : > { %7190 = vrsqrt.f32 %v6394_v23  ;;  %vm6416_vm1 = vmor %vm6414_vm6, %vm6415_vm2  ;;  %vm6404_vm3 = vweird.f32 %v6394_v23 }
0x20fe   : > { %v6410_v61 = vmul.f32 %v7189_v47, %v6409_v54 }
0x2100   : > { %v6411_v41 = vmul.f32 0.5, %v6410_v61 }
0x2102   : > { %v6412_v20 = vsub.f32 1.5, %v6411_v41 }
0x2103   : > { %v7191_v53 = vpop.eup %7190 }
0x2104   : > { %v6399_v26 = vmul.f32 %v7191_v53, %v6394_v23  ;;  %v6413_v63 = vmul.f32 %v7189_v47, %v6412_v20  ;;  %vm6405_vm4 = vweird.f32 %v7191_v53 }
0x2105   : > { %vm6406_vm11 = vmor %vm6404_vm3, %vm6405_vm4 }
0x2106   : > { %v6400_v35 = vmul.f32 %v7191_v53, %v6399_v26  ;;  %v6417_v5 = vsel %vm6416_vm1, %v7189_v47, %v6413_v63 }
0x2107   : > { %v6439_v34 = vmul.f32 %v6417_v5, %v8807_v50 }
0x2108   : > { %v6401_v49 = vmul.f32 0.5, %v6400_v35 }
0x210a   : > { %v6402_v42 = vsub.f32 1.5, %v6401_v49 }
0x210c   : > { %v6403_v15 = vmul.f32 %v7191_v53, %v6402_v42 }
0x210e   : > { %v6407_v55 = vsel %vm6406_vm11, %v7191_v53, %v6403_v15 }
0x210f   : > { %v6438_v14 = vmul.f32 %v6407_v55, %v8812_v48 }
0x2163   : > { %v6386_v21 = vpop.xlane.xlu2 %6385 }
0x2164   : > { %v6392_v33 = vmul.f32 %v6386_v21, %v7317_v51 }
0x2166   : > { %v6396_v40 = vadd.f32 1e-12, %v6392_v33 }
0x2168   : > { %7192 = vrsqrt.f32 %v6396_v40  ;;  %vm6424_vm12 = vweird.f32 %v6396_v40 }
0x216b   : > { %v6389_v3 = vpop.xlane.xlu1 %6388 }
0x216c   : > { %v6393_v18 = vmul.f32 %v6389_v3, %v7317_v51  ;;  %v413_v51 = vld [vmem:[%s7343_s18 + $0x10] sm:$0x3] }
0x216d   : > { %v6442_v16 = vperm.slane %v413_v51, 0  ;;  %v6447_v11 = vperm.slane %v413_v51, 1 }
0x216e   : > { %v7193_v37 = vpop.eup %7192  ;;  %v6397_v58 = vadd.f32 1e-12, %v6393_v18 }
0x216f   : > { %v6419_v36 = vmul.f32 %v7193_v37, %v6396_v40  ;;  %vm6425_vm7 = vweird.f32 %v7193_v37  ;;  %v6444_v8 = vmul.f32 %v6442_v16, %v6439_v34  ;;  %v6443_v57 = vmul.f32 %v6442_v16, %v6438_v14 }
0x2170   : > { %7194 = vrsqrt.f32 %v6397_v58  ;;  %vm6426_vm13 = vmor %vm6424_vm12, %vm6425_vm7  ;;  %vm6434_vm9 = vweird.f32 %v6397_v58 }
0x2171   : > { %v6420_v22 = vmul.f32 %v7193_v37, %v6419_v36  ;;  %v6449_v39 = vadd.f32 %v6447_v11, %v6444_v8  ;;  %v6448_v50 = vadd.f32 %v6447_v11, %v6443_v57 }
0x2173   : > { %v6421_v25 = vmul.f32 0.5, %v6420_v22  ;;  %v6453_v48 = vrot.slane %v6449_v39, 7 }
0x2175   : > { %v6422_v43 = vsub.f32 1.5, %v6421_v25  ;;  %v6462_v62 = vsel %vm6461_vm14, %v6448_v50, %v6453_v48 }
0x2176   : > { %v7195_v0 = vpop.eup %7194 }
0x2177   : > { %v6423_v45 = vmul.f32 %v7193_v37, %v6422_v43  ;;  %v6429_v24 = vmul.f32 %v7195_v0, %v6397_v58  ;;  %vm6435_vm8 = vweird.f32 %v7195_v0 }
0x2178   : > { %vm6436_vm10 = vmor %vm6434_vm9, %vm6435_vm8 }
0x2179   : > { %v6427_v1 = vsel %vm6426_vm13, %v7193_v37, %v6423_v45  ;;  %v6430_v56 = vmul.f32 %v7195_v0, %v6429_v24 }
0x217a   : > { %v6440_v59 = vmul.f32 %v6427_v1, %v6372_v29 }
0x217b   : > { %v6431_v30 = vmul.f32 0.5, %v6430_v56 }
0x217c   : > { %v6445_v38 = vmul.f32 %v6442_v16, %v6440_v59 }
0x217d   : > { %v6432_v4 = vsub.f32 1.5, %v6431_v30 }
0x217e   : > { %v6450_v52 = vadd.f32 %v6447_v11, %v6445_v38 }
0x217f   : > { %v6433_v60 = vmul.f32 %v7195_v0, %v6432_v4 }
0x2180   : > { %v6456_v12 = vrot.slane %v6450_v52, 6 }
0x2181   : > { %v6437_v9 = vsel %vm6436_vm10, %v7195_v0, %v6433_v60 }
0x2182   : > { %v6441_v10 = vmul.f32 %v6437_v9, %v8822_v6  ;;  %v6464_v28 = vsel %vm6463_vm15, %v6462_v62, %v6456_v12 }
0x2184   : > { %v6446_v27 = vmul.f32 %v6442_v16, %v6441_v10 }
0x2186   : > { %v6451_v29 = vadd.f32 %v6447_v11, %v6446_v27 }
0x2188   : > { %v6459_v13 = vrot.slane %v6451_v29, 5 }
0x218a   : > { %v6466_v7 = vsel %vm6465_vm0, %v6464_v28, %v6459_v13 }
0x218b   : > { %6468 = vst.msk [vmem:[%s396_s19] sm:$0xf] %vm6467_vm5, %v6466_v7 }
0x218c PF: > { %s17_s24 = sadd.s32 1, %s7204_s24  }
0x218d   : > { %p14_p4 = scmp.ge.s32.totalorder %s17_s24, 4  }
0x218f   :  { %16 = sbr.rel (!%p14_p4) target bundleno = 1 (0x1), region = 100 }

</bundles_post_ra>
